<compile_context>
chip_gen: v6e
topology: v6e:2x2x1
jax: 0.10.0
libtpu: 0.0.40
codegen_flags: <defaults>
</compile_context>

<pallas_src>
import functools

import jax
import jax.numpy as jnp
from jax.experimental import pallas as pl
from jax.experimental.pallas import tpu as pltpu


# ----------------------------------------------------------------------------
# In-kernel helpers
# ----------------------------------------------------------------------------
def _add_layernorm(a, b, gamma, beta, *, eps):
    """LayerNorm(a + b) in f32; centered tensor computed once and reused."""
    z = a + b
    mu = jnp.mean(z, axis=-1, keepdims=True)
    zc = z - mu
    var = jnp.mean(zc * zc, axis=-1, keepdims=True)
    return zc * jax.lax.rsqrt(var + eps) * gamma + beta


def _mha(q_src_bf, k_src_bf, v_src_bf, wq, wk, wv, wfc, bfc,
         *, n_batch, n_heads, head_dim, q_len, k_len):
    """Multi-head attention for a block of `n_batch` sequences.

    q_src_bf: (n_batch*q_len, E) bf16, k_src_bf/v_src_bf: (n_batch*k_len, E) bf16.
    wq/wk/wv: (D, D) bf16 (pre-transposed Linear weights, shared across heads,
    exactly like the PyTorch module). wfc: (E, E) bf16, bfc: (1, E) f32.

    Head split = static lane slices feeding matmuls; head merge is fused into
    the output projection (no slab, no stack, no masked stores).
    Returns (n_batch*q_len, E) f32.
    """
    D = head_dim
    # bug-for-bug: reference divides scores by k_len**(-1/2)  ==  * sqrt(k_len)
    scale = jnp.float32(float(k_len) ** 0.5)

    # per-head projections, row-batched over all n_batch*len rows
    qs, ks, vs = [], [], []
    for h in range(n_heads):
        lo, hi = h * D, (h + 1) * D
        qh = jnp.dot(q_src_bf[:, lo:hi], wq, preferred_element_type=jnp.float32)
        qs.append((qh * scale).astype(jnp.bfloat16))           # scale folded here
        ks.append(jnp.dot(k_src_bf[:, lo:hi], wk,
                          preferred_element_type=jnp.float32).astype(jnp.bfloat16))
        vs.append(jnp.dot(v_src_bf[:, lo:hi], wv,
                          preferred_element_type=jnp.float32).astype(jnp.bfloat16))

    outs = []
    for b in range(n_batch):
        qr = slice(b * q_len, (b + 1) * q_len)
        kr = slice(b * k_len, (b + 1) * k_len)
        acc = None
        for h in range(n_heads):
            # scores (Lq, Lk) in f32 on the MXU
            s = jnp.einsum('qd,kd->qk', qs[h][qr], ks[h][kr],
                           preferred_element_type=jnp.float32)
            s = s - jnp.max(s, axis=-1, keepdims=True)
            p = jnp.exp(s)
            p = p * pl.reciprocal(jnp.sum(p, axis=-1, keepdims=True), approx=True)
            ctx = jnp.dot(p.astype(jnp.bfloat16), vs[h][kr],
                          preferred_element_type=jnp.float32)          # (Lq, D)
            # fused head-merge + output projection: ctx_h @ Wfc.T[hD:(h+1)D, :]
            contrib = jnp.dot(ctx.astype(jnp.bfloat16), wfc[h * D:(h + 1) * D, :],
                              preferred_element_type=jnp.float32)      # (Lq, E)
            acc = contrib if acc is None else acc + contrib
        outs.append(acc + bfc)
    return outs[0] if n_batch == 1 else jnp.concatenate(outs, axis=0)


# ----------------------------------------------------------------------------
# Fused decoder-block kernel (one pallas_call for the whole module)
# ----------------------------------------------------------------------------
def _decoder_block_kernel(
        x_ref, k_ref, v_ref,
        sa_wq, sa_wk, sa_wv, sa_wfc, sa_bfc, n0_g, n0_b,
        ca_wq, ca_wk, ca_wv, ca_wfc, ca_bfc, n1_g, n1_b,
        w1, b1, w2, b2, n2_g, n2_b,
        o_ref, *, n_heads, eps):
    Bb, Lt, E = x_ref.shape
    Ls = k_ref.shape[1]
    D = E // n_heads

    # activations: f32 copies kept for residuals, one bf16 cast for matmuls
    x = x_ref[...].reshape(Bb * Lt, E)                       # f32
    x_bf = x.astype(jnp.bfloat16)
    k_bf = k_ref[...].reshape(Bb * Ls, E).astype(jnp.bfloat16)
    v_bf = v_ref[...].reshape(Bb * Ls, E).astype(jnp.bfloat16)

    mha = functools.partial(_mha, n_batch=Bb, n_heads=n_heads, head_dim=D)

    # --- self attention (trg_mask has no effect in the reference) + add & norm
    att = mha(x_bf, x_bf, x_bf,
              sa_wq[...], sa_wk[...], sa_wv[...], sa_wfc[...], sa_bfc[...],
              q_len=Lt, k_len=Lt)
    q = _add_layernorm(att, x, n0_g[...], n0_b[...], eps=eps)   # (Bb*Lt, E) f32
    # dropout -> identity (inference)

    # --- Encoder_Block: cross attention (src_mask also ignored) + add & norm
    att2 = mha(q.astype(jnp.bfloat16), k_bf, v_bf,
               ca_wq[...], ca_wk[...], ca_wv[...], ca_wfc[...], ca_bfc[...],
               q_len=Lt, k_len=Ls)
    an1 = _add_layernorm(att2, q, n1_g[...], n1_b[...], eps=eps)

    # --- FFN + add & norm (row-batched over Bb*Lt rows)
    h1 = jnp.dot(an1.astype(jnp.bfloat16), w1[...],
                 preferred_element_type=jnp.float32) + b1[...]
    h1 = jnp.maximum(h1, 0.0)
    ff = jnp.dot(h1.astype(jnp.bfloat16), w2[...],
                 preferred_element_type=jnp.float32) + b2[...]
    an2 = _add_layernorm(ff, an1, n2_g[...], n2_b[...], eps=eps)

    o_ref[...] = an2.reshape(Bb, Lt, E).astype(o_ref.dtype)


# ----------------------------------------------------------------------------
# Wrapper: one pallas_call for the entire Decoder_Block forward
# ----------------------------------------------------------------------------
def decoder_block_forward(params, x, v, k, src_mask=None, trg_mask=None,
                          *, n_heads, block_b=None):
    # masks are ignored: the reference's masked_fill result is discarded.
    B, Lt, E = x.shape
    Ls = k.shape[1]
    D = E // n_heads
    Hd = params["ffn_w1_t"].shape[1]

    if block_b is None:
        block_b = 1
        for cand in range(B, 0, -1):           # biggest divisor with <=256 rows/step
            if B % cand == 0 and cand * Lt <= 256:
                block_b = cand
                break
    assert B % block_b == 0

    sa, ea = params["self_attn"], params["enc_attn"]
    operands = (
        x, k, v,
        sa["wq_t"], sa["wk_t"], sa["wv_t"], sa["wfc_t"], sa["bfc"],
        params["norm_g"], params["norm_b"],
        ea["wq_t"], ea["wk_t"], ea["wv_t"], ea["wfc_t"], ea["bfc"],
        params["enc_norm1_g"], params["enc_norm1_b"],
        params["ffn_w1_t"], params["ffn_b1"],
        params["ffn_w2_t"], params["ffn_b2"],
        params["enc_norm2_g"], params["enc_norm2_b"],
    )

    def rep(shape):   # grid-invariant (replicated) operand
        return pl.BlockSpec(shape, lambda b: (0,) * len(shape))

    in_specs = [
        pl.BlockSpec((block_b, Lt, E), lambda b: (b, 0, 0)),   # x
        pl.BlockSpec((block_b, Ls, E), lambda b: (b, 0, 0)),   # k
        pl.BlockSpec((block_b, Ls, E), lambda b: (b, 0, 0)),   # v
        rep((D, D)), rep((D, D)), rep((D, D)), rep((E, E)), rep((1, E)),   # self-attn
        rep((1, E)), rep((1, E)),                                          # norm
        rep((D, D)), rep((D, D)), rep((D, D)), rep((E, E)), rep((1, E)),   # cross-attn
        rep((1, E)), rep((1, E)),                                          # enc norm1
        rep((E, Hd)), rep((1, Hd)), rep((Hd, E)), rep((1, E)),             # FFN
        rep((1, E)), rep((1, E)),                                          # enc norm2
    ]

    kernel = functools.partial(_decoder_block_kernel, n_heads=n_heads, eps=1e-5)

    return pl.pallas_call(
        kernel,
        out_shape=jax.ShapeDtypeStruct((B, Lt, E), jnp.bfloat16),
        grid=(B // block_b,),
        in_specs=in_specs,
        out_specs=pl.BlockSpec((block_b, Lt, E), lambda b: (b, 0, 0)),
        compiler_params=pltpu.CompilerParams(
            dimension_semantics=("parallel",),
            vmem_limit_bytes=32 * 1024 * 1024),
    )(*operands)


# ----------------------------------------------------------------------------
# Parameter construction (deterministic, mirrors the PyTorch module shapes)
# ----------------------------------------------------------------------------
def init_mha_params(key, embed_size, n_heads):
    D = embed_size // n_heads
    k1, k2, k3, k4, k5 = jax.random.split(key, 5)
    wq = jax.random.normal(k1, (D, D), jnp.float32) * 0.1   # Linear(D, D) weight
    wk = jax.random.normal(k2, (D, D), jnp.float32) * 0.1
    wv = jax.random.normal(k3, (D, D), jnp.float32) * 0.1
    wfc = jax.random.normal(k4, (embed_size, embed_size), jnp.float32) * 0.1
    bfc = jax.random.normal(k5, (embed_size,), jnp.float32) * 0.1
    # y = x @ W.T (PyTorch Linear); store pre-transposed and already in bf16
    return dict(wq_t=wq.T.astype(jnp.bfloat16),
                wk_t=wk.T.astype(jnp.bfloat16),
                wv_t=wv.T.astype(jnp.bfloat16),
                wfc_t=wfc.T.astype(jnp.bfloat16),
                bfc=bfc.reshape(1, embed_size))


def init_decoder_block_params(key, embed_size, n_heads, forward_expansion):
    ks = jax.random.split(key, 12)
    hidden = forward_expansion * embed_size
    p = {}
    p["self_attn"] = init_mha_params(ks[0], embed_size, n_heads)
    p["norm_g"] = (1.0 + 0.1 * jax.random.normal(ks[1], (embed_size,))).reshape(1, -1)
    p["norm_b"] = (0.1 * jax.random.normal(ks[2], (embed_size,))).reshape(1, -1)
    p["enc_attn"] = init_mha_params(ks[3], embed_size, n_heads)
    p["enc_norm1_g"] = (1.0 + 0.1 * jax.random.normal(ks[4], (embed_size,))).reshape(1, -1)
    p["enc_norm1_b"] = (0.1 * jax.random.normal(ks[5], (embed_size,))).reshape(1, -1)
    p["enc_norm2_g"] = (1.0 + 0.1 * jax.random.normal(ks[6], (embed_size,))).reshape(1, -1)
    p["enc_norm2_b"] = (0.1 * jax.random.normal(ks[7], (embed_size,))).reshape(1, -1)
    w1 = jax.random.normal(ks[8], (hidden, embed_size), jnp.float32) * 0.1
    b1 = jax.random.normal(ks[9], (hidden,), jnp.float32) * 0.1
    w2 = jax.random.normal(ks[10], (embed_size, hidden), jnp.float32) * 0.1
    b2 = jax.random.normal(ks[11], (embed_size,), jnp.float32) * 0.1
    p["ffn_w1_t"] = w1.T.astype(jnp.bfloat16)
    p["ffn_b1"] = b1.reshape(1, -1)
    p["ffn_w2_t"] = w2.T.astype(jnp.bfloat16)
    p["ffn_b2"] = b2.reshape(1, -1)
    return p


# ----------------------------------------------------------------------------
if __name__ == "__main__":
    B = 2            # batch
    Lt = 8           # target (decoder) sequence length
    Ls = 16          # source (encoder) sequence length
    E = 128          # embed_size (lane-dense: multiple of 128)
    H = 4            # n_heads  -> head_dim = 32
    FE = 4           # forward_expansion

    key = jax.random.PRNGKey(0)
    kx, kv, kk, kp = jax.random.split(key, 4)
    x = jax.random.normal(kx, (B, Lt, E), jnp.float32)   # decoder input
    v = jax.random.normal(kv, (B, Ls, E), jnp.float32)   # encoder values
    k = jax.random.normal(kk, (B, Ls, E), jnp.float32)   # encoder keys

    params = init_decoder_block_params(kp, E, H, FE)

    out = decoder_block_forward(params, x, v, k, src_mask=None, trg_mask=None,
                                n_heads=H)
    out = jax.block_until_ready(out)
    assert out.shape == (B, Lt, E)
    assert bool(jnp.all(jnp.isfinite(out.astype(jnp.float32))))
    print("KERNEL_OK")
</pallas_src>

<mosaic_0001>
module attributes {stable_mosaic.version = 11 : i64} {
  func.func @_decoder_block_kernel(%arg0: i32, %arg1: memref<2x8x128xf32, #tpu.memory_space<vmem>>, %arg2: memref<2x16x128xf32, #tpu.memory_space<vmem>>, %arg3: memref<2x16x128xf32, #tpu.memory_space<vmem>>, %arg4: memref<32x32xbf16, #tpu.memory_space<vmem>>, %arg5: memref<32x32xbf16, #tpu.memory_space<vmem>>, %arg6: memref<32x32xbf16, #tpu.memory_space<vmem>>, %arg7: memref<128x128xbf16, #tpu.memory_space<vmem>>, %arg8: memref<1x128xf32, #tpu.memory_space<vmem>>, %arg9: memref<1x128xf32, #tpu.memory_space<vmem>>, %arg10: memref<1x128xf32, #tpu.memory_space<vmem>>, %arg11: memref<32x32xbf16, #tpu.memory_space<vmem>>, %arg12: memref<32x32xbf16, #tpu.memory_space<vmem>>, %arg13: memref<32x32xbf16, #tpu.memory_space<vmem>>, %arg14: memref<128x128xbf16, #tpu.memory_space<vmem>>, %arg15: memref<1x128xf32, #tpu.memory_space<vmem>>, %arg16: memref<1x128xf32, #tpu.memory_space<vmem>>, %arg17: memref<1x128xf32, #tpu.memory_space<vmem>>, %arg18: memref<128x512xbf16, #tpu.memory_space<vmem>>, %arg19: memref<1x512xf32, #tpu.memory_space<vmem>>, %arg20: memref<512x128xbf16, #tpu.memory_space<vmem>>, %arg21: memref<1x128xf32, #tpu.memory_space<vmem>>, %arg22: memref<1x128xf32, #tpu.memory_space<vmem>>, %arg23: memref<1x128xf32, #tpu.memory_space<vmem>>, %arg24: memref<2x8x128xbf16, #tpu.memory_space<vmem>>) attributes {dimension_semantics = [#tpu.dimension_semantics<parallel>], iteration_bounds = array<i64: 1>, scalar_prefetch = 0 : i64, scratch_operands = 0 : i64, tpu.core_type = #tpu.core_type<tc>, window_params = [{transform_indices = @transform_0, window_bounds = array<i64: 2, 8, 128>}, {transform_indices = @transform_1, window_bounds = array<i64: 2, 16, 128>}, {transform_indices = @transform_2, window_bounds = array<i64: 2, 16, 128>}, {pipeline_mode = #tpu.pipeline_mode<synchronous>, transform_indices = @transform_3, window_bounds = array<i64: 32, 32>}, {pipeline_mode = #tpu.pipeline_mode<synchronous>, transform_indices = @transform_4, window_bounds = array<i64: 32, 32>}, {pipeline_mode = #tpu.pipeline_mode<synchronous>, transform_indices = @transform_5, window_bounds = array<i64: 32, 32>}, {pipeline_mode = #tpu.pipeline_mode<synchronous>, transform_indices = @transform_6, window_bounds = array<i64: 128, 128>}, {pipeline_mode = #tpu.pipeline_mode<synchronous>, transform_indices = @transform_7, window_bounds = array<i64: 1, 128>}, {pipeline_mode = #tpu.pipeline_mode<synchronous>, transform_indices = @transform_8, window_bounds = array<i64: 1, 128>}, {pipeline_mode = #tpu.pipeline_mode<synchronous>, transform_indices = @transform_9, window_bounds = array<i64: 1, 128>}, {pipeline_mode = #tpu.pipeline_mode<synchronous>, transform_indices = @transform_10, window_bounds = array<i64: 32, 32>}, {pipeline_mode = #tpu.pipeline_mode<synchronous>, transform_indices = @transform_11, window_bounds = array<i64: 32, 32>}, {pipeline_mode = #tpu.pipeline_mode<synchronous>, transform_indices = @transform_12, window_bounds = array<i64: 32, 32>}, {pipeline_mode = #tpu.pipeline_mode<synchronous>, transform_indices = @transform_13, window_bounds = array<i64: 128, 128>}, {pipeline_mode = #tpu.pipeline_mode<synchronous>, transform_indices = @transform_14, window_bounds = array<i64: 1, 128>}, {pipeline_mode = #tpu.pipeline_mode<synchronous>, transform_indices = @transform_15, window_bounds = array<i64: 1, 128>}, {pipeline_mode = #tpu.pipeline_mode<synchronous>, transform_indices = @transform_16, window_bounds = array<i64: 1, 128>}, {pipeline_mode = #tpu.pipeline_mode<synchronous>, transform_indices = @transform_17, window_bounds = array<i64: 128, 512>}, {pipeline_mode = #tpu.pipeline_mode<synchronous>, transform_indices = @transform_18, window_bounds = array<i64: 1, 512>}, {pipeline_mode = #tpu.pipeline_mode<synchronous>, transform_indices = @transform_19, window_bounds = array<i64: 512, 128>}, {pipeline_mode = #tpu.pipeline_mode<synchronous>, transform_indices = @transform_20, window_bounds = array<i64: 1, 128>}, {pipeline_mode = #tpu.pipeline_mode<synchronous>, transform_indices = @transform_21, window_bounds = array<i64: 1, 128>}, {pipeline_mode = #tpu.pipeline_mode<synchronous>, transform_indices = @transform_22, window_bounds = array<i64: 1, 128>}, {transform_indices = @transform_23, window_bounds = array<i64: 2, 8, 128>}]} {
    %c0 = arith.constant 0 : index
    %c0_0 = arith.constant 0 : index
    %c0_1 = arith.constant 0 : index
    %0 = vector.load %arg1[%c0, %c0_0, %c0_1] : memref<2x8x128xf32, #tpu.memory_space<vmem>>, vector<2x8x128xf32>
    %1 = vector.shape_cast %0 : vector<2x8x128xf32> to vector<16x128xf32>
    %2 = arith.truncf %1 : vector<16x128xf32> to vector<16x128xbf16>
    %c0_2 = arith.constant 0 : index
    %c0_3 = arith.constant 0 : index
    %c0_4 = arith.constant 0 : index
    %3 = vector.load %arg2[%c0_2, %c0_3, %c0_4] : memref<2x16x128xf32, #tpu.memory_space<vmem>>, vector<2x16x128xf32>
    %4 = vector.shape_cast %3 : vector<2x16x128xf32> to vector<32x128xf32>
    %5 = arith.truncf %4 : vector<32x128xf32> to vector<32x128xbf16>
    %c0_5 = arith.constant 0 : index
    %c0_6 = arith.constant 0 : index
    %c0_7 = arith.constant 0 : index
    %6 = vector.load %arg3[%c0_5, %c0_6, %c0_7] : memref<2x16x128xf32, #tpu.memory_space<vmem>>, vector<2x16x128xf32>
    %7 = vector.shape_cast %6 : vector<2x16x128xf32> to vector<32x128xf32>
    %8 = arith.truncf %7 : vector<32x128xf32> to vector<32x128xbf16>
    %c0_8 = arith.constant 0 : index
    %c0_9 = arith.constant 0 : index
    %9 = vector.load %arg4[%c0_8, %c0_9] : memref<32x32xbf16, #tpu.memory_space<vmem>>, vector<32x32xbf16>
    %c0_10 = arith.constant 0 : index
    %c0_11 = arith.constant 0 : index
    %10 = vector.load %arg5[%c0_10, %c0_11] : memref<32x32xbf16, #tpu.memory_space<vmem>>, vector<32x32xbf16>
    %c0_12 = arith.constant 0 : index
    %c0_13 = arith.constant 0 : index
    %11 = vector.load %arg6[%c0_12, %c0_13] : memref<32x32xbf16, #tpu.memory_space<vmem>>, vector<32x32xbf16>
    %c0_14 = arith.constant 0 : index
    %c0_15 = arith.constant 0 : index
    %12 = vector.load %arg7[%c0_14, %c0_15] : memref<128x128xbf16, #tpu.memory_space<vmem>>, vector<128x128xbf16>
    %c0_16 = arith.constant 0 : index
    %c0_17 = arith.constant 0 : index
    %13 = vector.load %arg8[%c0_16, %c0_17] : memref<1x128xf32, #tpu.memory_space<vmem>>, vector<1x128xf32>
    %14 = vector.extract_strided_slice %2 {offsets = [0, 0], sizes = [16, 32], strides = [1, 1]} : vector<16x128xbf16> to vector<16x32xbf16>
    %cst = arith.constant dense<0.000000e+00> : vector<16x32xf32>
    %15 = tpu.matmul %14, %9, %cst {dimension_numbers = #tpu.dot_dimension_numbers<[1], [0], [0], [1], [0, 0, 1, 1], [], []>} : vector<16x32xbf16>, vector<32x32xbf16>, vector<16x32xf32> -> vector<16x32xf32>
    %cst_18 = arith.constant 2.82842708 : f32
    %16 = vector.broadcast %cst_18 : f32 to vector<16x32xf32>
    %17 = arith.mulf %15, %16 : vector<16x32xf32>
    %18 = arith.truncf %17 : vector<16x32xf32> to vector<16x32xbf16>
    %19 = vector.extract_strided_slice %2 {offsets = [0, 0], sizes = [16, 32], strides = [1, 1]} : vector<16x128xbf16> to vector<16x32xbf16>
    %cst_19 = arith.constant dense<0.000000e+00> : vector<16x32xf32>
    %20 = tpu.matmul %19, %10, %cst_19 {dimension_numbers = #tpu.dot_dimension_numbers<[1], [0], [0], [1], [0, 0, 1, 1], [], []>} : vector<16x32xbf16>, vector<32x32xbf16>, vector<16x32xf32> -> vector<16x32xf32>
    %21 = arith.truncf %20 : vector<16x32xf32> to vector<16x32xbf16>
    %22 = vector.extract_strided_slice %2 {offsets = [0, 0], sizes = [16, 32], strides = [1, 1]} : vector<16x128xbf16> to vector<16x32xbf16>
    %cst_20 = arith.constant dense<0.000000e+00> : vector<16x32xf32>
    %23 = tpu.matmul %22, %11, %cst_20 {dimension_numbers = #tpu.dot_dimension_numbers<[1], [0], [0], [1], [0, 0, 1, 1], [], []>} : vector<16x32xbf16>, vector<32x32xbf16>, vector<16x32xf32> -> vector<16x32xf32>
    %24 = arith.truncf %23 : vector<16x32xf32> to vector<16x32xbf16>
    %25 = vector.extract_strided_slice %2 {offsets = [0, 32], sizes = [16, 32], strides = [1, 1]} : vector<16x128xbf16> to vector<16x32xbf16>
    %cst_21 = arith.constant dense<0.000000e+00> : vector<16x32xf32>
    %26 = tpu.matmul %25, %9, %cst_21 {dimension_numbers = #tpu.dot_dimension_numbers<[1], [0], [0], [1], [0, 0, 1, 1], [], []>} : vector<16x32xbf16>, vector<32x32xbf16>, vector<16x32xf32> -> vector<16x32xf32>
    %cst_22 = arith.constant 2.82842708 : f32
    %27 = vector.broadcast %cst_22 : f32 to vector<16x32xf32>
    %28 = arith.mulf %26, %27 : vector<16x32xf32>
    %29 = arith.truncf %28 : vector<16x32xf32> to vector<16x32xbf16>
    %30 = vector.extract_strided_slice %2 {offsets = [0, 32], sizes = [16, 32], strides = [1, 1]} : vector<16x128xbf16> to vector<16x32xbf16>
    %cst_23 = arith.constant dense<0.000000e+00> : vector<16x32xf32>
    %31 = tpu.matmul %30, %10, %cst_23 {dimension_numbers = #tpu.dot_dimension_numbers<[1], [0], [0], [1], [0, 0, 1, 1], [], []>} : vector<16x32xbf16>, vector<32x32xbf16>, vector<16x32xf32> -> vector<16x32xf32>
    %32 = arith.truncf %31 : vector<16x32xf32> to vector<16x32xbf16>
    %33 = vector.extract_strided_slice %2 {offsets = [0, 32], sizes = [16, 32], strides = [1, 1]} : vector<16x128xbf16> to vector<16x32xbf16>
    %cst_24 = arith.constant dense<0.000000e+00> : vector<16x32xf32>
    %34 = tpu.matmul %33, %11, %cst_24 {dimension_numbers = #tpu.dot_dimension_numbers<[1], [0], [0], [1], [0, 0, 1, 1], [], []>} : vector<16x32xbf16>, vector<32x32xbf16>, vector<16x32xf32> -> vector<16x32xf32>
    %35 = arith.truncf %34 : vector<16x32xf32> to vector<16x32xbf16>
    %36 = vector.extract_strided_slice %2 {offsets = [0, 64], sizes = [16, 32], strides = [1, 1]} : vector<16x128xbf16> to vector<16x32xbf16>
    %cst_25 = arith.constant dense<0.000000e+00> : vector<16x32xf32>
    %37 = tpu.matmul %36, %9, %cst_25 {dimension_numbers = #tpu.dot_dimension_numbers<[1], [0], [0], [1], [0, 0, 1, 1], [], []>} : vector<16x32xbf16>, vector<32x32xbf16>, vector<16x32xf32> -> vector<16x32xf32>
    %cst_26 = arith.constant 2.82842708 : f32
    %38 = vector.broadcast %cst_26 : f32 to vector<16x32xf32>
    %39 = arith.mulf %37, %38 : vector<16x32xf32>
    %40 = arith.truncf %39 : vector<16x32xf32> to vector<16x32xbf16>
    %41 = vector.extract_strided_slice %2 {offsets = [0, 64], sizes = [16, 32], strides = [1, 1]} : vector<16x128xbf16> to vector<16x32xbf16>
    %cst_27 = arith.constant dense<0.000000e+00> : vector<16x32xf32>
    %42 = tpu.matmul %41, %10, %cst_27 {dimension_numbers = #tpu.dot_dimension_numbers<[1], [0], [0], [1], [0, 0, 1, 1], [], []>} : vector<16x32xbf16>, vector<32x32xbf16>, vector<16x32xf32> -> vector<16x32xf32>
    %43 = arith.truncf %42 : vector<16x32xf32> to vector<16x32xbf16>
    %44 = vector.extract_strided_slice %2 {offsets = [0, 64], sizes = [16, 32], strides = [1, 1]} : vector<16x128xbf16> to vector<16x32xbf16>
    %cst_28 = arith.constant dense<0.000000e+00> : vector<16x32xf32>
    %45 = tpu.matmul %44, %11, %cst_28 {dimension_numbers = #tpu.dot_dimension_numbers<[1], [0], [0], [1], [0, 0, 1, 1], [], []>} : vector<16x32xbf16>, vector<32x32xbf16>, vector<16x32xf32> -> vector<16x32xf32>
    %46 = arith.truncf %45 : vector<16x32xf32> to vector<16x32xbf16>
    %47 = vector.extract_strided_slice %2 {offsets = [0, 96], sizes = [16, 32], strides = [1, 1]} : vector<16x128xbf16> to vector<16x32xbf16>
    %cst_29 = arith.constant dense<0.000000e+00> : vector<16x32xf32>
    %48 = tpu.matmul %47, %9, %cst_29 {dimension_numbers = #tpu.dot_dimension_numbers<[1], [0], [0], [1], [0, 0, 1, 1], [], []>} : vector<16x32xbf16>, vector<32x32xbf16>, vector<16x32xf32> -> vector<16x32xf32>
    %cst_30 = arith.constant 2.82842708 : f32
    %49 = vector.broadcast %cst_30 : f32 to vector<16x32xf32>
    %50 = arith.mulf %48, %49 : vector<16x32xf32>
    %51 = arith.truncf %50 : vector<16x32xf32> to vector<16x32xbf16>
    %52 = vector.extract_strided_slice %2 {offsets = [0, 96], sizes = [16, 32], strides = [1, 1]} : vector<16x128xbf16> to vector<16x32xbf16>
    %cst_31 = arith.constant dense<0.000000e+00> : vector<16x32xf32>
    %53 = tpu.matmul %52, %10, %cst_31 {dimension_numbers = #tpu.dot_dimension_numbers<[1], [0], [0], [1], [0, 0, 1, 1], [], []>} : vector<16x32xbf16>, vector<32x32xbf16>, vector<16x32xf32> -> vector<16x32xf32>
    %54 = arith.truncf %53 : vector<16x32xf32> to vector<16x32xbf16>
    %55 = vector.extract_strided_slice %2 {offsets = [0, 96], sizes = [16, 32], strides = [1, 1]} : vector<16x128xbf16> to vector<16x32xbf16>
    %cst_32 = arith.constant dense<0.000000e+00> : vector<16x32xf32>
    %56 = tpu.matmul %55, %11, %cst_32 {dimension_numbers = #tpu.dot_dimension_numbers<[1], [0], [0], [1], [0, 0, 1, 1], [], []>} : vector<16x32xbf16>, vector<32x32xbf16>, vector<16x32xf32> -> vector<16x32xf32>
    %57 = arith.truncf %56 : vector<16x32xf32> to vector<16x32xbf16>
    %58 = vector.extract_strided_slice %18 {offsets = [0, 0], sizes = [8, 32], strides = [1, 1]} : vector<16x32xbf16> to vector<8x32xbf16>
    %59 = vector.extract_strided_slice %21 {offsets = [0, 0], sizes = [8, 32], strides = [1, 1]} : vector<16x32xbf16> to vector<8x32xbf16>
    "tpu.trace_start"() <{level = 10 : i32, message = "qd,kd->qk"}> : () -> ()
    %cst_33 = arith.constant dense<0.000000e+00> : vector<8x8xf32>
    %60 = tpu.matmul %58, %59, %cst_33 {dimension_numbers = #tpu.dot_dimension_numbers<[1], [1], [0], [0], [0, 0, 1, 0], [], []>} : vector<8x32xbf16>, vector<8x32xbf16>, vector<8x8xf32> -> vector<8x8xf32>
    "tpu.trace_stop"() : () -> ()
    %cst_34 = arith.constant dense<0xFF800000> : vector<8xf32>
    %61 = vector.multi_reduction <maximumf>, %60, %cst_34 [1] : vector<8x8xf32> to vector<8xf32>
    %62 = vector.shape_cast %61 : vector<8xf32> to vector<8x1xf32>
    %63 = vector.broadcast %62 : vector<8x1xf32> to vector<8x8xf32>
    %64 = arith.subf %60, %63 : vector<8x8xf32>
    %65 = math.exp %64 : vector<8x8xf32>
    %cst_35 = arith.constant dense<0.000000e+00> : vector<8xf32>
    %66 = vector.multi_reduction <add>, %65, %cst_35 [1] : vector<8x8xf32> to vector<8xf32>
    %67 = vector.shape_cast %66 : vector<8xf32> to vector<8x1xf32>
    %68 = tpu.reciprocal %67 {approx = true} : vector<8x1xf32> -> vector<8x1xf32>
    %69 = vector.broadcast %68 : vector<8x1xf32> to vector<8x8xf32>
    %70 = arith.mulf %65, %69 : vector<8x8xf32>
    %71 = arith.truncf %70 : vector<8x8xf32> to vector<8x8xbf16>
    %72 = vector.extract_strided_slice %24 {offsets = [0, 0], sizes = [8, 32], strides = [1, 1]} : vector<16x32xbf16> to vector<8x32xbf16>
    %cst_36 = arith.constant dense<0.000000e+00> : vector<8x32xf32>
    %73 = tpu.matmul %71, %72, %cst_36 {dimension_numbers = #tpu.dot_dimension_numbers<[1], [0], [0], [1], [0, 0, 1, 1], [], []>} : vector<8x8xbf16>, vector<8x32xbf16>, vector<8x32xf32> -> vector<8x32xf32>
    %74 = arith.truncf %73 : vector<8x32xf32> to vector<8x32xbf16>
    %75 = vector.extract_strided_slice %12 {offsets = [0, 0], sizes = [32, 128], strides = [1, 1]} : vector<128x128xbf16> to vector<32x128xbf16>
    %cst_37 = arith.constant dense<0.000000e+00> : vector<8x128xf32>
    %76 = tpu.matmul %74, %75, %cst_37 {dimension_numbers = #tpu.dot_dimension_numbers<[1], [0], [0], [1], [0, 0, 1, 1], [], []>} : vector<8x32xbf16>, vector<32x128xbf16>, vector<8x128xf32> -> vector<8x128xf32>
    %77 = vector.extract_strided_slice %29 {offsets = [0, 0], sizes = [8, 32], strides = [1, 1]} : vector<16x32xbf16> to vector<8x32xbf16>
    %78 = vector.extract_strided_slice %32 {offsets = [0, 0], sizes = [8, 32], strides = [1, 1]} : vector<16x32xbf16> to vector<8x32xbf16>
    "tpu.trace_start"() <{level = 10 : i32, message = "qd,kd->qk"}> : () -> ()
    %cst_38 = arith.constant dense<0.000000e+00> : vector<8x8xf32>
    %79 = tpu.matmul %77, %78, %cst_38 {dimension_numbers = #tpu.dot_dimension_numbers<[1], [1], [0], [0], [0, 0, 1, 0], [], []>} : vector<8x32xbf16>, vector<8x32xbf16>, vector<8x8xf32> -> vector<8x8xf32>
    "tpu.trace_stop"() : () -> ()
    %cst_39 = arith.constant dense<0xFF800000> : vector<8xf32>
    %80 = vector.multi_reduction <maximumf>, %79, %cst_39 [1] : vector<8x8xf32> to vector<8xf32>
    %81 = vector.shape_cast %80 : vector<8xf32> to vector<8x1xf32>
    %82 = vector.broadcast %81 : vector<8x1xf32> to vector<8x8xf32>
    %83 = arith.subf %79, %82 : vector<8x8xf32>
    %84 = math.exp %83 : vector<8x8xf32>
    %cst_40 = arith.constant dense<0.000000e+00> : vector<8xf32>
    %85 = vector.multi_reduction <add>, %84, %cst_40 [1] : vector<8x8xf32> to vector<8xf32>
    %86 = vector.shape_cast %85 : vector<8xf32> to vector<8x1xf32>
    %87 = tpu.reciprocal %86 {approx = true} : vector<8x1xf32> -> vector<8x1xf32>
    %88 = vector.broadcast %87 : vector<8x1xf32> to vector<8x8xf32>
    %89 = arith.mulf %84, %88 : vector<8x8xf32>
    %90 = arith.truncf %89 : vector<8x8xf32> to vector<8x8xbf16>
    %91 = vector.extract_strided_slice %35 {offsets = [0, 0], sizes = [8, 32], strides = [1, 1]} : vector<16x32xbf16> to vector<8x32xbf16>
    %cst_41 = arith.constant dense<0.000000e+00> : vector<8x32xf32>
    %92 = tpu.matmul %90, %91, %cst_41 {dimension_numbers = #tpu.dot_dimension_numbers<[1], [0], [0], [1], [0, 0, 1, 1], [], []>} : vector<8x8xbf16>, vector<8x32xbf16>, vector<8x32xf32> -> vector<8x32xf32>
    %93 = arith.truncf %92 : vector<8x32xf32> to vector<8x32xbf16>
    %94 = vector.extract_strided_slice %12 {offsets = [32, 0], sizes = [32, 128], strides = [1, 1]} : vector<128x128xbf16> to vector<32x128xbf16>
    %cst_42 = arith.constant dense<0.000000e+00> : vector<8x128xf32>
    %95 = tpu.matmul %93, %94, %cst_42 {dimension_numbers = #tpu.dot_dimension_numbers<[1], [0], [0], [1], [0, 0, 1, 1], [], []>} : vector<8x32xbf16>, vector<32x128xbf16>, vector<8x128xf32> -> vector<8x128xf32>
    %96 = arith.addf %76, %95 : vector<8x128xf32>
    %97 = vector.extract_strided_slice %40 {offsets = [0, 0], sizes = [8, 32], strides = [1, 1]} : vector<16x32xbf16> to vector<8x32xbf16>
    %98 = vector.extract_strided_slice %43 {offsets = [0, 0], sizes = [8, 32], strides = [1, 1]} : vector<16x32xbf16> to vector<8x32xbf16>
    "tpu.trace_start"() <{level = 10 : i32, message = "qd,kd->qk"}> : () -> ()
    %cst_43 = arith.constant dense<0.000000e+00> : vector<8x8xf32>
    %99 = tpu.matmul %97, %98, %cst_43 {dimension_numbers = #tpu.dot_dimension_numbers<[1], [1], [0], [0], [0, 0, 1, 0], [], []>} : vector<8x32xbf16>, vector<8x32xbf16>, vector<8x8xf32> -> vector<8x8xf32>
    "tpu.trace_stop"() : () -> ()
    %cst_44 = arith.constant dense<0xFF800000> : vector<8xf32>
    %100 = vector.multi_reduction <maximumf>, %99, %cst_44 [1] : vector<8x8xf32> to vector<8xf32>
    %101 = vector.shape_cast %100 : vector<8xf32> to vector<8x1xf32>
    %102 = vector.broadcast %101 : vector<8x1xf32> to vector<8x8xf32>
    %103 = arith.subf %99, %102 : vector<8x8xf32>
    %104 = math.exp %103 : vector<8x8xf32>
    %cst_45 = arith.constant dense<0.000000e+00> : vector<8xf32>
    %105 = vector.multi_reduction <add>, %104, %cst_45 [1] : vector<8x8xf32> to vector<8xf32>
    %106 = vector.shape_cast %105 : vector<8xf32> to vector<8x1xf32>
    %107 = tpu.reciprocal %106 {approx = true} : vector<8x1xf32> -> vector<8x1xf32>
    %108 = vector.broadcast %107 : vector<8x1xf32> to vector<8x8xf32>
    %109 = arith.mulf %104, %108 : vector<8x8xf32>
    %110 = arith.truncf %109 : vector<8x8xf32> to vector<8x8xbf16>
    %111 = vector.extract_strided_slice %46 {offsets = [0, 0], sizes = [8, 32], strides = [1, 1]} : vector<16x32xbf16> to vector<8x32xbf16>
    %cst_46 = arith.constant dense<0.000000e+00> : vector<8x32xf32>
    %112 = tpu.matmul %110, %111, %cst_46 {dimension_numbers = #tpu.dot_dimension_numbers<[1], [0], [0], [1], [0, 0, 1, 1], [], []>} : vector<8x8xbf16>, vector<8x32xbf16>, vector<8x32xf32> -> vector<8x32xf32>
    %113 = arith.truncf %112 : vector<8x32xf32> to vector<8x32xbf16>
    %114 = vector.extract_strided_slice %12 {offsets = [64, 0], sizes = [32, 128], strides = [1, 1]} : vector<128x128xbf16> to vector<32x128xbf16>
    %cst_47 = arith.constant dense<0.000000e+00> : vector<8x128xf32>
    %115 = tpu.matmul %113, %114, %cst_47 {dimension_numbers = #tpu.dot_dimension_numbers<[1], [0], [0], [1], [0, 0, 1, 1], [], []>} : vector<8x32xbf16>, vector<32x128xbf16>, vector<8x128xf32> -> vector<8x128xf32>
    %116 = arith.addf %96, %115 : vector<8x128xf32>
    %117 = vector.extract_strided_slice %51 {offsets = [0, 0], sizes = [8, 32], strides = [1, 1]} : vector<16x32xbf16> to vector<8x32xbf16>
    %118 = vector.extract_strided_slice %54 {offsets = [0, 0], sizes = [8, 32], strides = [1, 1]} : vector<16x32xbf16> to vector<8x32xbf16>
    "tpu.trace_start"() <{level = 10 : i32, message = "qd,kd->qk"}> : () -> ()
    %cst_48 = arith.constant dense<0.000000e+00> : vector<8x8xf32>
    %119 = tpu.matmul %117, %118, %cst_48 {dimension_numbers = #tpu.dot_dimension_numbers<[1], [1], [0], [0], [0, 0, 1, 0], [], []>} : vector<8x32xbf16>, vector<8x32xbf16>, vector<8x8xf32> -> vector<8x8xf32>
    "tpu.trace_stop"() : () -> ()
    %cst_49 = arith.constant dense<0xFF800000> : vector<8xf32>
    %120 = vector.multi_reduction <maximumf>, %119, %cst_49 [1] : vector<8x8xf32> to vector<8xf32>
    %121 = vector.shape_cast %120 : vector<8xf32> to vector<8x1xf32>
    %122 = vector.broadcast %121 : vector<8x1xf32> to vector<8x8xf32>
    %123 = arith.subf %119, %122 : vector<8x8xf32>
    %124 = math.exp %123 : vector<8x8xf32>
    %cst_50 = arith.constant dense<0.000000e+00> : vector<8xf32>
    %125 = vector.multi_reduction <add>, %124, %cst_50 [1] : vector<8x8xf32> to vector<8xf32>
    %126 = vector.shape_cast %125 : vector<8xf32> to vector<8x1xf32>
    %127 = tpu.reciprocal %126 {approx = true} : vector<8x1xf32> -> vector<8x1xf32>
    %128 = vector.broadcast %127 : vector<8x1xf32> to vector<8x8xf32>
    %129 = arith.mulf %124, %128 : vector<8x8xf32>
    %130 = arith.truncf %129 : vector<8x8xf32> to vector<8x8xbf16>
    %131 = vector.extract_strided_slice %57 {offsets = [0, 0], sizes = [8, 32], strides = [1, 1]} : vector<16x32xbf16> to vector<8x32xbf16>
    %cst_51 = arith.constant dense<0.000000e+00> : vector<8x32xf32>
    %132 = tpu.matmul %130, %131, %cst_51 {dimension_numbers = #tpu.dot_dimension_numbers<[1], [0], [0], [1], [0, 0, 1, 1], [], []>} : vector<8x8xbf16>, vector<8x32xbf16>, vector<8x32xf32> -> vector<8x32xf32>
    %133 = arith.truncf %132 : vector<8x32xf32> to vector<8x32xbf16>
    %134 = vector.extract_strided_slice %12 {offsets = [96, 0], sizes = [32, 128], strides = [1, 1]} : vector<128x128xbf16> to vector<32x128xbf16>
    %cst_52 = arith.constant dense<0.000000e+00> : vector<8x128xf32>
    %135 = tpu.matmul %133, %134, %cst_52 {dimension_numbers = #tpu.dot_dimension_numbers<[1], [0], [0], [1], [0, 0, 1, 1], [], []>} : vector<8x32xbf16>, vector<32x128xbf16>, vector<8x128xf32> -> vector<8x128xf32>
    %136 = arith.addf %116, %135 : vector<8x128xf32>
    %137 = vector.broadcast %13 : vector<1x128xf32> to vector<8x128xf32>
    %138 = arith.addf %136, %137 : vector<8x128xf32>
    %139 = vector.extract_strided_slice %18 {offsets = [8, 0], sizes = [8, 32], strides = [1, 1]} : vector<16x32xbf16> to vector<8x32xbf16>
    %140 = vector.extract_strided_slice %21 {offsets = [8, 0], sizes = [8, 32], strides = [1, 1]} : vector<16x32xbf16> to vector<8x32xbf16>
    "tpu.trace_start"() <{level = 10 : i32, message = "qd,kd->qk"}> : () -> ()
    %cst_53 = arith.constant dense<0.000000e+00> : vector<8x8xf32>
    %141 = tpu.matmul %139, %140, %cst_53 {dimension_numbers = #tpu.dot_dimension_numbers<[1], [1], [0], [0], [0, 0, 1, 0], [], []>} : vector<8x32xbf16>, vector<8x32xbf16>, vector<8x8xf32> -> vector<8x8xf32>
    "tpu.trace_stop"() : () -> ()
    %cst_54 = arith.constant dense<0xFF800000> : vector<8xf32>
    %142 = vector.multi_reduction <maximumf>, %141, %cst_54 [1] : vector<8x8xf32> to vector<8xf32>
    %143 = vector.shape_cast %142 : vector<8xf32> to vector<8x1xf32>
    %144 = vector.broadcast %143 : vector<8x1xf32> to vector<8x8xf32>
    %145 = arith.subf %141, %144 : vector<8x8xf32>
    %146 = math.exp %145 : vector<8x8xf32>
    %cst_55 = arith.constant dense<0.000000e+00> : vector<8xf32>
    %147 = vector.multi_reduction <add>, %146, %cst_55 [1] : vector<8x8xf32> to vector<8xf32>
    %148 = vector.shape_cast %147 : vector<8xf32> to vector<8x1xf32>
    %149 = tpu.reciprocal %148 {approx = true} : vector<8x1xf32> -> vector<8x1xf32>
    %150 = vector.broadcast %149 : vector<8x1xf32> to vector<8x8xf32>
    %151 = arith.mulf %146, %150 : vector<8x8xf32>
    %152 = arith.truncf %151 : vector<8x8xf32> to vector<8x8xbf16>
    %153 = vector.extract_strided_slice %24 {offsets = [8, 0], sizes = [8, 32], strides = [1, 1]} : vector<16x32xbf16> to vector<8x32xbf16>
    %cst_56 = arith.constant dense<0.000000e+00> : vector<8x32xf32>
    %154 = tpu.matmul %152, %153, %cst_56 {dimension_numbers = #tpu.dot_dimension_numbers<[1], [0], [0], [1], [0, 0, 1, 1], [], []>} : vector<8x8xbf16>, vector<8x32xbf16>, vector<8x32xf32> -> vector<8x32xf32>
    %155 = arith.truncf %154 : vector<8x32xf32> to vector<8x32xbf16>
    %156 = vector.extract_strided_slice %12 {offsets = [0, 0], sizes = [32, 128], strides = [1, 1]} : vector<128x128xbf16> to vector<32x128xbf16>
    %cst_57 = arith.constant dense<0.000000e+00> : vector<8x128xf32>
    %157 = tpu.matmul %155, %156, %cst_57 {dimension_numbers = #tpu.dot_dimension_numbers<[1], [0], [0], [1], [0, 0, 1, 1], [], []>} : vector<8x32xbf16>, vector<32x128xbf16>, vector<8x128xf32> -> vector<8x128xf32>
    %158 = vector.extract_strided_slice %29 {offsets = [8, 0], sizes = [8, 32], strides = [1, 1]} : vector<16x32xbf16> to vector<8x32xbf16>
    %159 = vector.extract_strided_slice %32 {offsets = [8, 0], sizes = [8, 32], strides = [1, 1]} : vector<16x32xbf16> to vector<8x32xbf16>
    "tpu.trace_start"() <{level = 10 : i32, message = "qd,kd->qk"}> : () -> ()
    %cst_58 = arith.constant dense<0.000000e+00> : vector<8x8xf32>
    %160 = tpu.matmul %158, %159, %cst_58 {dimension_numbers = #tpu.dot_dimension_numbers<[1], [1], [0], [0], [0, 0, 1, 0], [], []>} : vector<8x32xbf16>, vector<8x32xbf16>, vector<8x8xf32> -> vector<8x8xf32>
    "tpu.trace_stop"() : () -> ()
    %cst_59 = arith.constant dense<0xFF800000> : vector<8xf32>
    %161 = vector.multi_reduction <maximumf>, %160, %cst_59 [1] : vector<8x8xf32> to vector<8xf32>
    %162 = vector.shape_cast %161 : vector<8xf32> to vector<8x1xf32>
    %163 = vector.broadcast %162 : vector<8x1xf32> to vector<8x8xf32>
    %164 = arith.subf %160, %163 : vector<8x8xf32>
    %165 = math.exp %164 : vector<8x8xf32>
    %cst_60 = arith.constant dense<0.000000e+00> : vector<8xf32>
    %166 = vector.multi_reduction <add>, %165, %cst_60 [1] : vector<8x8xf32> to vector<8xf32>
    %167 = vector.shape_cast %166 : vector<8xf32> to vector<8x1xf32>
    %168 = tpu.reciprocal %167 {approx = true} : vector<8x1xf32> -> vector<8x1xf32>
    %169 = vector.broadcast %168 : vector<8x1xf32> to vector<8x8xf32>
    %170 = arith.mulf %165, %169 : vector<8x8xf32>
    %171 = arith.truncf %170 : vector<8x8xf32> to vector<8x8xbf16>
    %172 = vector.extract_strided_slice %35 {offsets = [8, 0], sizes = [8, 32], strides = [1, 1]} : vector<16x32xbf16> to vector<8x32xbf16>
    %cst_61 = arith.constant dense<0.000000e+00> : vector<8x32xf32>
    %173 = tpu.matmul %171, %172, %cst_61 {dimension_numbers = #tpu.dot_dimension_numbers<[1], [0], [0], [1], [0, 0, 1, 1], [], []>} : vector<8x8xbf16>, vector<8x32xbf16>, vector<8x32xf32> -> vector<8x32xf32>
    %174 = arith.truncf %173 : vector<8x32xf32> to vector<8x32xbf16>
    %175 = vector.extract_strided_slice %12 {offsets = [32, 0], sizes = [32, 128], strides = [1, 1]} : vector<128x128xbf16> to vector<32x128xbf16>
    %cst_62 = arith.constant dense<0.000000e+00> : vector<8x128xf32>
    %176 = tpu.matmul %174, %175, %cst_62 {dimension_numbers = #tpu.dot_dimension_numbers<[1], [0], [0], [1], [0, 0, 1, 1], [], []>} : vector<8x32xbf16>, vector<32x128xbf16>, vector<8x128xf32> -> vector<8x128xf32>
    %177 = arith.addf %157, %176 : vector<8x128xf32>
    %178 = vector.extract_strided_slice %40 {offsets = [8, 0], sizes = [8, 32], strides = [1, 1]} : vector<16x32xbf16> to vector<8x32xbf16>
    %179 = vector.extract_strided_slice %43 {offsets = [8, 0], sizes = [8, 32], strides = [1, 1]} : vector<16x32xbf16> to vector<8x32xbf16>
    "tpu.trace_start"() <{level = 10 : i32, message = "qd,kd->qk"}> : () -> ()
    %cst_63 = arith.constant dense<0.000000e+00> : vector<8x8xf32>
    %180 = tpu.matmul %178, %179, %cst_63 {dimension_numbers = #tpu.dot_dimension_numbers<[1], [1], [0], [0], [0, 0, 1, 0], [], []>} : vector<8x32xbf16>, vector<8x32xbf16>, vector<8x8xf32> -> vector<8x8xf32>
    "tpu.trace_stop"() : () -> ()
    %cst_64 = arith.constant dense<0xFF800000> : vector<8xf32>
    %181 = vector.multi_reduction <maximumf>, %180, %cst_64 [1] : vector<8x8xf32> to vector<8xf32>
    %182 = vector.shape_cast %181 : vector<8xf32> to vector<8x1xf32>
    %183 = vector.broadcast %182 : vector<8x1xf32> to vector<8x8xf32>
    %184 = arith.subf %180, %183 : vector<8x8xf32>
    %185 = math.exp %184 : vector<8x8xf32>
    %cst_65 = arith.constant dense<0.000000e+00> : vector<8xf32>
    %186 = vector.multi_reduction <add>, %185, %cst_65 [1] : vector<8x8xf32> to vector<8xf32>
    %187 = vector.shape_cast %186 : vector<8xf32> to vector<8x1xf32>
    %188 = tpu.reciprocal %187 {approx = true} : vector<8x1xf32> -> vector<8x1xf32>
    %189 = vector.broadcast %188 : vector<8x1xf32> to vector<8x8xf32>
    %190 = arith.mulf %185, %189 : vector<8x8xf32>
    %191 = arith.truncf %190 : vector<8x8xf32> to vector<8x8xbf16>
    %192 = vector.extract_strided_slice %46 {offsets = [8, 0], sizes = [8, 32], strides = [1, 1]} : vector<16x32xbf16> to vector<8x32xbf16>
    %cst_66 = arith.constant dense<0.000000e+00> : vector<8x32xf32>
    %193 = tpu.matmul %191, %192, %cst_66 {dimension_numbers = #tpu.dot_dimension_numbers<[1], [0], [0], [1], [0, 0, 1, 1], [], []>} : vector<8x8xbf16>, vector<8x32xbf16>, vector<8x32xf32> -> vector<8x32xf32>
    %194 = arith.truncf %193 : vector<8x32xf32> to vector<8x32xbf16>
    %195 = vector.extract_strided_slice %12 {offsets = [64, 0], sizes = [32, 128], strides = [1, 1]} : vector<128x128xbf16> to vector<32x128xbf16>
    %cst_67 = arith.constant dense<0.000000e+00> : vector<8x128xf32>
    %196 = tpu.matmul %194, %195, %cst_67 {dimension_numbers = #tpu.dot_dimension_numbers<[1], [0], [0], [1], [0, 0, 1, 1], [], []>} : vector<8x32xbf16>, vector<32x128xbf16>, vector<8x128xf32> -> vector<8x128xf32>
    %197 = arith.addf %177, %196 : vector<8x128xf32>
    %198 = vector.extract_strided_slice %51 {offsets = [8, 0], sizes = [8, 32], strides = [1, 1]} : vector<16x32xbf16> to vector<8x32xbf16>
    %199 = vector.extract_strided_slice %54 {offsets = [8, 0], sizes = [8, 32], strides = [1, 1]} : vector<16x32xbf16> to vector<8x32xbf16>
    "tpu.trace_start"() <{level = 10 : i32, message = "qd,kd->qk"}> : () -> ()
    %cst_68 = arith.constant dense<0.000000e+00> : vector<8x8xf32>
    %200 = tpu.matmul %198, %199, %cst_68 {dimension_numbers = #tpu.dot_dimension_numbers<[1], [1], [0], [0], [0, 0, 1, 0], [], []>} : vector<8x32xbf16>, vector<8x32xbf16>, vector<8x8xf32> -> vector<8x8xf32>
    "tpu.trace_stop"() : () -> ()
    %cst_69 = arith.constant dense<0xFF800000> : vector<8xf32>
    %201 = vector.multi_reduction <maximumf>, %200, %cst_69 [1] : vector<8x8xf32> to vector<8xf32>
    %202 = vector.shape_cast %201 : vector<8xf32> to vector<8x1xf32>
    %203 = vector.broadcast %202 : vector<8x1xf32> to vector<8x8xf32>
    %204 = arith.subf %200, %203 : vector<8x8xf32>
    %205 = math.exp %204 : vector<8x8xf32>
    %cst_70 = arith.constant dense<0.000000e+00> : vector<8xf32>
    %206 = vector.multi_reduction <add>, %205, %cst_70 [1] : vector<8x8xf32> to vector<8xf32>
    %207 = vector.shape_cast %206 : vector<8xf32> to vector<8x1xf32>
    %208 = tpu.reciprocal %207 {approx = true} : vector<8x1xf32> -> vector<8x1xf32>
    %209 = vector.broadcast %208 : vector<8x1xf32> to vector<8x8xf32>
    %210 = arith.mulf %205, %209 : vector<8x8xf32>
    %211 = arith.truncf %210 : vector<8x8xf32> to vector<8x8xbf16>
    %212 = vector.extract_strided_slice %57 {offsets = [8, 0], sizes = [8, 32], strides = [1, 1]} : vector<16x32xbf16> to vector<8x32xbf16>
    %cst_71 = arith.constant dense<0.000000e+00> : vector<8x32xf32>
    %213 = tpu.matmul %211, %212, %cst_71 {dimension_numbers = #tpu.dot_dimension_numbers<[1], [0], [0], [1], [0, 0, 1, 1], [], []>} : vector<8x8xbf16>, vector<8x32xbf16>, vector<8x32xf32> -> vector<8x32xf32>
    %214 = arith.truncf %213 : vector<8x32xf32> to vector<8x32xbf16>
    %215 = vector.extract_strided_slice %12 {offsets = [96, 0], sizes = [32, 128], strides = [1, 1]} : vector<128x128xbf16> to vector<32x128xbf16>
    %cst_72 = arith.constant dense<0.000000e+00> : vector<8x128xf32>
    %216 = tpu.matmul %214, %215, %cst_72 {dimension_numbers = #tpu.dot_dimension_numbers<[1], [0], [0], [1], [0, 0, 1, 1], [], []>} : vector<8x32xbf16>, vector<32x128xbf16>, vector<8x128xf32> -> vector<8x128xf32>
    %217 = arith.addf %197, %216 : vector<8x128xf32>
    %218 = vector.broadcast %13 : vector<1x128xf32> to vector<8x128xf32>
    %219 = arith.addf %217, %218 : vector<8x128xf32>
    %220 = tpu.concatenate %138, %219 in 0 : vector<8x128xf32>, vector<8x128xf32> -> vector<16x128xf32>
    %c0_73 = arith.constant 0 : index
    %c0_74 = arith.constant 0 : index
    %221 = vector.load %arg9[%c0_73, %c0_74] : memref<1x128xf32, #tpu.memory_space<vmem>>, vector<1x128xf32>
    %c0_75 = arith.constant 0 : index
    %c0_76 = arith.constant 0 : index
    %222 = vector.load %arg10[%c0_75, %c0_76] : memref<1x128xf32, #tpu.memory_space<vmem>>, vector<1x128xf32>
    %223 = arith.addf %220, %1 : vector<16x128xf32>
    %cst_77 = arith.constant dense<0.000000e+00> : vector<16xf32>
    %224 = vector.multi_reduction <add>, %223, %cst_77 [1] : vector<16x128xf32> to vector<16xf32>
    %225 = vector.shape_cast %224 : vector<16xf32> to vector<16x1xf32>
    %cst_78 = arith.constant 1.280000e+02 : f32
    %226 = vector.broadcast %cst_78 : f32 to vector<16x1xf32>
    %227 = arith.divf %225, %226 : vector<16x1xf32>
    %228 = vector.broadcast %227 : vector<16x1xf32> to vector<16x128xf32>
    %229 = arith.subf %223, %228 : vector<16x128xf32>
    %230 = arith.mulf %229, %229 : vector<16x128xf32>
    %cst_79 = arith.constant dense<0.000000e+00> : vector<16xf32>
    %231 = vector.multi_reduction <add>, %230, %cst_79 [1] : vector<16x128xf32> to vector<16xf32>
    %232 = vector.shape_cast %231 : vector<16xf32> to vector<16x1xf32>
    %cst_80 = arith.constant 1.280000e+02 : f32
    %233 = vector.broadcast %cst_80 : f32 to vector<16x1xf32>
    %234 = arith.divf %232, %233 : vector<16x1xf32>
    %cst_81 = arith.constant 9.99999974E-6 : f32
    %235 = vector.broadcast %cst_81 : f32 to vector<16x1xf32>
    %236 = arith.addf %234, %235 : vector<16x1xf32>
    %237 = math.rsqrt %236 : vector<16x1xf32>
    %238 = vector.broadcast %237 : vector<16x1xf32> to vector<16x128xf32>
    %239 = arith.mulf %229, %238 : vector<16x128xf32>
    %240 = vector.broadcast %221 : vector<1x128xf32> to vector<16x128xf32>
    %241 = arith.mulf %239, %240 : vector<16x128xf32>
    %242 = vector.broadcast %222 : vector<1x128xf32> to vector<16x128xf32>
    %243 = arith.addf %241, %242 : vector<16x128xf32>
    %244 = arith.truncf %243 : vector<16x128xf32> to vector<16x128xbf16>
    %c0_82 = arith.constant 0 : index
    %c0_83 = arith.constant 0 : index
    %245 = vector.load %arg11[%c0_82, %c0_83] : memref<32x32xbf16, #tpu.memory_space<vmem>>, vector<32x32xbf16>
    %c0_84 = arith.constant 0 : index
    %c0_85 = arith.constant 0 : index
    %246 = vector.load %arg12[%c0_84, %c0_85] : memref<32x32xbf16, #tpu.memory_space<vmem>>, vector<32x32xbf16>
    %c0_86 = arith.constant 0 : index
    %c0_87 = arith.constant 0 : index
    %247 = vector.load %arg13[%c0_86, %c0_87] : memref<32x32xbf16, #tpu.memory_space<vmem>>, vector<32x32xbf16>
    %c0_88 = arith.constant 0 : index
    %c0_89 = arith.constant 0 : index
    %248 = vector.load %arg14[%c0_88, %c0_89] : memref<128x128xbf16, #tpu.memory_space<vmem>>, vector<128x128xbf16>
    %c0_90 = arith.constant 0 : index
    %c0_91 = arith.constant 0 : index
    %249 = vector.load %arg15[%c0_90, %c0_91] : memref<1x128xf32, #tpu.memory_space<vmem>>, vector<1x128xf32>
    %250 = vector.extract_strided_slice %244 {offsets = [0, 0], sizes = [16, 32], strides = [1, 1]} : vector<16x128xbf16> to vector<16x32xbf16>
    %cst_92 = arith.constant dense<0.000000e+00> : vector<16x32xf32>
    %251 = tpu.matmul %250, %245, %cst_92 {dimension_numbers = #tpu.dot_dimension_numbers<[1], [0], [0], [1], [0, 0, 1, 1], [], []>} : vector<16x32xbf16>, vector<32x32xbf16>, vector<16x32xf32> -> vector<16x32xf32>
    %cst_93 = arith.constant 4.000000e+00 : f32
    %252 = vector.broadcast %cst_93 : f32 to vector<16x32xf32>
    %253 = arith.mulf %251, %252 : vector<16x32xf32>
    %254 = arith.truncf %253 : vector<16x32xf32> to vector<16x32xbf16>
    %255 = vector.extract_strided_slice %5 {offsets = [0, 0], sizes = [32, 32], strides = [1, 1]} : vector<32x128xbf16> to vector<32x32xbf16>
    %cst_94 = arith.constant dense<0.000000e+00> : vector<32x32xf32>
    %256 = tpu.matmul %255, %246, %cst_94 {dimension_numbers = #tpu.dot_dimension_numbers<[1], [0], [0], [1], [0, 0, 1, 1], [], []>} : vector<32x32xbf16>, vector<32x32xbf16>, vector<32x32xf32> -> vector<32x32xf32>
    %257 = arith.truncf %256 : vector<32x32xf32> to vector<32x32xbf16>
    %258 = vector.extract_strided_slice %8 {offsets = [0, 0], sizes = [32, 32], strides = [1, 1]} : vector<32x128xbf16> to vector<32x32xbf16>
    %cst_95 = arith.constant dense<0.000000e+00> : vector<32x32xf32>
    %259 = tpu.matmul %258, %247, %cst_95 {dimension_numbers = #tpu.dot_dimension_numbers<[1], [0], [0], [1], [0, 0, 1, 1], [], []>} : vector<32x32xbf16>, vector<32x32xbf16>, vector<32x32xf32> -> vector<32x32xf32>
    %260 = arith.truncf %259 : vector<32x32xf32> to vector<32x32xbf16>
    %261 = vector.extract_strided_slice %244 {offsets = [0, 32], sizes = [16, 32], strides = [1, 1]} : vector<16x128xbf16> to vector<16x32xbf16>
    %cst_96 = arith.constant dense<0.000000e+00> : vector<16x32xf32>
    %262 = tpu.matmul %261, %245, %cst_96 {dimension_numbers = #tpu.dot_dimension_numbers<[1], [0], [0], [1], [0, 0, 1, 1], [], []>} : vector<16x32xbf16>, vector<32x32xbf16>, vector<16x32xf32> -> vector<16x32xf32>
    %cst_97 = arith.constant 4.000000e+00 : f32
    %263 = vector.broadcast %cst_97 : f32 to vector<16x32xf32>
    %264 = arith.mulf %262, %263 : vector<16x32xf32>
    %265 = arith.truncf %264 : vector<16x32xf32> to vector<16x32xbf16>
    %266 = vector.extract_strided_slice %5 {offsets = [0, 32], sizes = [32, 32], strides = [1, 1]} : vector<32x128xbf16> to vector<32x32xbf16>
    %cst_98 = arith.constant dense<0.000000e+00> : vector<32x32xf32>
    %267 = tpu.matmul %266, %246, %cst_98 {dimension_numbers = #tpu.dot_dimension_numbers<[1], [0], [0], [1], [0, 0, 1, 1], [], []>} : vector<32x32xbf16>, vector<32x32xbf16>, vector<32x32xf32> -> vector<32x32xf32>
    %268 = arith.truncf %267 : vector<32x32xf32> to vector<32x32xbf16>
    %269 = vector.extract_strided_slice %8 {offsets = [0, 32], sizes = [32, 32], strides = [1, 1]} : vector<32x128xbf16> to vector<32x32xbf16>
    %cst_99 = arith.constant dense<0.000000e+00> : vector<32x32xf32>
    %270 = tpu.matmul %269, %247, %cst_99 {dimension_numbers = #tpu.dot_dimension_numbers<[1], [0], [0], [1], [0, 0, 1, 1], [], []>} : vector<32x32xbf16>, vector<32x32xbf16>, vector<32x32xf32> -> vector<32x32xf32>
    %271 = arith.truncf %270 : vector<32x32xf32> to vector<32x32xbf16>
    %272 = vector.extract_strided_slice %244 {offsets = [0, 64], sizes = [16, 32], strides = [1, 1]} : vector<16x128xbf16> to vector<16x32xbf16>
    %cst_100 = arith.constant dense<0.000000e+00> : vector<16x32xf32>
    %273 = tpu.matmul %272, %245, %cst_100 {dimension_numbers = #tpu.dot_dimension_numbers<[1], [0], [0], [1], [0, 0, 1, 1], [], []>} : vector<16x32xbf16>, vector<32x32xbf16>, vector<16x32xf32> -> vector<16x32xf32>
    %cst_101 = arith.constant 4.000000e+00 : f32
    %274 = vector.broadcast %cst_101 : f32 to vector<16x32xf32>
    %275 = arith.mulf %273, %274 : vector<16x32xf32>
    %276 = arith.truncf %275 : vector<16x32xf32> to vector<16x32xbf16>
    %277 = vector.extract_strided_slice %5 {offsets = [0, 64], sizes = [32, 32], strides = [1, 1]} : vector<32x128xbf16> to vector<32x32xbf16>
    %cst_102 = arith.constant dense<0.000000e+00> : vector<32x32xf32>
    %278 = tpu.matmul %277, %246, %cst_102 {dimension_numbers = #tpu.dot_dimension_numbers<[1], [0], [0], [1], [0, 0, 1, 1], [], []>} : vector<32x32xbf16>, vector<32x32xbf16>, vector<32x32xf32> -> vector<32x32xf32>
    %279 = arith.truncf %278 : vector<32x32xf32> to vector<32x32xbf16>
    %280 = vector.extract_strided_slice %8 {offsets = [0, 64], sizes = [32, 32], strides = [1, 1]} : vector<32x128xbf16> to vector<32x32xbf16>
    %cst_103 = arith.constant dense<0.000000e+00> : vector<32x32xf32>
    %281 = tpu.matmul %280, %247, %cst_103 {dimension_numbers = #tpu.dot_dimension_numbers<[1], [0], [0], [1], [0, 0, 1, 1], [], []>} : vector<32x32xbf16>, vector<32x32xbf16>, vector<32x32xf32> -> vector<32x32xf32>
    %282 = arith.truncf %281 : vector<32x32xf32> to vector<32x32xbf16>
    %283 = vector.extract_strided_slice %244 {offsets = [0, 96], sizes = [16, 32], strides = [1, 1]} : vector<16x128xbf16> to vector<16x32xbf16>
    %cst_104 = arith.constant dense<0.000000e+00> : vector<16x32xf32>
    %284 = tpu.matmul %283, %245, %cst_104 {dimension_numbers = #tpu.dot_dimension_numbers<[1], [0], [0], [1], [0, 0, 1, 1], [], []>} : vector<16x32xbf16>, vector<32x32xbf16>, vector<16x32xf32> -> vector<16x32xf32>
    %cst_105 = arith.constant 4.000000e+00 : f32
    %285 = vector.broadcast %cst_105 : f32 to vector<16x32xf32>
    %286 = arith.mulf %284, %285 : vector<16x32xf32>
    %287 = arith.truncf %286 : vector<16x32xf32> to vector<16x32xbf16>
    %288 = vector.extract_strided_slice %5 {offsets = [0, 96], sizes = [32, 32], strides = [1, 1]} : vector<32x128xbf16> to vector<32x32xbf16>
    %cst_106 = arith.constant dense<0.000000e+00> : vector<32x32xf32>
    %289 = tpu.matmul %288, %246, %cst_106 {dimension_numbers = #tpu.dot_dimension_numbers<[1], [0], [0], [1], [0, 0, 1, 1], [], []>} : vector<32x32xbf16>, vector<32x32xbf16>, vector<32x32xf32> -> vector<32x32xf32>
    %290 = arith.truncf %289 : vector<32x32xf32> to vector<32x32xbf16>
    %291 = vector.extract_strided_slice %8 {offsets = [0, 96], sizes = [32, 32], strides = [1, 1]} : vector<32x128xbf16> to vector<32x32xbf16>
    %cst_107 = arith.constant dense<0.000000e+00> : vector<32x32xf32>
    %292 = tpu.matmul %291, %247, %cst_107 {dimension_numbers = #tpu.dot_dimension_numbers<[1], [0], [0], [1], [0, 0, 1, 1], [], []>} : vector<32x32xbf16>, vector<32x32xbf16>, vector<32x32xf32> -> vector<32x32xf32>
    %293 = arith.truncf %292 : vector<32x32xf32> to vector<32x32xbf16>
    %294 = vector.extract_strided_slice %254 {offsets = [0, 0], sizes = [8, 32], strides = [1, 1]} : vector<16x32xbf16> to vector<8x32xbf16>
    %295 = vector.extract_strided_slice %257 {offsets = [0, 0], sizes = [16, 32], strides = [1, 1]} : vector<32x32xbf16> to vector<16x32xbf16>
    "tpu.trace_start"() <{level = 10 : i32, message = "qd,kd->qk"}> : () -> ()
    %cst_108 = arith.constant dense<0.000000e+00> : vector<8x16xf32>
    %296 = tpu.matmul %294, %295, %cst_108 {dimension_numbers = #tpu.dot_dimension_numbers<[1], [1], [0], [0], [0, 0, 1, 0], [], []>} : vector<8x32xbf16>, vector<16x32xbf16>, vector<8x16xf32> -> vector<8x16xf32>
    "tpu.trace_stop"() : () -> ()
    %cst_109 = arith.constant dense<0xFF800000> : vector<8xf32>
    %297 = vector.multi_reduction <maximumf>, %296, %cst_109 [1] : vector<8x16xf32> to vector<8xf32>
    %298 = vector.shape_cast %297 : vector<8xf32> to vector<8x1xf32>
    %299 = vector.broadcast %298 : vector<8x1xf32> to vector<8x16xf32>
    %300 = arith.subf %296, %299 : vector<8x16xf32>
    %301 = math.exp %300 : vector<8x16xf32>
    %cst_110 = arith.constant dense<0.000000e+00> : vector<8xf32>
    %302 = vector.multi_reduction <add>, %301, %cst_110 [1] : vector<8x16xf32> to vector<8xf32>
    %303 = vector.shape_cast %302 : vector<8xf32> to vector<8x1xf32>
    %304 = tpu.reciprocal %303 {approx = true} : vector<8x1xf32> -> vector<8x1xf32>
    %305 = vector.broadcast %304 : vector<8x1xf32> to vector<8x16xf32>
    %306 = arith.mulf %301, %305 : vector<8x16xf32>
    %307 = arith.truncf %306 : vector<8x16xf32> to vector<8x16xbf16>
    %308 = vector.extract_strided_slice %260 {offsets = [0, 0], sizes = [16, 32], strides = [1, 1]} : vector<32x32xbf16> to vector<16x32xbf16>
    %cst_111 = arith.constant dense<0.000000e+00> : vector<8x32xf32>
    %309 = tpu.matmul %307, %308, %cst_111 {dimension_numbers = #tpu.dot_dimension_numbers<[1], [0], [0], [1], [0, 0, 1, 1], [], []>} : vector<8x16xbf16>, vector<16x32xbf16>, vector<8x32xf32> -> vector<8x32xf32>
    %310 = arith.truncf %309 : vector<8x32xf32> to vector<8x32xbf16>
    %311 = vector.extract_strided_slice %248 {offsets = [0, 0], sizes = [32, 128], strides = [1, 1]} : vector<128x128xbf16> to vector<32x128xbf16>
    %cst_112 = arith.constant dense<0.000000e+00> : vector<8x128xf32>
    %312 = tpu.matmul %310, %311, %cst_112 {dimension_numbers = #tpu.dot_dimension_numbers<[1], [0], [0], [1], [0, 0, 1, 1], [], []>} : vector<8x32xbf16>, vector<32x128xbf16>, vector<8x128xf32> -> vector<8x128xf32>
    %313 = vector.extract_strided_slice %265 {offsets = [0, 0], sizes = [8, 32], strides = [1, 1]} : vector<16x32xbf16> to vector<8x32xbf16>
    %314 = vector.extract_strided_slice %268 {offsets = [0, 0], sizes = [16, 32], strides = [1, 1]} : vector<32x32xbf16> to vector<16x32xbf16>
    "tpu.trace_start"() <{level = 10 : i32, message = "qd,kd->qk"}> : () -> ()
    %cst_113 = arith.constant dense<0.000000e+00> : vector<8x16xf32>
    %315 = tpu.matmul %313, %314, %cst_113 {dimension_numbers = #tpu.dot_dimension_numbers<[1], [1], [0], [0], [0, 0, 1, 0], [], []>} : vector<8x32xbf16>, vector<16x32xbf16>, vector<8x16xf32> -> vector<8x16xf32>
    "tpu.trace_stop"() : () -> ()
    %cst_114 = arith.constant dense<0xFF800000> : vector<8xf32>
    %316 = vector.multi_reduction <maximumf>, %315, %cst_114 [1] : vector<8x16xf32> to vector<8xf32>
    %317 = vector.shape_cast %316 : vector<8xf32> to vector<8x1xf32>
    %318 = vector.broadcast %317 : vector<8x1xf32> to vector<8x16xf32>
    %319 = arith.subf %315, %318 : vector<8x16xf32>
    %320 = math.exp %319 : vector<8x16xf32>
    %cst_115 = arith.constant dense<0.000000e+00> : vector<8xf32>
    %321 = vector.multi_reduction <add>, %320, %cst_115 [1] : vector<8x16xf32> to vector<8xf32>
    %322 = vector.shape_cast %321 : vector<8xf32> to vector<8x1xf32>
    %323 = tpu.reciprocal %322 {approx = true} : vector<8x1xf32> -> vector<8x1xf32>
    %324 = vector.broadcast %323 : vector<8x1xf32> to vector<8x16xf32>
    %325 = arith.mulf %320, %324 : vector<8x16xf32>
    %326 = arith.truncf %325 : vector<8x16xf32> to vector<8x16xbf16>
    %327 = vector.extract_strided_slice %271 {offsets = [0, 0], sizes = [16, 32], strides = [1, 1]} : vector<32x32xbf16> to vector<16x32xbf16>
    %cst_116 = arith.constant dense<0.000000e+00> : vector<8x32xf32>
    %328 = tpu.matmul %326, %327, %cst_116 {dimension_numbers = #tpu.dot_dimension_numbers<[1], [0], [0], [1], [0, 0, 1, 1], [], []>} : vector<8x16xbf16>, vector<16x32xbf16>, vector<8x32xf32> -> vector<8x32xf32>
    %329 = arith.truncf %328 : vector<8x32xf32> to vector<8x32xbf16>
    %330 = vector.extract_strided_slice %248 {offsets = [32, 0], sizes = [32, 128], strides = [1, 1]} : vector<128x128xbf16> to vector<32x128xbf16>
    %cst_117 = arith.constant dense<0.000000e+00> : vector<8x128xf32>
    %331 = tpu.matmul %329, %330, %cst_117 {dimension_numbers = #tpu.dot_dimension_numbers<[1], [0], [0], [1], [0, 0, 1, 1], [], []>} : vector<8x32xbf16>, vector<32x128xbf16>, vector<8x128xf32> -> vector<8x128xf32>
    %332 = arith.addf %312, %331 : vector<8x128xf32>
    %333 = vector.extract_strided_slice %276 {offsets = [0, 0], sizes = [8, 32], strides = [1, 1]} : vector<16x32xbf16> to vector<8x32xbf16>
    %334 = vector.extract_strided_slice %279 {offsets = [0, 0], sizes = [16, 32], strides = [1, 1]} : vector<32x32xbf16> to vector<16x32xbf16>
    "tpu.trace_start"() <{level = 10 : i32, message = "qd,kd->qk"}> : () -> ()
    %cst_118 = arith.constant dense<0.000000e+00> : vector<8x16xf32>
    %335 = tpu.matmul %333, %334, %cst_118 {dimension_numbers = #tpu.dot_dimension_numbers<[1], [1], [0], [0], [0, 0, 1, 0], [], []>} : vector<8x32xbf16>, vector<16x32xbf16>, vector<8x16xf32> -> vector<8x16xf32>
    "tpu.trace_stop"() : () -> ()
    %cst_119 = arith.constant dense<0xFF800000> : vector<8xf32>
    %336 = vector.multi_reduction <maximumf>, %335, %cst_119 [1] : vector<8x16xf32> to vector<8xf32>
    %337 = vector.shape_cast %336 : vector<8xf32> to vector<8x1xf32>
    %338 = vector.broadcast %337 : vector<8x1xf32> to vector<8x16xf32>
    %339 = arith.subf %335, %338 : vector<8x16xf32>
    %340 = math.exp %339 : vector<8x16xf32>
    %cst_120 = arith.constant dense<0.000000e+00> : vector<8xf32>
    %341 = vector.multi_reduction <add>, %340, %cst_120 [1] : vector<8x16xf32> to vector<8xf32>
    %342 = vector.shape_cast %341 : vector<8xf32> to vector<8x1xf32>
    %343 = tpu.reciprocal %342 {approx = true} : vector<8x1xf32> -> vector<8x1xf32>
    %344 = vector.broadcast %343 : vector<8x1xf32> to vector<8x16xf32>
    %345 = arith.mulf %340, %344 : vector<8x16xf32>
    %346 = arith.truncf %345 : vector<8x16xf32> to vector<8x16xbf16>
    %347 = vector.extract_strided_slice %282 {offsets = [0, 0], sizes = [16, 32], strides = [1, 1]} : vector<32x32xbf16> to vector<16x32xbf16>
    %cst_121 = arith.constant dense<0.000000e+00> : vector<8x32xf32>
    %348 = tpu.matmul %346, %347, %cst_121 {dimension_numbers = #tpu.dot_dimension_numbers<[1], [0], [0], [1], [0, 0, 1, 1], [], []>} : vector<8x16xbf16>, vector<16x32xbf16>, vector<8x32xf32> -> vector<8x32xf32>
    %349 = arith.truncf %348 : vector<8x32xf32> to vector<8x32xbf16>
    %350 = vector.extract_strided_slice %248 {offsets = [64, 0], sizes = [32, 128], strides = [1, 1]} : vector<128x128xbf16> to vector<32x128xbf16>
    %cst_122 = arith.constant dense<0.000000e+00> : vector<8x128xf32>
    %351 = tpu.matmul %349, %350, %cst_122 {dimension_numbers = #tpu.dot_dimension_numbers<[1], [0], [0], [1], [0, 0, 1, 1], [], []>} : vector<8x32xbf16>, vector<32x128xbf16>, vector<8x128xf32> -> vector<8x128xf32>
    %352 = arith.addf %332, %351 : vector<8x128xf32>
    %353 = vector.extract_strided_slice %287 {offsets = [0, 0], sizes = [8, 32], strides = [1, 1]} : vector<16x32xbf16> to vector<8x32xbf16>
    %354 = vector.extract_strided_slice %290 {offsets = [0, 0], sizes = [16, 32], strides = [1, 1]} : vector<32x32xbf16> to vector<16x32xbf16>
    "tpu.trace_start"() <{level = 10 : i32, message = "qd,kd->qk"}> : () -> ()
    %cst_123 = arith.constant dense<0.000000e+00> : vector<8x16xf32>
    %355 = tpu.matmul %353, %354, %cst_123 {dimension_numbers = #tpu.dot_dimension_numbers<[1], [1], [0], [0], [0, 0, 1, 0], [], []>} : vector<8x32xbf16>, vector<16x32xbf16>, vector<8x16xf32> -> vector<8x16xf32>
    "tpu.trace_stop"() : () -> ()
    %cst_124 = arith.constant dense<0xFF800000> : vector<8xf32>
    %356 = vector.multi_reduction <maximumf>, %355, %cst_124 [1] : vector<8x16xf32> to vector<8xf32>
    %357 = vector.shape_cast %356 : vector<8xf32> to vector<8x1xf32>
    %358 = vector.broadcast %357 : vector<8x1xf32> to vector<8x16xf32>
    %359 = arith.subf %355, %358 : vector<8x16xf32>
    %360 = math.exp %359 : vector<8x16xf32>
    %cst_125 = arith.constant dense<0.000000e+00> : vector<8xf32>
    %361 = vector.multi_reduction <add>, %360, %cst_125 [1] : vector<8x16xf32> to vector<8xf32>
    %362 = vector.shape_cast %361 : vector<8xf32> to vector<8x1xf32>
    %363 = tpu.reciprocal %362 {approx = true} : vector<8x1xf32> -> vector<8x1xf32>
    %364 = vector.broadcast %363 : vector<8x1xf32> to vector<8x16xf32>
    %365 = arith.mulf %360, %364 : vector<8x16xf32>
    %366 = arith.truncf %365 : vector<8x16xf32> to vector<8x16xbf16>
    %367 = vector.extract_strided_slice %293 {offsets = [0, 0], sizes = [16, 32], strides = [1, 1]} : vector<32x32xbf16> to vector<16x32xbf16>
    %cst_126 = arith.constant dense<0.000000e+00> : vector<8x32xf32>
    %368 = tpu.matmul %366, %367, %cst_126 {dimension_numbers = #tpu.dot_dimension_numbers<[1], [0], [0], [1], [0, 0, 1, 1], [], []>} : vector<8x16xbf16>, vector<16x32xbf16>, vector<8x32xf32> -> vector<8x32xf32>
    %369 = arith.truncf %368 : vector<8x32xf32> to vector<8x32xbf16>
    %370 = vector.extract_strided_slice %248 {offsets = [96, 0], sizes = [32, 128], strides = [1, 1]} : vector<128x128xbf16> to vector<32x128xbf16>
    %cst_127 = arith.constant dense<0.000000e+00> : vector<8x128xf32>
    %371 = tpu.matmul %369, %370, %cst_127 {dimension_numbers = #tpu.dot_dimension_numbers<[1], [0], [0], [1], [0, 0, 1, 1], [], []>} : vector<8x32xbf16>, vector<32x128xbf16>, vector<8x128xf32> -> vector<8x128xf32>
    %372 = arith.addf %352, %371 : vector<8x128xf32>
    %373 = vector.broadcast %249 : vector<1x128xf32> to vector<8x128xf32>
    %374 = arith.addf %372, %373 : vector<8x128xf32>
    %375 = vector.extract_strided_slice %254 {offsets = [8, 0], sizes = [8, 32], strides = [1, 1]} : vector<16x32xbf16> to vector<8x32xbf16>
    %376 = vector.extract_strided_slice %257 {offsets = [16, 0], sizes = [16, 32], strides = [1, 1]} : vector<32x32xbf16> to vector<16x32xbf16>
    "tpu.trace_start"() <{level = 10 : i32, message = "qd,kd->qk"}> : () -> ()
    %cst_128 = arith.constant dense<0.000000e+00> : vector<8x16xf32>
    %377 = tpu.matmul %375, %376, %cst_128 {dimension_numbers = #tpu.dot_dimension_numbers<[1], [1], [0], [0], [0, 0, 1, 0], [], []>} : vector<8x32xbf16>, vector<16x32xbf16>, vector<8x16xf32> -> vector<8x16xf32>
    "tpu.trace_stop"() : () -> ()
    %cst_129 = arith.constant dense<0xFF800000> : vector<8xf32>
    %378 = vector.multi_reduction <maximumf>, %377, %cst_129 [1] : vector<8x16xf32> to vector<8xf32>
    %379 = vector.shape_cast %378 : vector<8xf32> to vector<8x1xf32>
    %380 = vector.broadcast %379 : vector<8x1xf32> to vector<8x16xf32>
    %381 = arith.subf %377, %380 : vector<8x16xf32>
    %382 = math.exp %381 : vector<8x16xf32>
    %cst_130 = arith.constant dense<0.000000e+00> : vector<8xf32>
    %383 = vector.multi_reduction <add>, %382, %cst_130 [1] : vector<8x16xf32> to vector<8xf32>
    %384 = vector.shape_cast %383 : vector<8xf32> to vector<8x1xf32>
    %385 = tpu.reciprocal %384 {approx = true} : vector<8x1xf32> -> vector<8x1xf32>
    %386 = vector.broadcast %385 : vector<8x1xf32> to vector<8x16xf32>
    %387 = arith.mulf %382, %386 : vector<8x16xf32>
    %388 = arith.truncf %387 : vector<8x16xf32> to vector<8x16xbf16>
    %389 = vector.extract_strided_slice %260 {offsets = [16, 0], sizes = [16, 32], strides = [1, 1]} : vector<32x32xbf16> to vector<16x32xbf16>
    %cst_131 = arith.constant dense<0.000000e+00> : vector<8x32xf32>
    %390 = tpu.matmul %388, %389, %cst_131 {dimension_numbers = #tpu.dot_dimension_numbers<[1], [0], [0], [1], [0, 0, 1, 1], [], []>} : vector<8x16xbf16>, vector<16x32xbf16>, vector<8x32xf32> -> vector<8x32xf32>
    %391 = arith.truncf %390 : vector<8x32xf32> to vector<8x32xbf16>
    %392 = vector.extract_strided_slice %248 {offsets = [0, 0], sizes = [32, 128], strides = [1, 1]} : vector<128x128xbf16> to vector<32x128xbf16>
    %cst_132 = arith.constant dense<0.000000e+00> : vector<8x128xf32>
    %393 = tpu.matmul %391, %392, %cst_132 {dimension_numbers = #tpu.dot_dimension_numbers<[1], [0], [0], [1], [0, 0, 1, 1], [], []>} : vector<8x32xbf16>, vector<32x128xbf16>, vector<8x128xf32> -> vector<8x128xf32>
    %394 = vector.extract_strided_slice %265 {offsets = [8, 0], sizes = [8, 32], strides = [1, 1]} : vector<16x32xbf16> to vector<8x32xbf16>
    %395 = vector.extract_strided_slice %268 {offsets = [16, 0], sizes = [16, 32], strides = [1, 1]} : vector<32x32xbf16> to vector<16x32xbf16>
    "tpu.trace_start"() <{level = 10 : i32, message = "qd,kd->qk"}> : () -> ()
    %cst_133 = arith.constant dense<0.000000e+00> : vector<8x16xf32>
    %396 = tpu.matmul %394, %395, %cst_133 {dimension_numbers = #tpu.dot_dimension_numbers<[1], [1], [0], [0], [0, 0, 1, 0], [], []>} : vector<8x32xbf16>, vector<16x32xbf16>, vector<8x16xf32> -> vector<8x16xf32>
    "tpu.trace_stop"() : () -> ()
    %cst_134 = arith.constant dense<0xFF800000> : vector<8xf32>
    %397 = vector.multi_reduction <maximumf>, %396, %cst_134 [1] : vector<8x16xf32> to vector<8xf32>
    %398 = vector.shape_cast %397 : vector<8xf32> to vector<8x1xf32>
    %399 = vector.broadcast %398 : vector<8x1xf32> to vector<8x16xf32>
    %400 = arith.subf %396, %399 : vector<8x16xf32>
    %401 = math.exp %400 : vector<8x16xf32>
    %cst_135 = arith.constant dense<0.000000e+00> : vector<8xf32>
    %402 = vector.multi_reduction <add>, %401, %cst_135 [1] : vector<8x16xf32> to vector<8xf32>
    %403 = vector.shape_cast %402 : vector<8xf32> to vector<8x1xf32>
    %404 = tpu.reciprocal %403 {approx = true} : vector<8x1xf32> -> vector<8x1xf32>
    %405 = vector.broadcast %404 : vector<8x1xf32> to vector<8x16xf32>
    %406 = arith.mulf %401, %405 : vector<8x16xf32>
    %407 = arith.truncf %406 : vector<8x16xf32> to vector<8x16xbf16>
    %408 = vector.extract_strided_slice %271 {offsets = [16, 0], sizes = [16, 32], strides = [1, 1]} : vector<32x32xbf16> to vector<16x32xbf16>
    %cst_136 = arith.constant dense<0.000000e+00> : vector<8x32xf32>
    %409 = tpu.matmul %407, %408, %cst_136 {dimension_numbers = #tpu.dot_dimension_numbers<[1], [0], [0], [1], [0, 0, 1, 1], [], []>} : vector<8x16xbf16>, vector<16x32xbf16>, vector<8x32xf32> -> vector<8x32xf32>
    %410 = arith.truncf %409 : vector<8x32xf32> to vector<8x32xbf16>
    %411 = vector.extract_strided_slice %248 {offsets = [32, 0], sizes = [32, 128], strides = [1, 1]} : vector<128x128xbf16> to vector<32x128xbf16>
    %cst_137 = arith.constant dense<0.000000e+00> : vector<8x128xf32>
    %412 = tpu.matmul %410, %411, %cst_137 {dimension_numbers = #tpu.dot_dimension_numbers<[1], [0], [0], [1], [0, 0, 1, 1], [], []>} : vector<8x32xbf16>, vector<32x128xbf16>, vector<8x128xf32> -> vector<8x128xf32>
    %413 = arith.addf %393, %412 : vector<8x128xf32>
    %414 = vector.extract_strided_slice %276 {offsets = [8, 0], sizes = [8, 32], strides = [1, 1]} : vector<16x32xbf16> to vector<8x32xbf16>
    %415 = vector.extract_strided_slice %279 {offsets = [16, 0], sizes = [16, 32], strides = [1, 1]} : vector<32x32xbf16> to vector<16x32xbf16>
    "tpu.trace_start"() <{level = 10 : i32, message = "qd,kd->qk"}> : () -> ()
    %cst_138 = arith.constant dense<0.000000e+00> : vector<8x16xf32>
    %416 = tpu.matmul %414, %415, %cst_138 {dimension_numbers = #tpu.dot_dimension_numbers<[1], [1], [0], [0], [0, 0, 1, 0], [], []>} : vector<8x32xbf16>, vector<16x32xbf16>, vector<8x16xf32> -> vector<8x16xf32>
    "tpu.trace_stop"() : () -> ()
    %cst_139 = arith.constant dense<0xFF800000> : vector<8xf32>
    %417 = vector.multi_reduction <maximumf>, %416, %cst_139 [1] : vector<8x16xf32> to vector<8xf32>
    %418 = vector.shape_cast %417 : vector<8xf32> to vector<8x1xf32>
    %419 = vector.broadcast %418 : vector<8x1xf32> to vector<8x16xf32>
    %420 = arith.subf %416, %419 : vector<8x16xf32>
    %421 = math.exp %420 : vector<8x16xf32>
    %cst_140 = arith.constant dense<0.000000e+00> : vector<8xf32>
    %422 = vector.multi_reduction <add>, %421, %cst_140 [1] : vector<8x16xf32> to vector<8xf32>
    %423 = vector.shape_cast %422 : vector<8xf32> to vector<8x1xf32>
    %424 = tpu.reciprocal %423 {approx = true} : vector<8x1xf32> -> vector<8x1xf32>
    %425 = vector.broadcast %424 : vector<8x1xf32> to vector<8x16xf32>
    %426 = arith.mulf %421, %425 : vector<8x16xf32>
    %427 = arith.truncf %426 : vector<8x16xf32> to vector<8x16xbf16>
    %428 = vector.extract_strided_slice %282 {offsets = [16, 0], sizes = [16, 32], strides = [1, 1]} : vector<32x32xbf16> to vector<16x32xbf16>
    %cst_141 = arith.constant dense<0.000000e+00> : vector<8x32xf32>
    %429 = tpu.matmul %427, %428, %cst_141 {dimension_numbers = #tpu.dot_dimension_numbers<[1], [0], [0], [1], [0, 0, 1, 1], [], []>} : vector<8x16xbf16>, vector<16x32xbf16>, vector<8x32xf32> -> vector<8x32xf32>
    %430 = arith.truncf %429 : vector<8x32xf32> to vector<8x32xbf16>
    %431 = vector.extract_strided_slice %248 {offsets = [64, 0], sizes = [32, 128], strides = [1, 1]} : vector<128x128xbf16> to vector<32x128xbf16>
    %cst_142 = arith.constant dense<0.000000e+00> : vector<8x128xf32>
    %432 = tpu.matmul %430, %431, %cst_142 {dimension_numbers = #tpu.dot_dimension_numbers<[1], [0], [0], [1], [0, 0, 1, 1], [], []>} : vector<8x32xbf16>, vector<32x128xbf16>, vector<8x128xf32> -> vector<8x128xf32>
    %433 = arith.addf %413, %432 : vector<8x128xf32>
    %434 = vector.extract_strided_slice %287 {offsets = [8, 0], sizes = [8, 32], strides = [1, 1]} : vector<16x32xbf16> to vector<8x32xbf16>
    %435 = vector.extract_strided_slice %290 {offsets = [16, 0], sizes = [16, 32], strides = [1, 1]} : vector<32x32xbf16> to vector<16x32xbf16>
    "tpu.trace_start"() <{level = 10 : i32, message = "qd,kd->qk"}> : () -> ()
    %cst_143 = arith.constant dense<0.000000e+00> : vector<8x16xf32>
    %436 = tpu.matmul %434, %435, %cst_143 {dimension_numbers = #tpu.dot_dimension_numbers<[1], [1], [0], [0], [0, 0, 1, 0], [], []>} : vector<8x32xbf16>, vector<16x32xbf16>, vector<8x16xf32> -> vector<8x16xf32>
    "tpu.trace_stop"() : () -> ()
    %cst_144 = arith.constant dense<0xFF800000> : vector<8xf32>
    %437 = vector.multi_reduction <maximumf>, %436, %cst_144 [1] : vector<8x16xf32> to vector<8xf32>
    %438 = vector.shape_cast %437 : vector<8xf32> to vector<8x1xf32>
    %439 = vector.broadcast %438 : vector<8x1xf32> to vector<8x16xf32>
    %440 = arith.subf %436, %439 : vector<8x16xf32>
    %441 = math.exp %440 : vector<8x16xf32>
    %cst_145 = arith.constant dense<0.000000e+00> : vector<8xf32>
    %442 = vector.multi_reduction <add>, %441, %cst_145 [1] : vector<8x16xf32> to vector<8xf32>
    %443 = vector.shape_cast %442 : vector<8xf32> to vector<8x1xf32>
    %444 = tpu.reciprocal %443 {approx = true} : vector<8x1xf32> -> vector<8x1xf32>
    %445 = vector.broadcast %444 : vector<8x1xf32> to vector<8x16xf32>
    %446 = arith.mulf %441, %445 : vector<8x16xf32>
    %447 = arith.truncf %446 : vector<8x16xf32> to vector<8x16xbf16>
    %448 = vector.extract_strided_slice %293 {offsets = [16, 0], sizes = [16, 32], strides = [1, 1]} : vector<32x32xbf16> to vector<16x32xbf16>
    %cst_146 = arith.constant dense<0.000000e+00> : vector<8x32xf32>
    %449 = tpu.matmul %447, %448, %cst_146 {dimension_numbers = #tpu.dot_dimension_numbers<[1], [0], [0], [1], [0, 0, 1, 1], [], []>} : vector<8x16xbf16>, vector<16x32xbf16>, vector<8x32xf32> -> vector<8x32xf32>
    %450 = arith.truncf %449 : vector<8x32xf32> to vector<8x32xbf16>
    %451 = vector.extract_strided_slice %248 {offsets = [96, 0], sizes = [32, 128], strides = [1, 1]} : vector<128x128xbf16> to vector<32x128xbf16>
    %cst_147 = arith.constant dense<0.000000e+00> : vector<8x128xf32>
    %452 = tpu.matmul %450, %451, %cst_147 {dimension_numbers = #tpu.dot_dimension_numbers<[1], [0], [0], [1], [0, 0, 1, 1], [], []>} : vector<8x32xbf16>, vector<32x128xbf16>, vector<8x128xf32> -> vector<8x128xf32>
    %453 = arith.addf %433, %452 : vector<8x128xf32>
    %454 = vector.broadcast %249 : vector<1x128xf32> to vector<8x128xf32>
    %455 = arith.addf %453, %454 : vector<8x128xf32>
    %456 = tpu.concatenate %374, %455 in 0 : vector<8x128xf32>, vector<8x128xf32> -> vector<16x128xf32>
    %c0_148 = arith.constant 0 : index
    %c0_149 = arith.constant 0 : index
    %457 = vector.load %arg16[%c0_148, %c0_149] : memref<1x128xf32, #tpu.memory_space<vmem>>, vector<1x128xf32>
    %c0_150 = arith.constant 0 : index
    %c0_151 = arith.constant 0 : index
    %458 = vector.load %arg17[%c0_150, %c0_151] : memref<1x128xf32, #tpu.memory_space<vmem>>, vector<1x128xf32>
    %459 = arith.addf %456, %243 : vector<16x128xf32>
    %cst_152 = arith.constant dense<0.000000e+00> : vector<16xf32>
    %460 = vector.multi_reduction <add>, %459, %cst_152 [1] : vector<16x128xf32> to vector<16xf32>
    %461 = vector.shape_cast %460 : vector<16xf32> to vector<16x1xf32>
    %cst_153 = arith.constant 1.280000e+02 : f32
    %462 = vector.broadcast %cst_153 : f32 to vector<16x1xf32>
    %463 = arith.divf %461, %462 : vector<16x1xf32>
    %464 = vector.broadcast %463 : vector<16x1xf32> to vector<16x128xf32>
    %465 = arith.subf %459, %464 : vector<16x128xf32>
    %466 = arith.mulf %465, %465 : vector<16x128xf32>
    %cst_154 = arith.constant dense<0.000000e+00> : vector<16xf32>
    %467 = vector.multi_reduction <add>, %466, %cst_154 [1] : vector<16x128xf32> to vector<16xf32>
    %468 = vector.shape_cast %467 : vector<16xf32> to vector<16x1xf32>
    %cst_155 = arith.constant 1.280000e+02 : f32
    %469 = vector.broadcast %cst_155 : f32 to vector<16x1xf32>
    %470 = arith.divf %468, %469 : vector<16x1xf32>
    %cst_156 = arith.constant 9.99999974E-6 : f32
    %471 = vector.broadcast %cst_156 : f32 to vector<16x1xf32>
    %472 = arith.addf %470, %471 : vector<16x1xf32>
    %473 = math.rsqrt %472 : vector<16x1xf32>
    %474 = vector.broadcast %473 : vector<16x1xf32> to vector<16x128xf32>
    %475 = arith.mulf %465, %474 : vector<16x128xf32>
    %476 = vector.broadcast %457 : vector<1x128xf32> to vector<16x128xf32>
    %477 = arith.mulf %475, %476 : vector<16x128xf32>
    %478 = vector.broadcast %458 : vector<1x128xf32> to vector<16x128xf32>
    %479 = arith.addf %477, %478 : vector<16x128xf32>
    %480 = arith.truncf %479 : vector<16x128xf32> to vector<16x128xbf16>
    %c0_157 = arith.constant 0 : index
    %c0_158 = arith.constant 0 : index
    %481 = vector.load %arg18[%c0_157, %c0_158] : memref<128x512xbf16, #tpu.memory_space<vmem>>, vector<128x512xbf16>
    %cst_159 = arith.constant dense<0.000000e+00> : vector<16x512xf32>
    %482 = tpu.matmul %480, %481, %cst_159 {dimension_numbers = #tpu.dot_dimension_numbers<[1], [0], [0], [1], [0, 0, 1, 1], [], []>} : vector<16x128xbf16>, vector<128x512xbf16>, vector<16x512xf32> -> vector<16x512xf32>
    %c0_160 = arith.constant 0 : index
    %c0_161 = arith.constant 0 : index
    %483 = vector.load %arg19[%c0_160, %c0_161] : memref<1x512xf32, #tpu.memory_space<vmem>>, vector<1x512xf32>
    %484 = vector.broadcast %483 : vector<1x512xf32> to vector<16x512xf32>
    %485 = arith.addf %482, %484 : vector<16x512xf32>
    %cst_162 = arith.constant 0.000000e+00 : f32
    %486 = vector.broadcast %cst_162 : f32 to vector<16x512xf32>
    %487 = arith.maximumf %485, %486 : vector<16x512xf32>
    %488 = arith.truncf %487 : vector<16x512xf32> to vector<16x512xbf16>
    %c0_163 = arith.constant 0 : index
    %c0_164 = arith.constant 0 : index
    %489 = vector.load %arg20[%c0_163, %c0_164] : memref<512x128xbf16, #tpu.memory_space<vmem>>, vector<512x128xbf16>
    %cst_165 = arith.constant dense<0.000000e+00> : vector<16x128xf32>
    %490 = tpu.matmul %488, %489, %cst_165 {dimension_numbers = #tpu.dot_dimension_numbers<[1], [0], [0], [1], [0, 0, 1, 1], [], []>} : vector<16x512xbf16>, vector<512x128xbf16>, vector<16x128xf32> -> vector<16x128xf32>
    %c0_166 = arith.constant 0 : index
    %c0_167 = arith.constant 0 : index
    %491 = vector.load %arg21[%c0_166, %c0_167] : memref<1x128xf32, #tpu.memory_space<vmem>>, vector<1x128xf32>
    %492 = vector.broadcast %491 : vector<1x128xf32> to vector<16x128xf32>
    %493 = arith.addf %490, %492 : vector<16x128xf32>
    %c0_168 = arith.constant 0 : index
    %c0_169 = arith.constant 0 : index
    %494 = vector.load %arg22[%c0_168, %c0_169] : memref<1x128xf32, #tpu.memory_space<vmem>>, vector<1x128xf32>
    %c0_170 = arith.constant 0 : index
    %c0_171 = arith.constant 0 : index
    %495 = vector.load %arg23[%c0_170, %c0_171] : memref<1x128xf32, #tpu.memory_space<vmem>>, vector<1x128xf32>
    %496 = arith.addf %493, %479 : vector<16x128xf32>
    %cst_172 = arith.constant dense<0.000000e+00> : vector<16xf32>
    %497 = vector.multi_reduction <add>, %496, %cst_172 [1] : vector<16x128xf32> to vector<16xf32>
    %498 = vector.shape_cast %497 : vector<16xf32> to vector<16x1xf32>
    %cst_173 = arith.constant 1.280000e+02 : f32
    %499 = vector.broadcast %cst_173 : f32 to vector<16x1xf32>
    %500 = arith.divf %498, %499 : vector<16x1xf32>
    %501 = vector.broadcast %500 : vector<16x1xf32> to vector<16x128xf32>
    %502 = arith.subf %496, %501 : vector<16x128xf32>
    %503 = arith.mulf %502, %502 : vector<16x128xf32>
    %cst_174 = arith.constant dense<0.000000e+00> : vector<16xf32>
    %504 = vector.multi_reduction <add>, %503, %cst_174 [1] : vector<16x128xf32> to vector<16xf32>
    %505 = vector.shape_cast %504 : vector<16xf32> to vector<16x1xf32>
    %cst_175 = arith.constant 1.280000e+02 : f32
    %506 = vector.broadcast %cst_175 : f32 to vector<16x1xf32>
    %507 = arith.divf %505, %506 : vector<16x1xf32>
    %cst_176 = arith.constant 9.99999974E-6 : f32
    %508 = vector.broadcast %cst_176 : f32 to vector<16x1xf32>
    %509 = arith.addf %507, %508 : vector<16x1xf32>
    %510 = math.rsqrt %509 : vector<16x1xf32>
    %511 = vector.broadcast %510 : vector<16x1xf32> to vector<16x128xf32>
    %512 = arith.mulf %502, %511 : vector<16x128xf32>
    %513 = vector.broadcast %494 : vector<1x128xf32> to vector<16x128xf32>
    %514 = arith.mulf %512, %513 : vector<16x128xf32>
    %515 = vector.broadcast %495 : vector<1x128xf32> to vector<16x128xf32>
    %516 = arith.addf %514, %515 : vector<16x128xf32>
    %517 = vector.shape_cast %516 : vector<16x128xf32> to vector<2x8x128xf32>
    %518 = arith.truncf %517 : vector<2x8x128xf32> to vector<2x8x128xbf16>
    %c0_177 = arith.constant 0 : index
    %c0_178 = arith.constant 0 : index
    %c0_179 = arith.constant 0 : index
    %519 = vector.load %arg24[%c0_177, %c0_178, %c0_179] : memref<2x8x128xbf16, #tpu.memory_space<vmem>>, vector<2x8x128xbf16>
    tpu.vector_store %arg24[%c0_177, %c0_178, %c0_179], %518 {strides = array<i32>} : memref<2x8x128xbf16, #tpu.memory_space<vmem>>, vector<2x8x128xbf16>,
    return
  }
  func.func @transform_0(%arg0: i32) -> (i32, i32, i32) {
    %c0_i32 = arith.constant 0 : i32
    %c0_i32_0 = arith.constant 0 : i32
    %c0_i32_1 = arith.constant 0 : i32
    return %arg0, %c0_i32, %c0_i32_0 : i32, i32, i32
  }
  func.func @transform_1(%arg0: i32) -> (i32, i32, i32) {
    %c0_i32 = arith.constant 0 : i32
    %c0_i32_0 = arith.constant 0 : i32
    %c0_i32_1 = arith.constant 0 : i32
    return %arg0, %c0_i32, %c0_i32_0 : i32, i32, i32
  }
  func.func @transform_2(%arg0: i32) -> (i32, i32, i32) {
    %c0_i32 = arith.constant 0 : i32
    %c0_i32_0 = arith.constant 0 : i32
    %c0_i32_1 = arith.constant 0 : i32
    return %arg0, %c0_i32, %c0_i32_0 : i32, i32, i32
  }
  func.func @transform_3(%arg0: i32) -> (i32, i32) {
    %c0_i32 = arith.constant 0 : i32
    %c0_i32_0 = arith.constant 0 : i32
    %c0_i32_1 = arith.constant 0 : i32
    return %c0_i32, %c0_i32_0 : i32, i32
  }
  func.func @transform_4(%arg0: i32) -> (i32, i32) {
    %c0_i32 = arith.constant 0 : i32
    %c0_i32_0 = arith.constant 0 : i32
    %c0_i32_1 = arith.constant 0 : i32
    return %c0_i32, %c0_i32_0 : i32, i32
  }
  func.func @transform_5(%arg0: i32) -> (i32, i32) {
    %c0_i32 = arith.constant 0 : i32
    %c0_i32_0 = arith.constant 0 : i32
    %c0_i32_1 = arith.constant 0 : i32
    return %c0_i32, %c0_i32_0 : i32, i32
  }
  func.func @transform_6(%arg0: i32) -> (i32, i32) {
    %c0_i32 = arith.constant 0 : i32
    %c0_i32_0 = arith.constant 0 : i32
    %c0_i32_1 = arith.constant 0 : i32
    return %c0_i32, %c0_i32_0 : i32, i32
  }
  func.func @transform_7(%arg0: i32) -> (i32, i32) {
    %c0_i32 = arith.constant 0 : i32
    %c0_i32_0 = arith.constant 0 : i32
    %c0_i32_1 = arith.constant 0 : i32
    return %c0_i32, %c0_i32_0 : i32, i32
  }
  func.func @transform_8(%arg0: i32) -> (i32, i32) {
    %c0_i32 = arith.constant 0 : i32
    %c0_i32_0 = arith.constant 0 : i32
    %c0_i32_1 = arith.constant 0 : i32
    return %c0_i32, %c0_i32_0 : i32, i32
  }
  func.func @transform_9(%arg0: i32) -> (i32, i32) {
    %c0_i32 = arith.constant 0 : i32
    %c0_i32_0 = arith.constant 0 : i32
    %c0_i32_1 = arith.constant 0 : i32
    return %c0_i32, %c0_i32_0 : i32, i32
  }
  func.func @transform_10(%arg0: i32) -> (i32, i32) {
    %c0_i32 = arith.constant 0 : i32
    %c0_i32_0 = arith.constant 0 : i32
    %c0_i32_1 = arith.constant 0 : i32
    return %c0_i32, %c0_i32_0 : i32, i32
  }
  func.func @transform_11(%arg0: i32) -> (i32, i32) {
    %c0_i32 = arith.constant 0 : i32
    %c0_i32_0 = arith.constant 0 : i32
    %c0_i32_1 = arith.constant 0 : i32
    return %c0_i32, %c0_i32_0 : i32, i32
  }
  func.func @transform_12(%arg0: i32) -> (i32, i32) {
    %c0_i32 = arith.constant 0 : i32
    %c0_i32_0 = arith.constant 0 : i32
    %c0_i32_1 = arith.constant 0 : i32
    return %c0_i32, %c0_i32_0 : i32, i32
  }
  func.func @transform_13(%arg0: i32) -> (i32, i32) {
    %c0_i32 = arith.constant 0 : i32
    %c0_i32_0 = arith.constant 0 : i32
    %c0_i32_1 = arith.constant 0 : i32
    return %c0_i32, %c0_i32_0 : i32, i32
  }
  func.func @transform_14(%arg0: i32) -> (i32, i32) {
    %c0_i32 = arith.constant 0 : i32
    %c0_i32_0 = arith.constant 0 : i32
    %c0_i32_1 = arith.constant 0 : i32
    return %c0_i32, %c0_i32_0 : i32, i32
  }
  func.func @transform_15(%arg0: i32) -> (i32, i32) {
    %c0_i32 = arith.constant 0 : i32
    %c0_i32_0 = arith.constant 0 : i32
    %c0_i32_1 = arith.constant 0 : i32
    return %c0_i32, %c0_i32_0 : i32, i32
  }
  func.func @transform_16(%arg0: i32) -> (i32, i32) {
    %c0_i32 = arith.constant 0 : i32
    %c0_i32_0 = arith.constant 0 : i32
    %c0_i32_1 = arith.constant 0 : i32
    return %c0_i32, %c0_i32_0 : i32, i32
  }
  func.func @transform_17(%arg0: i32) -> (i32, i32) {
    %c0_i32 = arith.constant 0 : i32
    %c0_i32_0 = arith.constant 0 : i32
    %c0_i32_1 = arith.constant 0 : i32
    return %c0_i32, %c0_i32_0 : i32, i32
  }
  func.func @transform_18(%arg0: i32) -> (i32, i32) {
    %c0_i32 = arith.constant 0 : i32
    %c0_i32_0 = arith.constant 0 : i32
    %c0_i32_1 = arith.constant 0 : i32
    return %c0_i32, %c0_i32_0 : i32, i32
  }
  func.func @transform_19(%arg0: i32) -> (i32, i32) {
    %c0_i32 = arith.constant 0 : i32
    %c0_i32_0 = arith.constant 0 : i32
    %c0_i32_1 = arith.constant 0 : i32
    return %c0_i32, %c0_i32_0 : i32, i32
  }
  func.func @transform_20(%arg0: i32) -> (i32, i32) {
    %c0_i32 = arith.constant 0 : i32
    %c0_i32_0 = arith.constant 0 : i32
    %c0_i32_1 = arith.constant 0 : i32
    return %c0_i32, %c0_i32_0 : i32, i32
  }
  func.func @transform_21(%arg0: i32) -> (i32, i32) {
    %c0_i32 = arith.constant 0 : i32
    %c0_i32_0 = arith.constant 0 : i32
    %c0_i32_1 = arith.constant 0 : i32
    return %c0_i32, %c0_i32_0 : i32, i32
  }
  func.func @transform_22(%arg0: i32) -> (i32, i32) {
    %c0_i32 = arith.constant 0 : i32
    %c0_i32_0 = arith.constant 0 : i32
    %c0_i32_1 = arith.constant 0 : i32
    return %c0_i32, %c0_i32_0 : i32, i32
  }
  func.func @transform_23(%arg0: i32) -> (i32, i32, i32) {
    %c0_i32 = arith.constant 0 : i32
    %c0_i32_0 = arith.constant 0 : i32
    %c0_i32_1 = arith.constant 0 : i32
    return %arg0, %c0_i32, %c0_i32_0 : i32, i32, i32
  }
}

</mosaic_0001>

<bundles_post_ra>
// kernel: tpu_custom_call.1
= control target key start
LH: loop header
LB: loop body
LE: loop exit
PB: predicated region body
PF: predicated region fallthrough
CT: control target
= control target key end

     0   :  { %s7448_s0 = inlined_call_operand.hbm [shape: f32[2,8,128], index: 0, kind: input, shape index: {}]   ;;  %s7449_s1 = inlined_call_operand.hbm [shape: f32[2,16,128], index: 1, kind: input, shape index: {}]   ;;  %s7450_s2 = inlined_call_operand.hbm [shape: f32[2,16,128], index: 2, kind: input, shape index: {}]   ;;  %s7451_s3 = inlined_call_operand.hbm [shape: bf16[32,32], index: 3, kind: input, shape index: {}]   ;;  %s7452_s4 = inlined_call_operand.hbm [shape: bf16[32,32], index: 4, kind: input, shape index: {}]   ;;  %s7453_s5 = inlined_call_operand.hbm [shape: bf16[32,32], index: 5, kind: input, shape index: {}]   ;;  %s7454_s6 = inlined_call_operand.hbm [shape: bf16[128,128], index: 6, kind: input, shape index: {}]   ;;  %s7455_s7 = inlined_call_operand.hbm [shape: f32[1,128], index: 7, kind: input, shape index: {}]   ;;  %s7456_s8 = inlined_call_operand.hbm [shape: f32[1,128], index: 8, kind: input, shape index: {}]   ;;  %s7457_s9 = inlined_call_operand.hbm [shape: f32[1,128], index: 9, kind: input, shape index: {}]   ;;  %s7458_s10 = inlined_call_operand.vmem [shape: bf16[32,32], index: 10, kind: input, shape index: {}]   ;;  %s7459_s11 = inlined_call_operand.hbm [shape: bf16[32,32], index: 11, kind: input, shape index: {}]   ;;  %s7460_s12 = inlined_call_operand.hbm [shape: bf16[32,32], index: 12, kind: input, shape index: {}]   ;;  %s7461_s13 = inlined_call_operand.hbm [shape: bf16[128,128], index: 13, kind: input, shape index: {}]   ;;  %s7462_s14 = inlined_call_operand.vmem [shape: f32[1,128], index: 14, kind: input, shape index: {}]   ;;  %s7463_s15 = inlined_call_operand.vmem [shape: f32[1,128], index: 15, kind: input, shape index: {}]   ;;  %s7464_s16 = inlined_call_operand.vmem [shape: f32[1,128], index: 16, kind: input, shape index: {}]   ;;  %s7465_s17 = inlined_call_operand.hbm [shape: bf16[128,512], index: 17, kind: input, shape index: {}]   ;;  %s7466_s18 = inlined_call_operand.vmem [shape: f32[1,512], index: 18, kind: input, shape index: {}]   ;;  %s7467_s19 = inlined_call_operand.hbm [shape: bf16[512,128], index: 19, kind: input, shape index: {}]   ;;  %s7468_s20 = inlined_call_operand.vmem [shape: f32[1,128], index: 20, kind: input, shape index: {}]   ;;  %s7469_s21 = inlined_call_operand.vmem [shape: f32[1,128], index: 21, kind: input, shape index: {}]   ;;  %s7470_s22 = inlined_call_operand.vmem [shape: f32[1,128], index: 22, kind: input, shape index: {}]   ;;  %s7471_s23 = inlined_call_operand.hbm [shape: bf16[2,8,128], index: 23, kind: output, shape index: {}]  }
   0x1   :  { %7476 = sst [smem:[#allocation36_spill]] %s7448_s0 }
   0x2   :  { %7477 = sst [smem:[#allocation37_spill]] %s7449_s1 }
   0x3   :  { %7478 = sst [smem:[#allocation38_spill]] %s7450_s2 }
   0x4   :  { %7479 = sst [smem:[#allocation39_spill]] %s7451_s3 }
   0x5   :  { %7480 = sst [smem:[#allocation40_spill]] %s7452_s4 }
   0x6   :  { %7481 = sst [smem:[#allocation41_spill]] %s7453_s5 }
   0x7   :  { %7482 = sst [smem:[#allocation42_spill]] %s7454_s6 }
   0x8   :  { %7483 = sst [smem:[#allocation43_spill]] %s7455_s7 }
   0x9   :  { %7484 = sst [smem:[#allocation44_spill]] %s7471_s23 }
   0xa   :  { %28 = vsyncpa [#allocation3], 0 }
   0xb   :  { %29 = vsyncpa [#allocation6], 0 }
   0xc   :  { %30 = vsyncpa [#allocation9], 0 }
   0xd   :  { %31 = vsyncpa [#allocation12], 0 }
   0xe   :  { %32 = vsyncpa [#allocation15], 0 }
   0xf   :  { %33 = vsyncpa [#allocation18], 0 }
  0x10   :  { %34 = vsyncpa [#allocation21], 0 }
  0x11   :  { %35 = vsyncpa [#allocation24], 0 }
  0x12   :  { %36 = vsyncpa [#allocation4], 0  ;;  %s6427_s4 = smov [#allocation5]   ;;  %s6428_s24 = smov [#allocation8]  }
  0x13   :  { %s54_s30 = sshll.u32 %s6427_s4, 4  ;;  %s78_s25 = sshll.u32 %s6428_s24, 4  ;;  %s55_s30 = int_to_ptr.vmem [resolvable:$true] %s54_s30  ;;  %s79_s25 = int_to_ptr.vmem [resolvable:$true] %s78_s25 }
  0x14   :  { %s6097_s5 = scalar_lea.vmem %s55_s30, 512  ;;  %p6102_p1 = scmp.lt.s32.totalorder %s55_s30, %s55_s30 }
  0x15   :  { %p6098_p0 = scmp.ne.s32.totalorder %s55_s30, %s6097_s5  ;;  %p6103_p2 = scmp.lt.s32.totalorder %s6097_s5, %s6097_s5 }
  0x17   :  { %p6104_p3 = por %p6103_p2, %p6102_p1 }
  0x19   :  { %p6105_p4 = pnand %p6104_p3, %p6098_p0 }
  0x1b   :  { %6108 = shalt.err (!%p6105_p4)
}
  0x1c   :  { %s7472_s1 = smov 128   ;;  %s7474_s26 = smov 8  }
  0x1d   :  { %s7485_s27 = sld [smem:[#allocation37_spill]]  ;;  %s6117_s7 = scalar_lea.vmem %s79_s25, 256 }
  0x1e   :  { %p6118_p5 = scmp.ne.s32.totalorder %s79_s25, %s6117_s7  ;;  %p6122_p6 = scmp.lt.s32.totalorder %s79_s25, %s79_s25 }
  0x1f   :  { %p6123_p7 = scmp.lt.s32.totalorder %s6117_s7, %s6117_s7 }
  0x21   :  { %p6124_p8 = por %p6123_p7, %p6122_p6 }
  0x23   :  { %60 = dma.hbm_to_vmem [thread:$0]  %s7485_s27, 512, %s55_s30, [#allocation6], %s7472_s1, %s7472_s1, %s7474_s26  }
  0x24   :  { %p6125_p9 = pnand %p6124_p8, %p6118_p5 }
  0x26   :  { %6128 = shalt.err (!%p6125_p9)
}
  0x27   :  { %s6431_s28 = smov 64   ;;  %s6432_s29 = smov 4  }
  0x28   :  { %s7486_s4 = sld [smem:[#allocation39_spill]]  ;;  %s6433_s24 = smov [#allocation11]  }
  0x29   :  { %s102_s5 = sshll.u32 %s6433_s24, 4  ;;  %s6434_s2 = smov [#allocation14]   ;;  %s103_s5 = int_to_ptr.vmem [resolvable:$true] %s102_s5 }
  0x2a   :  { %s127_s30 = sshll.u32 %s6434_s2, 4  ;;  %s6137_s6 = scalar_lea.vmem %s103_s5, 256  ;;  %s128_s30 = int_to_ptr.vmem [resolvable:$true] %s127_s30 }
  0x2b   :  { %p6138_p10 = scmp.ne.s32.totalorder %s103_s5, %s6137_s6  ;;  %p6142_p11 = scmp.lt.s32.totalorder %s103_s5, %s103_s5 }
  0x2c   :  { %p6143_p12 = scmp.lt.s32.totalorder %s6137_s6, %s6137_s6 }
  0x2e   :  { %84 = dma.hbm_to_vmem [thread:$0]  %s7486_s4, 256, %s79_s25, [#allocation9], %s6431_s28, %s6431_s28, %s6432_s29  }
  0x2f   :  { %p6144_p13 = por %p6143_p12, %p6142_p11 }
  0x31   :  { %p6145_p0 = pnand %p6144_p13, %p6138_p10 }
  0x33   :  { %6148 = shalt.err (!%p6145_p0)
}
  0x34   :  { %s7487_s3 = sld [smem:[#allocation41_spill]]  ;;  %s6157_s25 = scalar_lea.vmem %s128_s30, 16 }
  0x35   :  { %p6158_p1 = scmp.ne.s32.totalorder %s128_s30, %s6157_s25  ;;  %s6161_s0 = scalar_lea.vmem %s128_s30, 32 }
  0x36   :  { %p6162_p2 = scmp.lt.s32.totalorder %s128_s30, %s128_s30  ;;  %p6163_p3 = scmp.lt.s32.totalorder %s6161_s0, %s6157_s25 }
  0x38   :  { %p6164_p4 = por %p6163_p3, %p6162_p2 }
  0x3a   :  { %108 = dma.hbm_to_vmem [thread:$0]  %s7487_s3, 256, %s103_s5, [#allocation12], %s6431_s28, %s6431_s28, %s6432_s29  }
  0x3b   :  { %p6165_p5 = pnand %p6164_p4, %p6158_p1 }
  0x3d   :  { %6168 = shalt.err (!%p6165_p5)
}
  0x3e   :  { %s7488_s2 = sld [smem:[#allocation43_spill]]  ;;  %s6435_s6 = smov [#allocation17]  }
  0x3f   :  { %s147_s1 = sshll.u32 %s6435_s6, 4  ;;  %s6436_s26 = smov [#allocation20]   ;;  %s148_s1 = int_to_ptr.vmem [resolvable:$true] %s147_s1 }
  0x40   :  { %s170_s23 = sshll.u32 %s6436_s26, 4  ;;  %s6177_s27 = scalar_lea.vmem %s148_s1, 16  ;;  %s171_s23 = int_to_ptr.vmem [resolvable:$true] %s170_s23 }
  0x41   :  { %p6178_p6 = scmp.ne.s32.totalorder %s148_s1, %s6177_s27  ;;  %s6181_s5 = scalar_lea.vmem %s148_s1, 32 }
  0x42   :  { %p6182_p7 = scmp.lt.s32.totalorder %s148_s1, %s148_s1  ;;  %p6183_p8 = scmp.lt.s32.totalorder %s6181_s5, %s6177_s27 }
  0x44   :  { %130 = dma.hbm_to_vmem [thread:$0]  %s7488_s2, 16, %s128_s30, [#allocation15]  }
  0x45   :  { %p6184_p9 = por %p6183_p8, %p6182_p7 }
  0x47   :  { %p6185_p10 = pnand %p6184_p9, %p6178_p6 }
  0x49   :  { %6188 = shalt.err (!%p6185_p10)
}
  0x4a   :  { %150 = dma.hbm_to_vmem [thread:$0]  %s7457_s9, 16, %s148_s1, [#allocation18]  }
  0x4b   :  { %s6197_s25 = scalar_lea.vmem %s171_s23, 256  ;;  %p6202_p12 = scmp.lt.s32.totalorder %s171_s23, %s171_s23 }
  0x4c   :  { %p6198_p11 = scmp.ne.s32.totalorder %s171_s23, %s6197_s25  ;;  %p6203_p13 = scmp.lt.s32.totalorder %s6197_s25, %s6197_s25 }
  0x4e   :  { %p6204_p0 = por %p6203_p13, %p6202_p12 }
  0x50   :  { %p6205_p1 = pnand %p6204_p0, %p6198_p11 }
  0x52   :  { %6208 = shalt.err (!%p6205_p1)
}
  0x53   :  { %176 = dma.hbm_to_vmem [thread:$0]  %s7460_s12, 256, %s171_s23, [#allocation21], %s6431_s28, %s6431_s28, %s6432_s29  }
  0x54   :  { %s6437_s0 = smov [#allocation23]  }
  0x55   :  { %s200_s4 = sshll.u32 %s6437_s0, 4  ;;  %s201_s4 = int_to_ptr.vmem [resolvable:$true] %s200_s4 }
  0x56   :  { %s6217_s24 = scalar_lea.vmem %s201_s4, 4096  ;;  %p6222_p3 = scmp.lt.s32.totalorder %s201_s4, %s201_s4 }
  0x57   :  { %p6218_p2 = scmp.ne.s32.totalorder %s201_s4, %s6217_s24  ;;  %p6223_p4 = scmp.lt.s32.totalorder %s6217_s24, %s6217_s24 }
  0x59   :  { %p6224_p5 = por %p6223_p4, %p6222_p3 }
  0x5b   :  { %p6225_p6 = pnand %p6224_p5, %p6218_p2 }
  0x5d   :  { %6228 = shalt.err (!%p6225_p6)
}
  0x5e   :  { %s6438_s9 = smov 256   ;;  %s6439_s1 = smov 16  }
  0x5f   :  { %206 = dma.hbm_to_vmem [thread:$0]  %s7465_s17, 4096, %s201_s4, [#allocation24], %s6438_s9, %s6438_s9, %s6439_s1  }
  0x60   :  { %s6440_s27 = smov [#allocation2]   ;;  %s6441_s12 = smov [#allocation7]  }
  0x61   :  { %s42_s5 = sshll.u32 %s6440_s27, 4  ;;  %s66_s23 = sshll.u32 %s6441_s12, 4  ;;  %s43_s5 = int_to_ptr.vmem [resolvable:$true] %s42_s5  ;;  %s67_s23 = int_to_ptr.vmem [resolvable:$true] %s66_s23 }
  0x62   :  { %s6237_s7 = scalar_lea.vmem %s43_s5, 256  ;;  %p6242_p8 = scmp.lt.s32.totalorder %s43_s5, %s43_s5 }
  0x63   :  { %p6238_p7 = scmp.ne.s32.totalorder %s43_s5, %s6237_s7  ;;  %p6243_p9 = scmp.lt.s32.totalorder %s6237_s7, %s6237_s7 }
  0x65   :  { %p6244_p10 = por %p6243_p9, %p6242_p8 }
  0x67   :  { %p6245_p11 = pnand %p6244_p10, %p6238_p7 }
  0x69   :  { %6248 = shalt.err (!%p6245_p11)
}
  0x6a   :  { %s7489_s3 = smov 8   ;;  %s7490_s25 = smov 128  }
  0x6b   :  { %s7491_s0 = sld [smem:[#allocation36_spill]]  ;;  %s6257_s17 = scalar_lea.vmem %s67_s23, 512 }
  0x6c   :  { %p6258_p12 = scmp.ne.s32.totalorder %s67_s23, %s6257_s17  ;;  %p6262_p13 = scmp.lt.s32.totalorder %s67_s23, %s67_s23 }
  0x6d   :  { %p6263_p0 = scmp.lt.s32.totalorder %s6257_s17, %s6257_s17 }
  0x6f   :  { %p6264_p1 = por %p6263_p0, %p6262_p13 }
  0x71   :  { %48 = dma.hbm_to_vmem [thread:$0]  %s7491_s0, 256, %s43_s5, [#allocation3], %s7490_s25, %s7490_s25, %s7489_s3  }
  0x72   :  { %p6265_p2 = pnand %p6264_p1, %p6258_p12 }
  0x74   :  { %6268 = shalt.err (!%p6265_p2)
}
  0x75   :  { %s7492_s9 = sld [smem:[#allocation38_spill]]  ;;  %s6442_s1 = smov [#allocation10]  }
  0x76   :  { %s90_s2 = sshll.u32 %s6442_s1, 4  ;;  %s6443_s6 = smov [#allocation13]   ;;  %s91_s2 = int_to_ptr.vmem [resolvable:$true] %s90_s2 }
  0x77   :  { %s114_s27 = sshll.u32 %s6443_s6, 4  ;;  %s6277_s5 = scalar_lea.vmem %s91_s2, 256  ;;  %s115_s27 = int_to_ptr.vmem [resolvable:$true] %s114_s27 }
  0x78   :  { %p6278_p3 = scmp.ne.s32.totalorder %s91_s2, %s6277_s5  ;;  %p6282_p4 = scmp.lt.s32.totalorder %s91_s2, %s91_s2 }
  0x79   :  { %p6283_p5 = scmp.lt.s32.totalorder %s6277_s5, %s6277_s5 }
  0x7b   :  { %72 = dma.hbm_to_vmem [thread:$0]  %s7492_s9, 512, %s67_s23, [#allocation6], %s7490_s25, %s7490_s25, %s7489_s3  }
  0x7c   :  { %p6284_p6 = por %p6283_p5, %p6282_p4 }
  0x7e   :  { %p6285_p7 = pnand %p6284_p6, %p6278_p3 }
  0x80   :  { %6288 = shalt.err (!%p6285_p7)
}
  0x81   :  { %s7493_s26 = sld [smem:[#allocation40_spill]]  ;;  %s6297_s23 = scalar_lea.vmem %s115_s27, 1024 }
  0x82   :  { %p6298_p8 = scmp.ne.s32.totalorder %s115_s27, %s6297_s23  ;;  %p6302_p9 = scmp.lt.s32.totalorder %s115_s27, %s115_s27 }
  0x83   :  { %p6303_p10 = scmp.lt.s32.totalorder %s6297_s23, %s6297_s23 }
  0x85   :  { %p6304_p11 = por %p6303_p10, %p6302_p9 }
  0x87   :  { %96 = dma.hbm_to_vmem [thread:$0]  %s7493_s26, 256, %s91_s2, [#allocation9], %s6431_s28, %s6431_s28, %s6432_s29  }
  0x88   :  { %p6305_p12 = pnand %p6304_p11, %p6298_p8 }
  0x8a   :  { %6308 = shalt.err (!%p6305_p12)
}
  0x8b   :  { %s7494_s30 = sld [smem:[#allocation42_spill]]  ;;  %s6444_s0 = smov [#allocation16]  }
  0x8c   :  { %s137_s17 = sshll.u32 %s6444_s0, 4  ;;  %s6445_s4 = smov [#allocation19]   ;;  %s138_s17 = int_to_ptr.vmem [resolvable:$true] %s137_s17 }
  0x8d   :  { %s158_s24 = sshll.u32 %s6445_s4, 4  ;;  %s6317_s9 = scalar_lea.vmem %s138_s17, 16  ;;  %s159_s24 = int_to_ptr.vmem [resolvable:$true] %s158_s24 }
  0x8e   :  { %p6318_p13 = scmp.ne.s32.totalorder %s138_s17, %s6317_s9  ;;  %s6321_s1 = scalar_lea.vmem %s138_s17, 32 }
  0x8f   :  { %p6322_p0 = scmp.lt.s32.totalorder %s138_s17, %s138_s17  ;;  %p6323_p1 = scmp.lt.s32.totalorder %s6321_s1, %s6317_s9 }
  0x91   :  { %120 = dma.hbm_to_vmem [thread:$0]  %s7494_s30, 1024, %s115_s27, [#allocation12], %s6431_s28, %s6431_s28, %s6432_s29  }
  0x92   :  { %p6324_p2 = por %p6323_p1, %p6322_p0 }
  0x94   :  { %p6325_p3 = pnand %p6324_p2, %p6318_p13 }
  0x96   :  { %6328 = shalt.err (!%p6325_p3)
}
  0x97   :  { %140 = dma.hbm_to_vmem [thread:$0]  %s7456_s8, 16, %s138_s17, [#allocation15]  }
  0x98   :  { %s6337_s5 = scalar_lea.vmem %s159_s24, 256  ;;  %p6342_p5 = scmp.lt.s32.totalorder %s159_s24, %s159_s24 }
  0x99   :  { %p6338_p4 = scmp.ne.s32.totalorder %s159_s24, %s6337_s5  ;;  %p6343_p6 = scmp.lt.s32.totalorder %s6337_s5, %s6337_s5 }
  0x9b   :  { %p6344_p7 = por %p6343_p6, %p6342_p5 }
  0x9d   :  { %p6345_p8 = pnand %p6344_p7, %p6338_p4 }
  0x9f   :  { %6348 = shalt.err (!%p6345_p8)
}
  0xa0   :  { %164 = dma.hbm_to_vmem [thread:$0]  %s7459_s11, 256, %s159_s24, [#allocation18], %s6431_s28, %s6431_s28, %s6432_s29  }
  0xa1   :  { %s6446_s7 = smov [#allocation22]   ;;  %s6447_s23 = smov [#allocation25]  }
  0xa2   :  { %s182_s26 = sshll.u32 %s6446_s7, 4  ;;  %s214_s8 = sshll.u32 %s6447_s23, 4  ;;  %s183_s26 = int_to_ptr.vmem [resolvable:$true] %s182_s26  ;;  %s215_s8 = int_to_ptr.vmem [resolvable:$true] %s214_s8 }
  0xa3   :  { %s6357_s3 = scalar_lea.vmem %s183_s26, 1024  ;;  %p6362_p10 = scmp.lt.s32.totalorder %s183_s26, %s183_s26 }
  0xa4   :  { %p6358_p9 = scmp.ne.s32.totalorder %s183_s26, %s6357_s3  ;;  %p6363_p11 = scmp.lt.s32.totalorder %s6357_s3, %s6357_s3 }
  0xa6   :  { %p6364_p12 = por %p6363_p11, %p6362_p10 }
  0xa8   :  { %p6365_p13 = pnand %p6364_p12, %p6358_p9 }
  0xaa   :  { %6368 = shalt.err (!%p6365_p13)
}
  0xab   :  { %188 = dma.hbm_to_vmem [thread:$0]  %s7461_s13, 1024, %s183_s26, [#allocation21], %s6431_s28, %s6431_s28, %s6432_s29  }
  0xac   :  { %s6377_s11 = scalar_lea.vmem %s215_s8, 4096  ;;  %p6382_p1 = scmp.lt.s32.totalorder %s215_s8, %s215_s8 }
  0xad   :  { %p6378_p0 = scmp.ne.s32.totalorder %s215_s8, %s6377_s11  ;;  %p6383_p2 = scmp.lt.s32.totalorder %s6377_s11, %s6377_s11 }
  0xaf   :  { %p6384_p3 = por %p6383_p2, %p6382_p1 }
  0xb1   :  { %p6385_p4 = pnand %p6384_p3, %p6378_p0 }
  0xb3   :  { %6388 = shalt.err (!%p6385_p4)
}
  0xb4   :  { %220 = dma.hbm_to_vmem [thread:$0]  %s7467_s19, 4096, %s215_s8, [#allocation24], %s6431_s28, %s6431_s28, %s6432_s29  }
  0xb5   :  { %6409 = dma.done.wait [#allocation3], 256  }
  0xb6   :  { %6410 = vsyncadd [#allocation3], 4294967040 }
  0xb7   :  { %6411 = dma.done.wait [#allocation6], 1024  }
  0xb8   :  { %6412 = vsyncadd [#allocation6], 4294966272 }
  0xb9   :  { %6413 = dma.done.wait [#allocation9], 512  }
  0xba   :  { %6414 = vsyncadd [#allocation9], 4294966784 }
  0xbb   :  { %6415 = dma.done.wait [#allocation12], 1280  }
  0xbc   :  { %6416 = vsyncadd [#allocation12], 4294966016 }
  0xbd   :  { %6417 = dma.done.wait [#allocation15], 32  }
  0xbe   :  { %6418 = vsyncadd [#allocation15], 4294967264 }
  0xbf   :  { %6419 = dma.done.wait [#allocation18], 272  }
  0xc0   :  { %6420 = vsyncadd [#allocation18], 4294967024 }
  0xc1   :  { %6421 = dma.done.wait [#allocation21], 1280  }
  0xc2   :  { %6422 = vsyncadd [#allocation21], 4294966016 }
  0xc3   :  { %6423 = dma.done.wait [#allocation24], 8192  }
  0xc4   :  { %6424 = vsyncadd [#allocation24], 4294959104  ;;  %v6448_v0 = vmov 0.0   ;;  %vm6449_vm0 = vmmov 0   ;;  %v6658_v1 = vld [vmem:[#allocation10 + $0x8] sm:$0xff]   ;;  %v273_v2 = vld [vmem:[#allocation2] sm:$0xff] }
  0xc5   :  { %5372 = vmatprep.subr.bf16.mxu1 %v6448_v0  ;;  %5364 = vmatprep.subr.bf16.mxu0 %v6448_v0  ;;  %v274_v3 = vld [vmem:[#allocation2 + $0x8] sm:$0xff]  ;;  %v6661_v5 = vld [vmem:[#allocation10] sm:$0xff]   ;;  %v5905_v6 = vld [vmem:[#allocation8 + $0x8] sm:$0xff]   ;;  %s6450_s13 = smov 96   ;;  %s6451_s19 = smov 32   ;;  %vm329_vm1 = vcmask 261120  }
  0xc6   :  { %5376 = vmatprep.mubr.msk.bf16.mxu1 %vm6449_vm0, %v6448_v0  ;;  %5368 = vmatprep.mubr.msk.bf16.mxu0 %vm6449_vm0, %v6448_v0  ;;  %v275_v4 = vpack.c.bf16 %v274_v3, %v273_v2  ;;  %v5906_v7 = vld [vmem:[#allocation8] sm:$0xff]   ;;  %v6668_v8 = vld [vmem:[#allocation11 + $0x8] sm:$0xff]   ;;  %vm947_vm2 = vcmask 1043456   ;;  %vm931_vm3 = vcmask 64512   ;;  %vm2989_vm4 = vcmask 130048   ;;  %s6453_s8 = smov [#allocation26]  }
  0xc7   :  { %5373 = vmatpush3.bf16.msra.mxu1 %v6658_v1  ;;  %5365 = vmatpush3.bf16.msra.mxu0 %v5905_v6  ;;  %v5908_v9 = vld [vmem:[#allocation11] sm:$0xff]   ;;  %s4923_s3 = sshll.u32 %s6453_s8, 4  ;;  %s4924_s3 = int_to_ptr.vmem [resolvable:$true] %s4923_s3 }
  0xc8   :  { %5374 = vmatprep.subr.bf16.mxu1 %v6448_v0  ;;  %486 = vrot.lane.b32.xlu0 %v275_v4, %s6450_s13  ;;  %s6389_s25 = scalar_lea.vmem %s4924_s3, 128  ;;  %p6394_p6 = scmp.lt.s32.totalorder %s4924_s3, %s4924_s3 }
  0xc9   :  { %752 = vrot.lane.b32.xlu1 %v275_v4, %s6451_s19  ;;  %5366 = vmatprep.subr.bf16.mxu0 %v6448_v0  ;;  %p6390_p5 = scmp.ne.s32.totalorder %s4924_s3, %s6389_s25  ;;  %p6395_p7 = scmp.lt.s32.totalorder %s6389_s25, %s6389_s25 }
  0xcb   :  { %5375 = vmatpush3.bf16.msra.mxu1 %v6661_v5  ;;  %5367 = vmatpush3.bf16.msra.mxu0 %v5906_v7  ;;  %p6396_p8 = por %p6395_p7, %p6394_p6 }
  0xcc   :  { %5388 = vmatprep.subr.bf16.mxu1 %v6448_v0  ;;  %619 = vrot.lane.b32.xlu0 %v275_v4, %s6431_s28 }
  0xcd   :  { %5380 = vmatprep.subr.bf16.mxu0 %v6448_v0  ;;  %p6397_p9 = pnand %p6396_p8, %p6390_p5 }
  0xce   :  { %5377 = vmatmul.mubr.msk.bf16.vlgmr.msra.gmra.mxu1 %vm329_vm1, %v275_v4  ;;  %5369 = vmatmul.mubr.msk.bf16.vlgmr.msra.gmra.mxu0 %vm329_vm1, %v275_v4 }
  0xcf   :  { %5389 = vmatpush3.bf16.msra.mxu1 %v5905_v6  ;;  %5392 = vmatprep.mubr.msk.bf16.mxu1 %vm6449_vm0, %v6448_v0 }
  0xd0   :  { %5390 = vmatprep.subr.bf16.mxu1 %v6448_v0  ;;  %5381 = vmatpush3.bf16.msra.mxu0 %v6668_v8 }
  0xd1   :  { %5384 = vmatprep.mubr.msk.bf16.mxu0 %vm6449_vm0, %v6448_v0  ;;  %5382 = vmatprep.subr.bf16.mxu0 %v6448_v0 }
  0xd3   :  { %5391 = vmatpush3.bf16.msra.mxu1 %v5906_v7 }
  0xd4   :  { %5404 = vmatprep.subr.bf16.mxu1 %v6448_v0  ;;  %5383 = vmatpush3.bf16.msra.mxu0 %v5908_v9 }
  0xd5   :  { %5396 = vmatprep.subr.bf16.mxu0 %v6448_v0 }
  0xd7   :  { %5385 = vmatmul.mubr.msk.bf16.vlgmr.msra.gmra.mxu0 %vm329_vm1, %v275_v4 }
  0xd8   :  { %5397 = vmatpush3.bf16.msra.mxu0 %v6658_v1  ;;  %5400 = vmatprep.mubr.msk.bf16.mxu0 %vm6449_vm0, %v6448_v0 }
  0xd9   :  { %5398 = vmatprep.subr.bf16.mxu0 %v6448_v0 }
  0xdc   :  { %5399 = vmatpush3.bf16.msra.mxu0 %v6661_v5 }
  0xdd   :  { %5412 = vmatprep.subr.bf16.mxu0 %v6448_v0 }
 0x13a   :  { %v487_v10 = vpop.permute.xlu0 %486 }
 0x13b   :  { %5393 = vmatmul.mubr.msk.bf16.vlgmr.msra.gmra.mxu1 %vm329_vm1, %v487_v10  ;;  %5401 = vmatmul.mubr.msk.bf16.vlgmr.msra.gmra.mxu0 %vm329_vm1, %v487_v10  ;;  %v753_v12 = vpop.permute.xlu1 %752 }
 0x13c   :  { %5405 = vmatpush3.bf16.msra.mxu1 %v6668_v8  ;;  %5408 = vmatprep.mubr.msk.bf16.mxu1 %vm6449_vm0, %v6448_v0 }
 0x13d   :  { %5406 = vmatprep.subr.bf16.mxu1 %v6448_v0  ;;  %5413 = vmatpush3.bf16.msra.mxu0 %v5905_v6 }
 0x13e   :  { %5414 = vmatprep.subr.bf16.mxu0 %v6448_v0  ;;  %5416 = vmatprep.mubr.msk.bf16.mxu0 %vm6449_vm0, %v6448_v0  ;;  %v620_v11 = vpop.permute.xlu0 %619 }
 0x140   :  { %5407 = vmatpush3.bf16.msra.mxu1 %v5908_v9 }
 0x141   :  { %5415 = vmatpush3.bf16.msra.mxu0 %v5906_v7  ;;  %5420 = vmatprep.subr.bf16.mxu1 %v6448_v0 }
 0x142   :  { %5428 = vmatprep.subr.bf16.mxu0 %v6448_v0 }
 0x143   :  { %5409 = vmatmul.mubr.msk.bf16.vlgmr.msra.gmra.mxu1 %vm329_vm1, %v487_v10 }
 0x144   :  { %5417 = vmatmul.mubr.msk.bf16.vlgmr.msra.gmra.mxu0 %vm329_vm1, %v620_v11  ;;  %5421 = vmatpush3.bf16.msra.mxu1 %v6658_v1 }
 0x145   :  { %5429 = vmatpush3.bf16.msra.mxu0 %v6668_v8  ;;  %5432 = vmatprep.mubr.msk.bf16.mxu0 %vm6449_vm0, %v6448_v0 }
 0x146   :  { %5430 = vmatprep.subr.bf16.mxu0 %v6448_v0  ;;  %5422 = vmatprep.subr.bf16.mxu1 %v6448_v0 }
 0x147   :  { %5424 = vmatprep.mubr.msk.bf16.mxu1 %vm6449_vm0, %v6448_v0 }
 0x148   :  { %5423 = vmatpush3.bf16.msra.mxu1 %v6661_v5 }
 0x149   :  { %5431 = vmatpush3.bf16.msra.mxu0 %v5908_v9  ;;  %5436 = vmatprep.subr.bf16.mxu1 %v6448_v0 }
 0x14a   :  { %5444 = vmatprep.subr.bf16.mxu0 %v6448_v0 }
 0x14b   :  { %5425 = vmatmul.mubr.msk.bf16.vlgmr.msra.gmra.mxu1 %vm329_vm1, %v620_v11 }
 0x14c   :  { %5433 = vmatmul.mubr.msk.bf16.vlgmr.msra.gmra.mxu0 %vm329_vm1, %v620_v11  ;;  %5437 = vmatpush3.bf16.msra.mxu1 %v5905_v6 }
 0x14d   :  { %5445 = vmatpush3.bf16.msra.mxu0 %v6658_v1  ;;  %5448 = vmatprep.mubr.msk.bf16.mxu0 %vm6449_vm0, %v6448_v0 }
 0x14e   :  { %5446 = vmatprep.subr.bf16.mxu0 %v6448_v0  ;;  %5438 = vmatprep.subr.bf16.mxu1 %v6448_v0 }
 0x14f   :  { %5440 = vmatprep.mubr.msk.bf16.mxu1 %vm6449_vm0, %v6448_v0 }
 0x150   :  { %5439 = vmatpush3.bf16.msra.mxu1 %v5906_v7 }
 0x151   :  { %5447 = vmatpush3.bf16.msra.mxu0 %v6661_v5  ;;  %5452 = vmatprep.subr.bf16.mxu1 %v6448_v0 }
 0x152   :  { %5460 = vmatprep.subr.bf16.mxu0 %v6448_v0 }
 0x153   :  { %5441 = vmatmul.mubr.msk.bf16.vlgmr.msra.gmra.mxu1 %vm329_vm1, %v753_v12 }
 0x154   :  { %5449 = vmatmul.mubr.msk.bf16.vlgmr.msra.gmra.mxu0 %vm329_vm1, %v753_v12  ;;  %5453 = vmatpush3.bf16.msra.mxu1 %v6668_v8 }
 0x155   :  { %5462 = vmatprep.mubr.msk.bf16.mxu0 %vm6449_vm0, %v6448_v0  ;;  %5454 = vmatprep.subr.bf16.mxu1 %v6448_v0 }
 0x156   :  { %5456 = vmatprep.mubr.msk.bf16.mxu1 %vm6449_vm0, %v6448_v0 }
 0x158   :  { %5455 = vmatpush3.bf16.msra.mxu1 %v5908_v9 }
 0x159   :  { %5466 = vmatprep.subr.bf16.mxu1 %v6448_v0 }
 0x15b   :  { %5457 = vmatmul.mubr.msk.bf16.vlgmr.msra.gmra.mxu1 %vm329_vm1, %v753_v12 }
 0x15c   :  { %5468 = vmatprep.mubr.msk.bf16.mxu1 %vm6449_vm0, %v6448_v0 }
 0x18e   :  { %v423_v13 = vpop.f32.mrf.mxu1  ;;  %v367_v15 = vpop.f32.mrf.mxu0 }
 0x18f   :  { %v374_v21 = vmul.f32 2.828427, %v367_v15 }
 0x190   :  { %v5378_v14 = vpop.f32.mrf.mxu1  ;;  %v5370_v18 = vpop.f32.mrf.mxu0 }
 0x192   :  { %v426_v16 = vpop.f32.mrf.mxu1  ;;  %v370_v22 = vpop.f32.mrf.mxu0 }
 0x193   :  { %v6739_v17 = vpack.c.bf16 %v426_v16, %v423_v13  ;;  %v375_v23 = vmul.f32 2.828427, %v370_v22 }
 0x194   :  { %v5379_v19 = vpop.f32.mrf.mxu1  ;;  %v5371_v24 = vpop.f32.mrf.mxu0 }
 0x195   :  { %v889_v20 = vsel %vm329_vm1, %v6739_v17, 0  ;;  %v6744_v25 = vpack.c.bf16 %v375_v23, %v374_v21 }
 0x196   :  { %5461 = vmatpush3.bf16.xpose.msra.mxu0 %v889_v20 }
 0x197   :  { %5472 = vmatprep.subr.bf16.mxu0 %v6448_v0  ;;  %v477_v26 = vpop.f32.mrf.mxu0 }
 0x199   :  { %v5386_v27 = vpop.f32.mrf.mxu0 }
 0x19b   :  { %v480_v28 = vpop.f32.mrf.mxu0 }
 0x19c   :  { %v6748_v29 = vpack.c.bf16 %v480_v28, %v477_v26 }
 0x19d   :  { %5463 = vmatmul.mubr.msk.bf16.vlgmr.msra.gmra.mxu0 %vm329_vm1, %v6744_v25  ;;  %v5387_v30 = vpop.f32.mrf.mxu0 }
 0x19e   :  { %5474 = vmatprep.mubr.msk.bf16.mxu0 %vm6449_vm0, %v6448_v0  ;;  %v949_v31 = vsel %vm947_vm2, %v6748_v29, 0 }
 0x19f   :  { %5467 = vmatpush3.bf16.msra.mxu1 %v949_v31 }
 0x1a0   :  { %5478 = vmatprep.subr.bf16.mxu1 %v6448_v0 }
 0x1fb   :  { %v525_v32 = vpop.f32.mrf.mxu1  ;;  %v569_v33 = vpop.f32.mrf.mxu0 }
 0x1fc   :  { %v532_v46 = vmul.f32 2.828427, %v525_v32 }
 0x1fd   :  { %v5394_v34 = vpop.f32.mrf.mxu1  ;;  %v5402_v35 = vpop.f32.mrf.mxu0 }
 0x1ff   :  { %v528_v36 = vpop.f32.mrf.mxu1  ;;  %v572_v37 = vpop.f32.mrf.mxu0 }
 0x200   :  { %v6755_v38 = vpack.c.bf16 %v572_v37, %v569_v33  ;;  %v533_v43 = vmul.f32 2.828427, %v528_v36 }
 0x201   :  { %v5395_v39 = vpop.f32.mrf.mxu1  ;;  %v5403_v40 = vpop.f32.mrf.mxu0 }
 0x202   :  { %v996_v41 = vsel %vm329_vm1, %v6755_v38, 0  ;;  %v6760_v50 = vpack.c.bf16 %v533_v43, %v532_v46 }
 0x203   :  { %v611_v42 = vpop.f32.mrf.mxu1  ;;  %5473 = vmatpush3.bf16.xpose.msra.mxu0 %v996_v41 }
 0x204   :  { %v658_v44 = vpop.f32.mrf.mxu0  ;;  %5484 = vmatprep.subr.bf16.mxu0 %v6448_v0 }
 0x205   :  { %v5410_v45 = vpop.f32.mrf.mxu1  ;;  %v665_v49 = vmul.f32 2.828427, %v658_v44 }
 0x206   :  { %v5418_v47 = vpop.f32.mrf.mxu0 }
 0x207   :  { %v614_v48 = vpop.f32.mrf.mxu1 }
 0x208   :  { %v6762_v51 = vpack.c.bf16 %v614_v48, %v611_v42  ;;  %v661_v52 = vpop.f32.mrf.mxu0 }
 0x209   :  { %v5411_v53 = vpop.f32.mrf.mxu1  ;;  %v666_v54 = vmul.f32 2.828427, %v661_v52  ;;  %v6790_v52 = vld [vmem:[#allocation13 + $0x18] sm:$0xff]  }
 0x20a   :  { %5475 = vmatmul.mubr.msk.bf16.vlgmr.msra.gmra.mxu0 %vm329_vm1, %v6760_v50  ;;  %v5419_v55 = vpop.f32.mrf.mxu0  ;;  %v6793_v53 = vld [vmem:[#allocation13 + $0x10] sm:$0xff]  }
 0x20b   :  { %v6766_v56 = vpack.c.bf16 %v666_v54, %v665_v49  ;;  %v702_v57 = vpop.f32.mrf.mxu1  ;;  %5488 = vmatprep.mubr.msk.bf16.mxu0 %vm6449_vm0, %v6448_v0  ;;  %v1054_v49 = vsel %vm947_vm2, %v6762_v51, 0  ;;  %5485 = vmatpush3.bf16.msra.mxu0 %v6790_v52 }
 0x20c   :  { %v744_v58 = vpop.f32.mrf.mxu0  ;;  %5486 = vmatprep.subr.bf16.mxu0 %v6448_v0 }
 0x20d   :  { %v5426_v59 = vpop.f32.mrf.mxu1 }
 0x20e   :  { %v5434_v60 = vpop.f32.mrf.mxu0 }
 0x20f   :  { %v705_v61 = vpop.f32.mrf.mxu1  ;;  %5487 = vmatpush3.bf16.msra.mxu0 %v6793_v53  ;;  %v6802_v60 = vld [vmem:[#allocation13] sm:$0xff]  }
 0x210   :  { %v747_v62 = vpop.f32.mrf.mxu0  ;;  %v6770_v63 = vpack.c.bf16 %v705_v61, %v702_v57  ;;  %5500 = vmatprep.subr.bf16.mxu0 %v6448_v0 }
 0x211   :  { %v6772_v1 = vpack.c.bf16 %v747_v62, %v744_v58  ;;  %v5427_v2 = vpop.f32.mrf.mxu1  ;;  %v6798_v58 = vld [vmem:[#allocation13 + $0x8] sm:$0xff]  }
 0x212   :  { %v5435_v3 = vpop.f32.mrf.mxu0 }
 0x213   :  { %v791_v4 = vpop.f32.mrf.mxu1  ;;  %v1269_v3 = vsel %vm947_vm2, %v6772_v1, 0 }
 0x214   :  { %v835_v5 = vpop.f32.mrf.mxu0  ;;  %v798_v8 = vmul.f32 2.828427, %v791_v4 }
 0x215   :  { %v5442_v6 = vpop.f32.mrf.mxu1 }
 0x216   :  { %v5450_v7 = vpop.f32.mrf.mxu0 }
 0x217   :  { %v794_v9 = vpop.f32.mrf.mxu1 }
 0x218   :  { %v838_v10 = vpop.f32.mrf.mxu0  ;;  %v799_v11 = vmul.f32 2.828427, %v794_v9  ;;  %v1211_v9 = vsel %vm329_vm1, %v6770_v63, 0 }
 0x219   :  { %v6774_v12 = vpack.c.bf16 %v838_v10, %v835_v5  ;;  %v5443_v13 = vpop.f32.mrf.mxu1 }
 0x21a   :  { %v5451_v14 = vpop.f32.mrf.mxu0  ;;  %v6776_v15 = vpack.c.bf16 %v799_v11, %v798_v8 }
 0x21b   :  { %v877_v16 = vpop.f32.mrf.mxu1 }
 0x21d   :  { %v5458_v18 = vpop.f32.mrf.mxu1 }
 0x21f   :  { %v880_v19 = vpop.f32.mrf.mxu1 }
 0x220   :  { %v6778_v20 = vpack.c.bf16 %v880_v19, %v877_v16 }
 0x221   :  { %v5459_v21 = vpop.f32.mrf.mxu1 }
 0x25d   :  { %v925_v22 = vpop.f32.mrf.mxu0 }
 0x25e   :  { %v932_v23 = vsel %vm931_vm3, %v925_v22, -inf }
 0x25f   :  { %933 = vmax.xlane.f32.xlu1 %v932_v23  ;;  %v5464_v24 = vpop.f32.mrf.mxu0 }
 0x261   :  { %v928_v26 = vpop.f32.mrf.mxu0 }
 0x263   :  { %v5465_v27 = vpop.f32.mrf.mxu0 }
 0x2ca   :  { %v1032_v28 = vpop.f32.mrf.mxu0 }
 0x2cb   :  { %v1038_v30 = vsel %vm931_vm3, %v1032_v28, -inf }
 0x2cc   :  { %1039 = vmax.xlane.f32.xlu0 %v1038_v30  ;;  %v5476_v31 = vpop.f32.mrf.mxu0 }
 0x2ce   :  { %v1035_v32 = vpop.f32.mrf.mxu0 }
 0x2d0   :  { %v5477_v33 = vpop.f32.mrf.mxu0 }
 0x2e8   :  { %v934_v34 = vpop.xlane.xlu1 %933 }
 0x2e9   :  { %v935_v35 = vsub.f32 %v925_v22, %v934_v34 }
 0x2eb   :  { %v936_v36 = vmul.f32 1.442695, %v935_v35 }
 0x2ed   :  { %6011 = vpow2.f32 %v936_v36  ;;  %v6827_v36 = vld [vmem:[#allocation13 + $0x28] sm:$0xff]  }
 0x2fa   :  { %v6012_v37 = vpop.eup %6011 }
 0x2fb   :  { %v938_v39 = vsel %vm931_vm3, %v6012_v37, 0.0 }
 0x2fc   :  { %939 = vadd.xlane.f32.xlu0 %v938_v39 }
 0x355   :  { %v1040_v40 = vpop.xlane.xlu0 %1039 }
 0x356   :  { %v1041_v41 = vsub.f32 %v1032_v28, %v1040_v40 }
 0x358   :  { %v1042_v42 = vmul.f32 1.442695, %v1041_v41 }
 0x35a   :  { %6013 = vpow2.f32 %v1042_v42 }
 0x367   :  { %v6014_v43 = vpop.eup %6013 }
 0x368   :  { %v1044_v44 = vsel %vm931_vm3, %v6014_v43, 0.0 }
 0x369   :  { %1045 = vadd.xlane.f32.xlu1 %v1044_v44 }
 0x385   :  { %v940_v45 = vpop.xlane.xlu0 %939 }
 0x386   :  { %6015 = vrcp.f32 %v940_v45 }
 0x393   :  { %v6016_v46 = vpop.eup %6015 }
 0x394   :  { %v942_v47 = vmul.f32 %v6016_v46, %v6012_v37  ;;  %v6830_v37 = vld [vmem:[#allocation13 + $0x20] sm:$0xff]  }
 0x396   :  { %v943_v48 = vpack.c.bf16 %v942_v47, %v942_v47  ;;  %v1430_v47 = vsel %vm947_vm2, %v6778_v20, 0 }
 0x398   :  { %5469 = vmatmul.mubr.msk.bf16.vlgmr.msra.gmra.mxu1 %vm931_vm3, %v943_v48 }
 0x399   :  { %5479 = vmatpush3.bf16.msra.mxu1 %v1054_v49  ;;  %5480 = vmatprep.mubr.msk.bf16.mxu1 %vm6449_vm0, %v6448_v0 }
 0x39a   :  { %5492 = vmatprep.subr.bf16.mxu1 %v6448_v0 }
 0x3f2   :  { %v1046_v54 = vpop.xlane.xlu1 %1045 }
 0x3f3   :  { %6017 = vrcp.f32 %v1046_v54 }
 0x400   :  { %v6018_v55 = vpop.eup %6017 }
 0x401   :  { %v1048_v57 = vmul.f32 %v6018_v55, %v6014_v43  ;;  %v1372_v43 = vsel %vm329_vm1, %v6774_v12, 0 }
 0x403   :  { %v1049_v59 = vpack.c.bf16 %v1048_v57, %v1048_v57 }
 0x405   :  { %5481 = vmatmul.mubr.msk.bf16.vlgmr.msra.gmra.mxu1 %vm931_vm3, %v1049_v59 }
 0x406   :  { %5493 = vmatpush3.bf16.msra.mxu1 %v6798_v58  ;;  %5496 = vmatprep.mubr.msk.bf16.mxu1 %vm6449_vm0, %v6448_v0 }
 0x407   :  { %5494 = vmatprep.subr.bf16.mxu1 %v6448_v0 }
 0x40a   :  { %5495 = vmatpush3.bf16.msra.mxu1 %v6802_v60 }
 0x40b   :  { %5506 = vmatprep.subr.bf16.mxu1 %v6448_v0 }
 0x458   :  { %v985_v61 = vpop.f32.mrf.mxu1 }
 0x459   :  { %v991_v62 = vpack.c.bf16 %v985_v61, %v985_v61 }
 0x45a   :  { %v5470_v2 = vpop.f32.mrf.mxu1 }
 0x45b   :  { %5497 = vmatmul.mubr.msk.bf16.vlgmr.msra.gmra.mxu1 %vm329_vm1, %v991_v62 }
 0x45c   :  { %5507 = vmatpush3.bf16.msra.mxu1 %v1269_v3  ;;  %v988_v4 = vpop.f32.mrf.mxu1  ;;  %5508 = vmatprep.mubr.msk.bf16.mxu1 %vm6449_vm0, %v6448_v0 }
 0x45d   :  { %5520 = vmatprep.subr.bf16.mxu1 %v6448_v0 }
 0x45e   :  { %v5471_v5 = vpop.f32.mrf.mxu1 }
 0x4c5   :  { %v1090_v6 = vpop.f32.mrf.mxu1 }
 0x4c6   :  { %v1096_v7 = vpack.c.bf16 %v1090_v6, %v1090_v6 }
 0x4c7   :  { %v5482_v8 = vpop.f32.mrf.mxu1 }
 0x4c8   :  { %5489 = vmatmul.mubr.msk.bf16.vlgmr.msra.gmra.mxu0 %vm329_vm1, %v1096_v7 }
 0x4c9   :  { %5501 = vmatpush3.bf16.xpose.msra.mxu0 %v1211_v9  ;;  %v1093_v10 = vpop.f32.mrf.mxu1  ;;  %5502 = vmatprep.mubr.msk.bf16.mxu0 %vm6449_vm0, %v6448_v0 }
 0x4ca   :  { %5512 = vmatprep.subr.bf16.mxu0 %v6448_v0 }
 0x4cb   :  { %v5483_v11 = vpop.f32.mrf.mxu1 }
 0x4d0   :  { %5503 = vmatmul.mubr.msk.bf16.vlgmr.msra.gmra.mxu0 %vm329_vm1, %v6766_v56 }
 0x4d1   :  { %5516 = vmatprep.mubr.msk.bf16.mxu0 %vm6449_vm0, %v6448_v0  ;;  %5513 = vmatpush3.bf16.msra.mxu0 %v6827_v36 }
 0x4d2   :  { %5514 = vmatprep.subr.bf16.mxu0 %v6448_v0 }
 0x4d5   :  { %5515 = vmatpush3.bf16.msra.mxu0 %v6830_v37 }
 0x4d6   :  { %5526 = vmatprep.subr.bf16.mxu0 %v6448_v0 }
 0x51b   :  { %v1201_v13 = vpop.f32.mrf.mxu1 }
 0x51d   :  { %v5498_v14 = vpop.f32.mrf.mxu1 }
 0x51e   :  { %v6855_v14 = vld [vmem:[#allocation13 + $0x38] sm:$0xff]  }
 0x51f   :  { %v1204_v16 = vpop.f32.mrf.mxu1 }
 0x520   :  { %v6858_v16 = vld [vmem:[#allocation13 + $0x30] sm:$0xff]  }
 0x521   :  { %v5499_v18 = vpop.f32.mrf.mxu1 }
 0x588   :  { %v1146_v19 = vpop.f32.mrf.mxu0 }
 0x589   :  { %v1202_v6 = vadd.f32 %v1201_v13, %v1146_v19  ;;  %v1539_v19 = vrot.slane %v6739_v17, 4 }
 0x58a   :  { %v5490_v21 = vpop.f32.mrf.mxu0 }
 0x58c   :  { %v1149_v22 = vpop.f32.mrf.mxu0 }
 0x58e   :  { %v5491_v23 = vpop.f32.mrf.mxu0 }
 0x58f   :  { %v1544_v23 = vsel %vm329_vm1, %v1539_v19, 0 }
 0x590   :  { %v1247_v24 = vpop.f32.mrf.mxu0 }
 0x591   :  { %v1253_v26 = vsel %vm931_vm3, %v1247_v24, -inf }
 0x592   :  { %1254 = vmax.xlane.f32.xlu0 %v1253_v26  ;;  %v5504_v27 = vpop.f32.mrf.mxu0  ;;  %v1537_v26 = vrot.slane %v6744_v25, 4  ;;  %v1599_v25 = vrot.slane %v6748_v29, 4 }
 0x593   :  { %v1648_v27 = vrot.slane %v6760_v50, 4 }
 0x594   :  { %v1250_v28 = vpop.f32.mrf.mxu0  ;;  %v1604_v50 = vsel %vm947_vm2, %v1599_v25, 0 }
 0x596   :  { %v5505_v30 = vpop.f32.mrf.mxu0 }
 0x61b   :  { %v1255_v31 = vpop.xlane.xlu0 %1254 }
 0x61c   :  { %v1256_v32 = vsub.f32 %v1247_v24, %v1255_v31  ;;  %v1650_v24 = vrot.slane %v6755_v38, 4 }
 0x61e   :  { %v1257_v33 = vmul.f32 1.442695, %v1256_v32  ;;  %v1655_v17 = vsel %vm329_vm1, %v1650_v24, 0 }
 0x620   :  { %6019 = vpow2.f32 %v1257_v33 }
 0x62d   :  { %v6020_v34 = vpop.eup %6019 }
 0x62e   :  { %v1259_v35 = vsel %vm931_vm3, %v6020_v34, 0.0 }
 0x62f   :  { %1260 = vadd.xlane.f32.xlu1 %v1259_v35 }
 0x6b8   :  { %v1261_v39 = vpop.xlane.xlu1 %1260 }
 0x6b9   :  { %6021 = vrcp.f32 %v1261_v39 }
 0x6c6   :  { %v6022_v40 = vpop.eup %6021 }
 0x6c7   :  { %v1263_v41 = vmul.f32 %v6022_v40, %v6020_v34 }
 0x6c9   :  { %v1264_v42 = vpack.c.bf16 %v1263_v41, %v1263_v41 }
 0x6cb   :  { %5509 = vmatmul.mubr.msk.bf16.vlgmr.msra.gmra.mxu1 %vm931_vm3, %v1264_v42 }
 0x6cc   :  { %5521 = vmatpush3.bf16.xpose.msra.mxu1 %v1372_v43  ;;  %5522 = vmatprep.mubr.msk.bf16.mxu1 %vm6449_vm0, %v6448_v0 }
 0x6cd   :  { %5532 = vmatprep.subr.bf16.mxu1 %v6448_v0 }
 0x6d3   :  { %5523 = vmatmul.mubr.msk.bf16.vlgmr.msra.gmra.mxu1 %vm329_vm1, %v6776_v15 }
 0x6d4   :  { %5536 = vmatprep.mubr.msk.bf16.mxu1 %vm6449_vm0, %v6448_v0  ;;  %5533 = vmatpush3.bf16.msra.mxu1 %v6855_v14 }
 0x6d5   :  { %5534 = vmatprep.subr.bf16.mxu1 %v6448_v0 }
 0x6d8   :  { %5535 = vmatpush3.bf16.msra.mxu1 %v6858_v16 }
 0x6d9   :  { %5546 = vmatprep.subr.bf16.mxu1 %v6448_v0 }
 0x78b   :  { %v1305_v44 = vpop.f32.mrf.mxu1 }
 0x78c   :  { %v1311_v45 = vpack.c.bf16 %v1305_v44, %v1305_v44 }
 0x78d   :  { %v5510_v46 = vpop.f32.mrf.mxu1 }
 0x78e   :  { %5517 = vmatmul.mubr.msk.bf16.vlgmr.msra.gmra.mxu0 %vm329_vm1, %v1311_v45 }
 0x78f   :  { %5527 = vmatpush3.bf16.msra.mxu0 %v1430_v47  ;;  %v1308_v48 = vpop.f32.mrf.mxu1  ;;  %5528 = vmatprep.mubr.msk.bf16.mxu0 %vm6449_vm0, %v6448_v0 }
 0x790   :  { %5540 = vmatprep.subr.bf16.mxu0 %v6448_v0 }
 0x791   :  { %v5511_v49 = vpop.f32.mrf.mxu1 }
 0x793   :  { %v1408_v54 = vpop.f32.mrf.mxu1 }
 0x794   :  { %v1414_v55 = vsel %vm931_vm3, %v1408_v54, -inf }
 0x795   :  { %1415 = vmax.xlane.f32.xlu0 %v1414_v55  ;;  %v5524_v57 = vpop.f32.mrf.mxu1 }
 0x797   :  { %v1411_v59 = vpop.f32.mrf.mxu1 }
 0x799   :  { %v5525_v61 = vpop.f32.mrf.mxu1 }
 0x81e   :  { %v1416_v62 = vpop.xlane.xlu0 %1415 }
 0x81f   :  { %v1417_v2 = vsub.f32 %v1408_v54, %v1416_v62 }
 0x821   :  { %v1418_v3 = vmul.f32 1.442695, %v1417_v2 }
 0x823   :  { %6023 = vpow2.f32 %v1418_v3 }
 0x830   :  { %v6024_v4 = vpop.eup %6023 }
 0x831   :  { %v1420_v5 = vsel %vm931_vm3, %v6024_v4, 0.0 }
 0x832   :  { %1421 = vadd.xlane.f32.xlu1 %v1420_v5 }
 0x84e   :  { %v1361_v7 = vpop.f32.mrf.mxu0 }
 0x84f   :  { %v6853_v8 = vadd.f32 %v1361_v7, %v1202_v6  ;;  %v1710_v7 = vrot.slane %v6762_v51, 4  ;;  %v1907_v51 = vrot.slane %v6772_v1, 4 }
 0x850   :  { %v5518_v9 = vpop.f32.mrf.mxu0 }
 0x852   :  { %v1364_v10 = vpop.f32.mrf.mxu0 }
 0x854   :  { %v5519_v11 = vpop.f32.mrf.mxu0 }
 0x855   :  { %v1715_v11 = vsel %vm947_vm2, %v1710_v7, 0 }
 0x8bb   :  { %v1422_v18 = vpop.xlane.xlu1 %1421 }
 0x8bc   :  { %6025 = vrcp.f32 %v1422_v18 }
 0x8c9   :  { %v6026_v13 = vpop.eup %6025 }
 0x8ca   :  { %v1424_v21 = vmul.f32 %v6026_v13, %v6024_v4 }
 0x8cc   :  { %v1425_v22 = vpack.c.bf16 %v1424_v21, %v1424_v21 }
 0x8ce   :  { %5529 = vmatmul.mubr.msk.bf16.vlgmr.msra.gmra.mxu0 %vm931_vm3, %v1425_v22 }
 0x8cf   :  { %5541 = vmatpush3.bf16.xpose.msra.mxu0 %v1544_v23  ;;  %5542 = vmatprep.mubr.msk.bf16.mxu0 %vm6449_vm0, %v6448_v0  ;;  %v1912_v23 = vsel %vm947_vm2, %v1907_v51, 0 }
 0x8d0   :  { %5552 = vmatprep.subr.bf16.mxu0 %v6448_v0 }
 0x8d6   :  { %5543 = vmatmul.mubr.msk.bf16.vlgmr.msra.gmra.mxu0 %vm329_vm1, %v1537_v26 }
 0x8d7   :  { %5553 = vmatpush3.bf16.xpose.msra.mxu0 %v1655_v17  ;;  %5554 = vmatprep.mubr.msk.bf16.mxu0 %vm6449_vm0, %v6448_v0 }
 0x8d8   :  { %5564 = vmatprep.subr.bf16.mxu0 %v6448_v0 }
 0x8de   :  { %5555 = vmatmul.mubr.msk.bf16.vlgmr.msra.gmra.mxu0 %vm329_vm1, %v1648_v27 }
 0x8df   :  { %5565 = vmatpush3.bf16.msra.mxu0 %v6790_v52  ;;  %5568 = vmatprep.mubr.msk.bf16.mxu0 %vm6449_vm0, %v6448_v0 }
 0x8e0   :  { %5566 = vmatprep.subr.bf16.mxu0 %v6448_v0 }
 0x8e3   :  { %5567 = vmatpush3.bf16.msra.mxu0 %v6793_v53 }
 0x8e4   :  { %5580 = vmatprep.subr.bf16.mxu0 %v6448_v0 }
 0x98e   :  { %v1466_v38 = vpop.f32.mrf.mxu0 }
 0x98f   :  { %v1472_v28 = vpack.c.bf16 %v1466_v38, %v1466_v38 }
 0x990   :  { %v5530_v30 = vpop.f32.mrf.mxu0 }
 0x991   :  { %5537 = vmatmul.mubr.msk.bf16.vlgmr.msra.gmra.mxu1 %vm329_vm1, %v1472_v28  ;;  %v1845_v28 = vrot.slane %v6766_v56, 4 }
 0x992   :  { %5547 = vmatpush3.bf16.msra.mxu1 %v1604_v50  ;;  %v1469_v52 = vpop.f32.mrf.mxu0  ;;  %5548 = vmatprep.mubr.msk.bf16.mxu1 %vm6449_vm0, %v6448_v0 }
 0x993   :  { %5558 = vmatprep.subr.bf16.mxu1 %v6448_v0 }
 0x994   :  { %v5531_v31 = vpop.f32.mrf.mxu0 }
 0x996   :  { %v1580_v53 = vpop.f32.mrf.mxu0 }
 0x997   :  { %v1586_v32 = vsel %vm931_vm3, %v1580_v53, -inf }
 0x998   :  { %1587 = vmax.xlane.f32.xlu0 %v1586_v32  ;;  %v5544_v29 = vpop.f32.mrf.mxu0 }
 0x99a   :  { %v1583_v33 = vpop.f32.mrf.mxu0 }
 0x99c   :  { %v5545_v34 = vpop.f32.mrf.mxu0 }
 0x99e   :  { %v1691_v35 = vpop.f32.mrf.mxu0 }
 0x99f   :  { %v1697_v39 = vsel %vm931_vm3, %v1691_v35, -inf }
 0x9a0   :  { %1698 = vmax.xlane.f32.xlu1 %v1697_v39  ;;  %v5556_v40 = vpop.f32.mrf.mxu0 }
 0x9a2   :  { %v1694_v41 = vpop.f32.mrf.mxu0 }
 0x9a4   :  { %v5557_v42 = vpop.f32.mrf.mxu0 }
 0xa21   :  { %v1588_v43 = vpop.xlane.xlu0 %1587 }
 0xa22   :  { %v1589_v44 = vsub.f32 %v1580_v53, %v1588_v43 }
 0xa24   :  { %v1590_v45 = vmul.f32 1.442695, %v1589_v44 }
 0xa26   :  { %6027 = vpow2.f32 %v1590_v45 }
 0xa29   :  { %v1699_v46 = vpop.xlane.xlu1 %1698 }
 0xa2a   :  { %v1700_v47 = vsub.f32 %v1691_v35, %v1699_v46  ;;  %v2002_v46 = vrot.slane %v6774_v12, 4  ;;  %v2062_v12 = vrot.slane %v6778_v20, 4 }
 0xa2c   :  { %v1701_v48 = vmul.f32 1.442695, %v1700_v47 }
 0xa2e   :  { %6029 = vpow2.f32 %v1701_v48 }
 0xa33   :  { %v6028_v49 = vpop.eup %6027 }
 0xa34   :  { %v1592_v54 = vsel %vm931_vm3, %v6028_v49, 0.0 }
 0xa35   :  { %1593 = vadd.xlane.f32.xlu0 %v1592_v54  ;;  %v2000_v54 = vrot.slane %v6776_v15, 4  ;;  %v2067_v15 = vsel %vm947_vm2, %v2062_v12, 0 }
 0xa3b   :  { %v6030_v55 = vpop.eup %6029 }
 0xa3c   :  { %v1703_v57 = vsel %vm931_vm3, %v6030_v55, 0.0 }
 0xa3d   :  { %1704 = vadd.xlane.f32.xlu1 %v1703_v57 }
 0xa51   :  { %v1522_v59 = vpop.f32.mrf.mxu1 }
 0xa52   :  { %v6895_v61 = vadd.f32 %v1522_v59, %v6853_v8 }
 0xa53   :  { %v5538_v62 = vpop.f32.mrf.mxu1 }
 0xa55   :  { %v1525_v2 = vpop.f32.mrf.mxu1 }
 0xa57   :  { %v5539_v3 = vpop.f32.mrf.mxu1 }
 0xabe   :  { %v1594_v4 = vpop.xlane.xlu0 %1593 }
 0xabf   :  { %6031 = vrcp.f32 %v1594_v4 }
 0xac6   :  { %v1705_v5 = vpop.xlane.xlu1 %1704 }
 0xac7   :  { %6033 = vrcp.f32 %v1705_v5 }
 0xacc   :  { %v6032_v6 = vpop.eup %6031 }
 0xacd   :  { %v1596_v9 = vmul.f32 %v6032_v6, %v6028_v49  ;;  %v2007_v49 = vsel %vm329_vm1, %v2002_v46, 0  ;;  %v6087_v6 = vld [vmem:[#allocation2] sm:$0xff] }
 0xacf   :  { %v1597_v10 = vpack.c.bf16 %v1596_v9, %v1596_v9 }
 0xad1   :  { %5549 = vmatmul.mubr.msk.bf16.vlgmr.msra.gmra.mxu1 %vm931_vm3, %v1597_v10 }
 0xad2   :  { %5559 = vmatpush3.bf16.msra.mxu1 %v1715_v11  ;;  %5560 = vmatprep.mubr.msk.bf16.mxu1 %vm6449_vm0, %v6448_v0 }
 0xad3   :  { %5572 = vmatprep.subr.bf16.mxu1 %v6448_v0 }
 0xad4   :  { %v6034_v8 = vpop.eup %6033 }
 0xad5   :  { %v1707_v18 = vmul.f32 %v6034_v8, %v6030_v55 }
 0xad7   :  { %v1708_v13 = vpack.c.bf16 %v1707_v18, %v1707_v18 }
 0xad9   :  { %5561 = vmatmul.mubr.msk.bf16.vlgmr.msra.gmra.mxu1 %vm931_vm3, %v1708_v13 }
 0xada   :  { %5573 = vmatpush3.bf16.msra.mxu1 %v6798_v58  ;;  %5576 = vmatprep.mubr.msk.bf16.mxu1 %vm6449_vm0, %v6448_v0 }
 0xadb   :  { %5574 = vmatprep.subr.bf16.mxu1 %v6448_v0 }
 0xade   :  { %5575 = vmatpush3.bf16.msra.mxu1 %v6802_v60  ;;  %v1847_v60 = vrot.slane %v6770_v63, 4 }
 0xadf   :  { %5586 = vmatprep.subr.bf16.mxu1 %v6448_v0 }
 0xae0   :  { %v1852_v27 = vsel %vm329_vm1, %v1847_v60, 0 }
 0xb91   :  { %v1640_v19 = vpop.f32.mrf.mxu1 }
 0xb92   :  { %v1646_v21 = vpack.c.bf16 %v1640_v19, %v1640_v19 }
 0xb93   :  { %v5550_v22 = vpop.f32.mrf.mxu1 }
 0xb94   :  { %5577 = vmatmul.mubr.msk.bf16.vlgmr.msra.gmra.mxu1 %vm329_vm1, %v1646_v21 }
 0xb95   :  { %5587 = vmatpush3.bf16.msra.mxu1 %v1912_v23  ;;  %v1643_v58 = vpop.f32.mrf.mxu1  ;;  %5588 = vmatprep.mubr.msk.bf16.mxu1 %vm6449_vm0, %v6448_v0 }
 0xb96   :  { %5600 = vmatprep.subr.bf16.mxu1 %v6448_v0 }
 0xb97   :  { %v5551_v24 = vpop.f32.mrf.mxu1 }
 0xb99   :  { %v1751_v26 = vpop.f32.mrf.mxu1 }
 0xb9a   :  { %v1757_v17 = vpack.c.bf16 %v1751_v26, %v1751_v26 }
 0xb9b   :  { %v5562_v1 = vpop.f32.mrf.mxu1 }
 0xb9c   :  { %5569 = vmatmul.mubr.msk.bf16.vlgmr.msra.gmra.mxu0 %vm329_vm1, %v1757_v17 }
 0xb9d   :  { %5581 = vmatpush3.bf16.xpose.msra.mxu0 %v1852_v27  ;;  %v1754_v25 = vpop.f32.mrf.mxu1  ;;  %5582 = vmatprep.mubr.msk.bf16.mxu0 %vm6449_vm0, %v6448_v0 }
 0xb9e   :  { %5592 = vmatprep.subr.bf16.mxu0 %v6448_v0 }
 0xb9f   :  { %v5563_v38 = vpop.f32.mrf.mxu1 }
 0xba4   :  { %5583 = vmatmul.mubr.msk.bf16.vlgmr.msra.gmra.mxu0 %vm329_vm1, %v1845_v28 }
 0xba5   :  { %5593 = vmatpush3.bf16.msra.mxu0 %v6827_v36  ;;  %5596 = vmatprep.mubr.msk.bf16.mxu0 %vm6449_vm0, %v6448_v0 }
 0xba6   :  { %5594 = vmatprep.subr.bf16.mxu0 %v6448_v0 }
 0xba9   :  { %5595 = vmatpush3.bf16.msra.mxu0 %v6830_v37 }
 0xbaa   :  { %5606 = vmatprep.subr.bf16.mxu0 %v6448_v0 }
 0xc54   :  { %v1838_v63 = vpop.f32.mrf.mxu1 }
 0xc56   :  { %v5578_v30 = vpop.f32.mrf.mxu1 }
 0xc58   :  { %v1841_v50 = vpop.f32.mrf.mxu1 }
 0xc5a   :  { %v5579_v52 = vpop.f32.mrf.mxu1 }
 0xc5c   :  { %v1795_v31 = vpop.f32.mrf.mxu0 }
 0xc5d   :  { %v6930_v53 = vadd.f32 %v1838_v63, %v1795_v31 }
 0xc5e   :  { %v5570_v56 = vpop.f32.mrf.mxu0 }
 0xc60   :  { %v1798_v32 = vpop.f32.mrf.mxu0 }
 0xc61   :  { %v6088_v32 = vld [vmem:[#allocation2 + $0x8] sm:$0xff] }
 0xc62   :  { %v5571_v29 = vpop.f32.mrf.mxu0 }
 0xc64   :  { %v1888_v36 = vpop.f32.mrf.mxu0 }
 0xc65   :  { %v1894_v33 = vsel %vm931_vm3, %v1888_v36, -inf }
 0xc66   :  { %1895 = vmax.xlane.f32.xlu0 %v1894_v33  ;;  %v5584_v34 = vpop.f32.mrf.mxu0 }
 0xc68   :  { %v1891_v35 = vpop.f32.mrf.mxu0 }
 0xc6a   :  { %v5585_v39 = vpop.f32.mrf.mxu0 }
 0xcef   :  { %v1896_v37 = vpop.xlane.xlu0 %1895 }
 0xcf0   :  { %v1897_v40 = vsub.f32 %v1888_v36, %v1896_v37  ;;  %v6965_v37 = vld [vmem:[#allocation19 + $0x8] sm:$0xff]  }
 0xcf2   :  { %v1898_v41 = vmul.f32 1.442695, %v1897_v40  ;;  %v276_v40 = vld [vmem:[#allocation5] sm:$0xff] }
 0xcf4   :  { %6035 = vpow2.f32 %v1898_v41  ;;  %v277_v41 = vld [vmem:[#allocation5 + $0x8] sm:$0xff] }
 0xd01   :  { %v6036_v42 = vpop.eup %6035 }
 0xd02   :  { %v1900_v43 = vsel %vm931_vm3, %v6036_v42, 0.0 }
 0xd03   :  { %1901 = vadd.xlane.f32.xlu1 %v1900_v43  ;;  %v278_v43 = vld [vmem:[#allocation5 + $0x10] sm:$0xff] }
 0xd8c   :  { %v1902_v44 = vpop.xlane.xlu1 %1901 }
 0xd8d   :  { %6037 = vrcp.f32 %v1902_v44  ;;  %v279_v44 = vld [vmem:[#allocation5 + $0x18] sm:$0xff] }
 0xd8e   :  { %v6972_v46 = vpack.c.bf16 %v279_v44, %v278_v43 }
 0xd9a   :  { %v6038_v45 = vpop.eup %6037 }
 0xd9b   :  { %v1904_v47 = vmul.f32 %v6038_v45, %v6036_v42  ;;  %v6967_v42 = vpack.c.bf16 %v277_v41, %v276_v40  ;;  %v6969_v45 = vld [vmem:[#allocation19] sm:$0xff]  }
 0xd9d   :  { %v1905_v48 = vpack.c.bf16 %v1904_v47, %v1904_v47  ;;  %v6977_v47 = vld [vmem:[%s7458_s10 + $0x8] sm:$0xff]  }
 0xd9f   :  { %5589 = vmatmul.mubr.msk.bf16.vlgmr.msra.gmra.mxu1 %vm931_vm3, %v1905_v48  ;;  %v6991_v48 = vld [vmem:[%s7458_s10] sm:$0xff]  }
 0xda0   :  { %5601 = vmatpush3.bf16.xpose.msra.mxu1 %v2007_v49  ;;  %5602 = vmatprep.mubr.msk.bf16.mxu1 %vm6449_vm0, %v6448_v0  ;;  %v7004_v49 = vld [vmem:[#allocation20 + $0x8] sm:$0xff]  }
 0xda1   :  { %5612 = vmatprep.subr.bf16.mxu1 %v6448_v0 }
 0xda7   :  { %5603 = vmatmul.mubr.msk.bf16.vlgmr.msra.gmra.mxu1 %vm329_vm1, %v2000_v54 }
 0xda8   :  { %5613 = vmatpush3.bf16.msra.mxu1 %v6855_v14  ;;  %5616 = vmatprep.mubr.msk.bf16.mxu1 %vm6449_vm0, %v6448_v0  ;;  %v4980_v14 = vld [vmem:[#allocation14] ss:$0 sm:$0xff] }
 0xda9   :  { %5614 = vmatprep.subr.bf16.mxu1 %v6448_v0 }
 0xdac   :  { %5615 = vmatpush3.bf16.msra.mxu1 %v6858_v16  ;;  %v1535_v16 = vadd.f32 %v4980_v14, %v6895_v61 }
 0xdad   :  { %5628 = vmatprep.subr.bf16.mxu1 %v6965_v37 }
 0xdae   :  { %v2157_v7 = vadd.f32 %v6087_v6, %v1535_v16 }
 0xe5f   :  { %v1948_v55 = vpop.f32.mrf.mxu1 }
 0xe60   :  { %v1954_v57 = vpack.c.bf16 %v1948_v55, %v1948_v55 }
 0xe61   :  { %v5590_v59 = vpop.f32.mrf.mxu1 }
 0xe62   :  { %5597 = vmatmul.mubr.msk.bf16.vlgmr.msra.gmra.mxu0 %vm329_vm1, %v1954_v57 }
 0xe63   :  { %5607 = vmatpush3.bf16.msra.mxu0 %v2067_v15  ;;  %v1951_v62 = vpop.f32.mrf.mxu1  ;;  %5608 = vmatprep.mubr.msk.bf16.mxu0 %vm6449_vm0, %v6448_v0 }
 0xe64   :  { %5620 = vmatprep.subr.bf16.mxu0 %v6448_v0 }
 0xe65   :  { %v5591_v2 = vpop.f32.mrf.mxu1 }
 0xe66   :  { %v4993_v2 = vld [vmem:[#allocation16] ss:$0 sm:$0xff] }
 0xe67   :  { %v2043_v3 = vpop.f32.mrf.mxu1 }
 0xe68   :  { %v2049_v20 = vsel %vm931_vm3, %v2043_v3, -inf }
 0xe69   :  { %2050 = vmax.xlane.f32.xlu0 %v2049_v20  ;;  %v5604_v4 = vpop.f32.mrf.mxu1 }
 0xe6a   :  { %v4994_v4 = vld [vmem:[#allocation17] ss:$0 sm:$0xff] }
 0xe6b   :  { %v2046_v5 = vpop.f32.mrf.mxu1 }
 0xe6d   :  { %2159 = vadd.xlane.f32.xlu0 %v2157_v7  ;;  %v5605_v9 = vpop.f32.mrf.mxu1 }
 0xe6e   :  { %v282_v9 = vld [vmem:[#allocation7] sm:$0xff] }
 0xef2   :  { %v2051_v10 = vpop.xlane.xlu0 %2050 }
 0xef3   :  { %v2052_v11 = vsub.f32 %v2043_v3, %v2051_v10  ;;  %v283_v10 = vld [vmem:[#allocation7 + $0x8] sm:$0xff] }
 0xef5   :  { %v2053_v8 = vmul.f32 1.442695, %v2052_v11  ;;  %v284_v11 = vld [vmem:[#allocation7 + $0x10] sm:$0xff] }
 0xef6   :  { %v2160_v18 = vpop.xlane.xlu0 %2159 }
 0xef7   :  { %6039 = vpow2.f32 %v2053_v8  ;;  %v2164_v13 = vmul.f32 0.0078125, %v2160_v18  ;;  %v285_v8 = vld [vmem:[#allocation7 + $0x18] sm:$0xff] }
 0xef9   :  { %v6955_v51 = vsub.f32 %v2157_v7, %v2164_v13  ;;  %v7017_v13 = vld [vmem:[#allocation20] sm:$0xff]  }
 0xefb   :  { %v2168_v61 = vmul.f32 %v6955_v51, %v6955_v51 }
 0xefd   :  { %2170 = vadd.xlane.f32.xlu0 %v2168_v61  ;;  %v7025_v61 = vpack.c.bf16 %v285_v8, %v284_v11 }
 0xf04   :  { %v6040_v19 = vpop.eup %6039 }
 0xf05   :  { %v2055_v21 = vsel %vm931_vm3, %v6040_v19, 0.0 }
 0xf06   :  { %2056 = vadd.xlane.f32.xlu1 %v2055_v21 }
 0xf13   :  { %2477 = vrot.lane.b32.xlu0 %v6967_v42, %s6450_s13 }
 0xf22   :  { %v1992_v22 = vpop.f32.mrf.mxu0 }
 0xf23   :  { %v1998_v23 = vadd.f32 %v1992_v22, %v6930_v53 }
 0xf24   :  { %v5598_v58 = vpop.f32.mrf.mxu0 }
 0xf26   :  { %v1995_v24 = vpop.f32.mrf.mxu0 }
 0xf28   :  { %v5599_v60 = vpop.f32.mrf.mxu0 }
 0xf86   :  { %v2171_v54 = vpop.xlane.xlu0 %2170 }
 0xf87   :  { %v2174_v12 = vmul.f32 0.0078125, %v2171_v54 }
 0xf89   :  { %v2176_v55 = vadd.f32 1e-05, %v2174_v12 }
 0xf8f   :  { %v2057_v26 = vpop.xlane.xlu1 %2056 }
 0xf90   :  { %6041 = vrcp.f32 %v2057_v26 }
 0xf91   :  { %6043 = vrsqrt.f32 %v2176_v55 }
 0xf9d   :  { %v6042_v17 = vpop.eup %6041 }
 0xf9e   :  { %v2059_v1 = vmul.f32 %v6042_v17, %v6040_v19  ;;  %v6044_v62 = vpop.eup %6043  ;;  %v2478_v19 = vpop.permute.xlu0 %2477 }
 0xfa0   :  { %v2060_v27 = vpack.c.bf16 %v2059_v1, %v2059_v1 }
 0xfa2   :  { %5609 = vmatmul.mubr.msk.bf16.vlgmr.msra.gmra.mxu0 %vm931_vm3, %v2060_v27 }
 0xfa3   :  { %5624 = vmatprep.mubr.msk.bf16.mxu0 %vm6449_vm0, %v6448_v0  ;;  %5621 = vmatpush3.bf16.msra.mxu0 %v6977_v47 }
 0xfa4   :  { %5622 = vmatprep.subr.bf16.mxu0 %v6448_v0 }
 0xfa7   :  { %5623 = vmatpush3.bf16.msra.mxu0 %v6991_v48 }
 0xfa8   :  { %5636 = vmatprep.subr.bf16.mxu0 %v7004_v49 }
0x1062   :  { %v2103_v25 = vpop.f32.mrf.mxu0 }
0x1063   :  { %v2109_v38 = vpack.c.bf16 %v2103_v25, %v2103_v25 }
0x1064   :  { %v5610_v28 = vpop.f32.mrf.mxu0 }
0x1065   :  { %5617 = vmatmul.mubr.msk.bf16.vlgmr.msra.gmra.mxu1 %vm329_vm1, %v2109_v38 }
0x1066   :  { %v2106_v63 = vpop.f32.mrf.mxu0  ;;  %5629 = vmatpush3.bf16.msra.mxu1 %v6965_v37  ;;  %5632 = vmatprep.mubr.msk.bf16.mxu1 %vm329_vm1, %v6967_v42 }
0x1067   :  { %5630 = vmatprep.subr.bf16.mxu1 %v6969_v45 }
0x1068   :  { %v5611_v30 = vpop.f32.mrf.mxu0 }
0x106a   :  { %5631 = vmatpush3.bf16.msra.mxu1 %v6969_v45 }
0x106b   :  { %5644 = vmatprep.subr.bf16.mxu1 %v6448_v0 }
0x106d   :  { %5633 = vmatmul.mubr.msk.bf16.vlgmr.msra.gmra.mxu1 %vm329_vm1, %v6972_v46 }
0x106e   :  { %5645 = vmatpush3.bf16.msra.mxu1 %v6977_v47  ;;  %5648 = vmatprep.mubr.msk.bf16.mxu1 %vm6449_vm0, %v6448_v0 }
0x106f   :  { %5646 = vmatprep.subr.bf16.mxu1 %v6448_v0 }
0x1072   :  { %5647 = vmatpush3.bf16.msra.mxu1 %v6991_v48 }
0x1073   :  { %5660 = vmatprep.subr.bf16.mxu1 %v7004_v49 }
0x1125   :  { %v2147_v50 = vpop.f32.mrf.mxu1 }
0x1126   :  { %v2153_v52 = vadd.f32 %v2147_v50, %v1998_v23 }
0x1127   :  { %v5618_v31 = vpop.f32.mrf.mxu1 }
0x1128   :  { %v2154_v53 = vadd.f32 %v4980_v14, %v2153_v52  ;;  %v2180_v14 = vmul.f32 %v6044_v62, %v6955_v51  ;;  %v7023_v51 = vpack.c.bf16 %v283_v10, %v282_v9 }
0x1129   :  { %v2150_v56 = vpop.f32.mrf.mxu1 }
0x112a   :  { %v2158_v29 = vadd.f32 %v6088_v32, %v2154_v53  ;;  %v2188_v20 = vmul.f32 %v4993_v2, %v2180_v14 }
0x112b   :  { %v5619_v36 = vpop.f32.mrf.mxu1 }
0x112c   :  { %2161 = vadd.xlane.f32.xlu1 %v2158_v29  ;;  %v7009_v6 = vadd.f32 %v4994_v4, %v2188_v20 }
0x112d   :  { %v7061_v22 = vpop.f32.mrf.mxu1 }
0x112f   :  { %v2339_v23 = vpop.f32.mrf.mxu1 }
0x1131   :  { %v7063_v58 = vpop.f32.mrf.mxu1 }
0x1132   :  { %v2355_v24 = vpack.c.bf16 %v7063_v58, %v7061_v22 }
0x1133   :  { %v2342_v27 = vpop.f32.mrf.mxu1 }
0x1134   :  { %v2354_v38 = vpack.c.bf16 %v2342_v27, %v2339_v23 }
0x1136   :  { %v2947_v63 = vsel %vm329_vm1, %v2354_v38, 0 }
0x11b5   :  { %v2162_v33 = vpop.xlane.xlu1 %2161 }
0x11b6   :  { %v2165_v34 = vmul.f32 0.0078125, %v2162_v33 }
0x11b8   :  { %v2167_v35 = vsub.f32 %v2158_v29, %v2165_v34 }
0x11ba   :  { %v2169_v39 = vmul.f32 %v2167_v35, %v2167_v35 }
0x11bc   :  { %2172 = vadd.xlane.f32.xlu1 %v2169_v39 }
0x11cd   :  { %2479 = vrot.lane.b32.xlu1 %v6972_v46, %s6450_s13 }
0x1245   :  { %v2173_v57 = vpop.xlane.xlu1 %2172 }
0x1246   :  { %v2175_v59 = vmul.f32 0.0078125, %v2173_v57 }
0x1248   :  { %v2177_v15 = vadd.f32 1e-05, %v2175_v59 }
0x1249   :  { %v2480_v21 = vpop.permute.xlu1 %2479 }
0x124a   :  { %6045 = vrsqrt.f32 %v2177_v15 }
0x1257   :  { %v6046_v16 = vpop.eup %6045 }
0x1258   :  { %v2181_v3 = vmul.f32 %v6046_v16, %v2167_v35 }
0x125a   :  { %v2189_v5 = vmul.f32 %v4993_v2, %v2181_v3 }
0x125c   :  { %v7011_v7 = vadd.f32 %v4994_v4, %v2189_v5 }
0x125e   :  { %v7015_v18 = vpack.c.bf16 %v7011_v7, %v7009_v6 }
0x1260   :  { %2601 = vrot.lane.b32.xlu0 %v7015_v18, %s6431_s28  ;;  %2426 = vrot.lane.b32.xlu1 %v7015_v18, %s6450_s13 }
0x1261   :  { %5625 = vmatmul.mubr.msk.bf16.vlgmr.msra.gmra.mxu0 %vm329_vm1, %v7015_v18 }
0x1262   :  { %5637 = vmatpush3.bf16.msra.mxu0 %v7004_v49  ;;  %5640 = vmatprep.mubr.msk.bf16.mxu0 %vm329_vm1, %v7023_v51 }
0x1263   :  { %5638 = vmatprep.subr.bf16.mxu0 %v7017_v13 }
0x1264   :  { %2711 = vrot.lane.b32.xlu1 %v7023_v51, %s6431_s28  ;;  %2713 = vrot.lane.b32.xlu0 %v7025_v61, %s6431_s28 }
0x1266   :  { %5639 = vmatpush3.bf16.msra.mxu0 %v7017_v13 }
0x1267   :  { %5652 = vmatprep.subr.bf16.mxu0 %v6965_v37 }
0x1268   :  { %2821 = vrot.lane.b32.xlu1 %v6967_v42, %s6451_s19  ;;  %2823 = vrot.lane.b32.xlu0 %v6972_v46, %s6451_s19 }
0x1269   :  { %5641 = vmatmul.mubr.msk.bf16.vlgmr.msra.gmra.mxu0 %vm329_vm1, %v7025_v61 }
0x126a   :  { %5653 = vmatpush3.bf16.msra.mxu0 %v6965_v37  ;;  %5656 = vmatprep.mubr.msk.bf16.mxu0 %vm329_vm1, %v2478_v19 }
0x126b   :  { %5654 = vmatprep.subr.bf16.mxu0 %v6969_v45 }
0x126c   :  { %2540 = vrot.lane.b32.xlu1 %v7023_v51, %s6450_s13  ;;  %2542 = vrot.lane.b32.xlu0 %v7025_v61, %s6450_s13 }
0x126e   :  { %5655 = vmatpush3.bf16.msra.mxu0 %v6969_v45 }
0x126f   :  { %5668 = vmatprep.subr.bf16.mxu0 %v6448_v0 }
0x1271   :  { %5657 = vmatmul.mubr.msk.bf16.vlgmr.msra.gmra.mxu0 %vm329_vm1, %v2480_v21 }
0x1272   :  { %5669 = vmatpush3.bf16.msra.mxu0 %v6977_v47  ;;  %5672 = vmatprep.mubr.msk.bf16.mxu0 %vm6449_vm0, %v6448_v0 }
0x1273   :  { %5670 = vmatprep.subr.bf16.mxu0 %v6448_v0 }
0x1276   :  { %5671 = vmatpush3.bf16.msra.mxu0 %v6991_v48 }
0x1277   :  { %5684 = vmatprep.subr.bf16.mxu0 %v7004_v49 }
0x12d2   :  { %v2602_v60 = vpop.permute.xlu0 %2601  ;;  %v2427_v26 = vpop.permute.xlu1 %2426 }
0x12d3   :  { %5649 = vmatmul.mubr.msk.bf16.vlgmr.msra.gmra.mxu1 %vm329_vm1, %v2427_v26  ;;  %5673 = vmatmul.mubr.msk.bf16.vlgmr.msra.gmra.mxu0 %vm329_vm1, %v2602_v60 }
0x12d4   :  { %5685 = vmatpush3.bf16.msra.mxu0 %v7004_v49  ;;  %5661 = vmatpush3.bf16.msra.mxu1 %v7004_v49 }
0x12d5   :  { %5686 = vmatprep.subr.bf16.mxu0 %v7017_v13  ;;  %5662 = vmatprep.subr.bf16.mxu1 %v7017_v13 }
0x12d6   :  { %v2712_v17 = vpop.permute.xlu1 %2711  ;;  %v2714_v1 = vpop.permute.xlu0 %2713 }
0x12d7   :  { %5688 = vmatprep.mubr.msk.bf16.mxu0 %vm329_vm1, %v2712_v17 }
0x12d8   :  { %5687 = vmatpush3.bf16.msra.mxu0 %v7017_v13  ;;  %5663 = vmatpush3.bf16.msra.mxu1 %v7017_v13 }
0x12d9   :  { %5700 = vmatprep.subr.bf16.mxu0 %v6965_v37  ;;  %5676 = vmatprep.subr.bf16.mxu1 %v6965_v37 }
0x12da   :  { %v2822_v25 = vpop.permute.xlu1 %2821  ;;  %v2824_v28 = vpop.permute.xlu0 %2823 }
0x12db   :  { %5689 = vmatmul.mubr.msk.bf16.vlgmr.msra.gmra.mxu0 %vm329_vm1, %v2714_v1 }
0x12dc   :  { %5701 = vmatpush3.bf16.msra.mxu0 %v6965_v37  ;;  %5704 = vmatprep.mubr.msk.bf16.mxu0 %vm329_vm1, %v2822_v25 }
0x12dd   :  { %5702 = vmatprep.subr.bf16.mxu0 %v6969_v45 }
0x12e0   :  { %5703 = vmatpush3.bf16.msra.mxu0 %v6969_v45 }
0x12e1   :  { %5716 = vmatprep.subr.bf16.mxu0 %v6448_v0 }
0x12e3   :  { %5705 = vmatmul.mubr.msk.bf16.vlgmr.msra.gmra.mxu0 %vm329_vm1, %v2824_v28 }
0x12e4   :  { %5717 = vmatpush3.bf16.xpose.msra.mxu0 %v2947_v63  ;;  %5718 = vmatprep.mubr.msk.bf16.mxu0 %vm6449_vm0, %v6448_v0  ;;  %v2541_v63 = vpop.permute.xlu1 %2540 }
0x12e5   :  { %5728 = vmatprep.subr.bf16.mxu0 %v6448_v0  ;;  %5664 = vmatprep.mubr.msk.bf16.mxu1 %vm329_vm1, %v2541_v63 }
0x1321   :  { %v2277_v30 = vpop.f32.mrf.mxu0 }
0x1322   :  { %v2284_v31 = vmul.f32 4.0, %v2277_v30 }
0x1323   :  { %v5626_v50 = vpop.f32.mrf.mxu0 }
0x1325   :  { %v2280_v52 = vpop.f32.mrf.mxu0 }
0x1326   :  { %v2285_v53 = vmul.f32 4.0, %v2280_v52 }
0x1327   :  { %v5627_v56 = vpop.f32.mrf.mxu0 }
0x1328   :  { %v7089_v32 = vpack.c.bf16 %v2285_v53, %v2284_v31  ;;  %v2543_v56 = vpop.permute.xlu0 %2542 }
0x1329   :  { %v7091_v29 = vpop.f32.mrf.mxu0  ;;  %5665 = vmatmul.mubr.msk.bf16.vlgmr.msra.gmra.mxu1 %vm329_vm1, %v2543_v56 }
0x132a   :  { %5719 = vmatmul.mubr.msk.bf16.vlgmr.msra.gmra.mxu0 %vm329_vm1, %v7089_v32  ;;  %5677 = vmatpush3.bf16.msra.mxu1 %v6965_v37 }
0x132b   :  { %v7095_v36 = vpop.f32.mrf.mxu0  ;;  %5730 = vmatprep.mubr.msk.bf16.mxu0 %vm6449_vm0, %v6448_v0  ;;  %5678 = vmatprep.subr.bf16.mxu1 %v6969_v45 }
0x132d   :  { %v7099_v33 = vpop.f32.mrf.mxu0 }
0x132e   :  { %v2424_v34 = vpack.c.bf16 %v7099_v33, %v7091_v29  ;;  %5679 = vmatpush3.bf16.msra.mxu1 %v6969_v45 }
0x132f   :  { %v7103_v35 = vpop.f32.mrf.mxu0  ;;  %5692 = vmatprep.subr.bf16.mxu1 %v6448_v0 }
0x1330   :  { %v2423_v39 = vpack.c.bf16 %v7103_v35, %v7095_v36  ;;  %v7201_v36 = vld [vmem:[#allocation22 + $0x10] sm:$0xff]  }
0x1331   :  { %v7107_v40 = vpop.f32.mrf.mxu0 }
0x1333   :  { %v2521_v41 = vpop.f32.mrf.mxu0 }
0x1335   :  { %v7109_v43 = vpop.f32.mrf.mxu0 }
0x1336   :  { %v2537_v44 = vpack.c.bf16 %v7109_v43, %v7107_v40 }
0x1337   :  { %v2524_v54 = vpop.f32.mrf.mxu0 }
0x1338   :  { %v2536_v12 = vpack.c.bf16 %v2524_v54, %v2521_v41 }
0x133a   :  { %v3050_v55 = vsel %vm329_vm1, %v2536_v12, 0 }
0x133b   :  { %5729 = vmatpush3.bf16.xpose.msra.mxu0 %v3050_v55 }
0x133c   :  { %5740 = vmatprep.subr.bf16.mxu0 %v6448_v0 }
0x1393   :  { %v2465_v57 = vpop.f32.mrf.mxu1  ;;  %v2640_v59 = vpop.f32.mrf.mxu0 }
0x1394   :  { %v2472_v16 = vmul.f32 4.0, %v2465_v57  ;;  %v2647_v3 = vmul.f32 4.0, %v2640_v59 }
0x1395   :  { %v5650_v15 = vpop.f32.mrf.mxu1  ;;  %v5674_v62 = vpop.f32.mrf.mxu0 }
0x1397   :  { %v2468_v14 = vpop.f32.mrf.mxu1  ;;  %v2643_v2 = vpop.f32.mrf.mxu0 }
0x1398   :  { %v2473_v20 = vmul.f32 4.0, %v2468_v14  ;;  %v2648_v4 = vmul.f32 4.0, %v2643_v2 }
0x1399   :  { %v5651_v5 = vpop.f32.mrf.mxu1  ;;  %v5675_v9 = vpop.f32.mrf.mxu0 }
0x139a   :  { %v7115_v10 = vpack.c.bf16 %v2473_v20, %v2472_v16  ;;  %v7117_v11 = vpack.c.bf16 %v2648_v4, %v2647_v3 }
0x139b   :  { %v7119_v8 = vpop.f32.mrf.mxu0 }
0x139c   :  { %5731 = vmatmul.mubr.msk.bf16.vlgmr.msra.gmra.mxu0 %vm329_vm1, %v7115_v10  ;;  %v3686_v22 = vrot.slane %v7115_v10, 4 }
0x139d   :  { %v7123_v19 = vpop.f32.mrf.mxu0  ;;  %5744 = vmatprep.mubr.msk.bf16.mxu0 %vm6449_vm0, %v6448_v0 }
0x139f   :  { %v7127_v21 = vpop.f32.mrf.mxu0 }
0x13a0   :  { %v2771_v23 = vpack.c.bf16 %v7127_v21, %v7119_v8 }
0x13a1   :  { %v7131_v60 = vpop.f32.mrf.mxu0 }
0x13a2   :  { %v2770_v26 = vpack.c.bf16 %v7131_v60, %v7123_v19 }
0x13a3   :  { %v7135_v17 = vpop.f32.mrf.mxu0 }
0x13a5   :  { %v7137_v1 = vpop.f32.mrf.mxu0 }
0x13a7   :  { %v7139_v27 = vpop.f32.mrf.mxu0 }
0x13a8   :  { %v2881_v25 = vpack.c.bf16 %v7139_v27, %v7135_v17 }
0x13a9   :  { %v7143_v38 = vpop.f32.mrf.mxu0 }
0x13aa   :  { %v2880_v28 = vpack.c.bf16 %v7143_v38, %v7137_v1 }
0x13e9   :  { %v7167_v16 = vpop.f32.mrf.mxu1 }
0x13ea   :  { %v2983_v30 = vpop.f32.mrf.mxu0 }
0x13eb   :  { %v2990_v50 = vsel %vm2989_vm4, %v2983_v30, -inf  ;;  %v2584_v20 = vpop.f32.mrf.mxu1 }
0x13ec   :  { %2991 = vmax.xlane.f32.xlu1 %v2990_v50  ;;  %v5720_v52 = vpop.f32.mrf.mxu0 }
0x13ee   :  { %v2986_v31 = vpop.f32.mrf.mxu0 }
0x13f0   :  { %v5721_v53 = vpop.f32.mrf.mxu0 }
0x13f1   :  { %v7206_v53 = vld [vmem:[#allocation22 + $0x8] sm:$0xff]  }
0x13fd   :  { %2650 = vrot.lane.b32.xlu1 %v6967_v42, %s6431_s28 }
0x145c   :  { %v3086_v41 = vpop.f32.mrf.mxu0 }
0x145d   :  { %v3092_v54 = vsel %vm2989_vm4, %v3086_v41, -inf }
0x145e   :  { %3093 = vmax.xlane.f32.xlu0 %v3092_v54  ;;  %v5732_v12 = vpop.f32.mrf.mxu0 }
0x1460   :  { %v3089_v55 = vpop.f32.mrf.mxu0 }
0x1462   :  { %v5733_v57 = vpop.f32.mrf.mxu0 }
0x1474   :  { %2652 = vrot.lane.b32.xlu0 %v6972_v46, %s6431_s28 }
0x1475   :  { %v2992_v42 = vpop.xlane.xlu1 %2991 }
0x1476   :  { %v2993_v59 = vsub.f32 %v2983_v30, %v2992_v42 }
0x1478   :  { %v2994_v37 = vmul.f32 1.442695, %v2993_v59 }
0x1479   :  { %v2651_v15 = vpop.permute.xlu1 %2650 }
0x147a   :  { %5680 = vmatprep.mubr.msk.bf16.mxu1 %vm329_vm1, %v2651_v15  ;;  %6047 = vpow2.f32 %v2994_v37 }
0x1487   :  { %v6048_v45 = vpop.eup %6047 }
0x1488   :  { %v2996_v62 = vsel %vm2989_vm4, %v6048_v45, 0.0 }
0x1493   :  { %2997 = vadd.xlane.f32.xlu0 %v2996_v62 }
0x14a9   :  { %2772 = vrot.lane.b32.xlu0 %v7015_v18, %s6451_s19  ;;  %v7174_v18 = vpop.f32.mrf.mxu1 }
0x14ab   :  { %v2587_v30 = vpop.f32.mrf.mxu1 }
0x14ac   :  { %v2599_v50 = vpack.c.bf16 %v2587_v30, %v2584_v20 }
0x14ad   :  { %2882 = vrot.lane.b32.xlu0 %v7023_v51, %s6451_s19  ;;  %v2600_v51 = vpack.c.bf16 %v7174_v18, %v7167_v16 }
0x14b1   :  { %2884 = vrot.lane.b32.xlu0 %v7025_v61, %s6451_s19 }
0x14e7   :  { %v3094_v46 = vpop.xlane.xlu0 %3093 }
0x14e8   :  { %v3095_v14 = vsub.f32 %v3086_v41, %v3094_v46  ;;  %v7210_v41 = vld [vmem:[#allocation22] sm:$0xff]  }
0x14ea   :  { %v3096_v2 = vmul.f32 1.442695, %v3095_v14 }
0x14eb   :  { %v2653_v3 = vpop.permute.xlu0 %2652 }
0x14ec   :  { %6049 = vpow2.f32 %v3096_v2  ;;  %5681 = vmatmul.mubr.msk.bf16.vlgmr.msra.gmra.mxu1 %vm329_vm1, %v2653_v3 }
0x14ed   :  { %5693 = vmatpush3.bf16.msra.mxu1 %v6977_v47  ;;  %5696 = vmatprep.mubr.msk.bf16.mxu1 %vm6449_vm0, %v6448_v0 }
0x14ee   :  { %5694 = vmatprep.subr.bf16.mxu1 %v6448_v0 }
0x14f1   :  { %5695 = vmatpush3.bf16.msra.mxu1 %v6991_v48 }
0x14f2   :  { %5708 = vmatprep.subr.bf16.mxu1 %v7004_v49 }
0x14f9   :  { %v6050_v61 = vpop.eup %6049 }
0x14fa   :  { %v3098_v4 = vsel %vm2989_vm4, %v6050_v61, 0.0 }
0x14fb   :  { %3099 = vadd.xlane.f32.xlu1 %v3098_v4 }
0x151c   :  { %v2998_v5 = vpop.xlane.xlu0 %2997 }
0x151d   :  { %6051 = vrcp.f32 %v2998_v5 }
0x1520   :  { %v2773_v47 = vpop.permute.xlu0 %2772 }
0x1521   :  { %5697 = vmatmul.mubr.msk.bf16.vlgmr.msra.gmra.mxu1 %vm329_vm1, %v2773_v47 }
0x1522   :  { %5709 = vmatpush3.bf16.msra.mxu1 %v7004_v49 }
0x1523   :  { %5710 = vmatprep.subr.bf16.mxu1 %v7017_v13 }
0x1524   :  { %v2883_v9 = vpop.permute.xlu0 %2882 }
0x1525   :  { %5712 = vmatprep.mubr.msk.bf16.mxu1 %vm329_vm1, %v2883_v9 }
0x1526   :  { %5711 = vmatpush3.bf16.msra.mxu1 %v7017_v13  ;;  %v7198_v13 = vld [vmem:[#allocation22 + $0x18] sm:$0xff]  }
0x1527   :  { %5722 = vmatprep.subr.bf16.mxu1 %v6448_v0  ;;  %5741 = vmatpush3.bf16.msra.mxu0 %v7198_v13 }
0x1528   :  { %v2885_v48 = vpop.permute.xlu0 %2884  ;;  %5742 = vmatprep.subr.bf16.mxu0 %v6448_v0 }
0x1529   :  { %5713 = vmatmul.mubr.msk.bf16.vlgmr.msra.gmra.mxu1 %vm329_vm1, %v2885_v48 }
0x152a   :  { %v6052_v63 = vpop.eup %6051  ;;  %5723 = vmatpush3.bf16.msra.mxu1 %v2423_v39  ;;  %5724 = vmatprep.mubr.msk.bf16.mxu1 %vm6449_vm0, %v6448_v0 }
0x152b   :  { %v3000_v49 = vmul.f32 %v6052_v63, %v6048_v45  ;;  %5734 = vmatprep.subr.bf16.mxu1 %v6448_v0  ;;  %5743 = vmatpush3.bf16.msra.mxu0 %v7201_v36 }
0x152c   :  { %5756 = vmatprep.subr.bf16.mxu0 %v6448_v0 }
0x152d   :  { %v3001_v52 = vpack.c.bf16 %v3000_v49, %v3000_v49 }
0x1531   :  { %5725 = vmatmul.mubr.msk.bf16.vlgmr.msra.gmra.mxu1 %vm2989_vm4, %v3001_v52 }
0x1532   :  { %5735 = vmatpush3.bf16.msra.mxu1 %v2599_v50  ;;  %5736 = vmatprep.mubr.msk.bf16.mxu1 %vm6449_vm0, %v6448_v0 }
0x1533   :  { %5748 = vmatprep.subr.bf16.mxu1 %v6448_v0 }
0x1584   :  { %v3100_v35 = vpop.xlane.xlu1 %3099 }
0x1585   :  { %6053 = vrcp.f32 %v3100_v35 }
0x1592   :  { %v6054_v39 = vpop.eup %6053 }
0x1593   :  { %v3102_v31 = vmul.f32 %v6054_v39, %v6050_v61 }
0x1595   :  { %v3103_v56 = vpack.c.bf16 %v3102_v31, %v3102_v31 }
0x1597   :  { %5737 = vmatmul.mubr.msk.bf16.vlgmr.msra.gmra.mxu1 %vm2989_vm4, %v3103_v56 }
0x1598   :  { %5749 = vmatpush3.bf16.msra.mxu1 %v7206_v53  ;;  %5752 = vmatprep.mubr.msk.bf16.mxu1 %vm6449_vm0, %v6448_v0 }
0x1599   :  { %5750 = vmatprep.subr.bf16.mxu1 %v6448_v0 }
0x159c   :  { %5751 = vmatpush3.bf16.msra.mxu1 %v7210_v41 }
0x159d   :  { %5762 = vmatprep.subr.bf16.mxu1 %v6448_v0 }
0x15ac   :  { %v7217_v54 = vpop.f32.mrf.mxu1 }
0x15ae   :  { %v2694_v12 = vpop.f32.mrf.mxu1 }
0x15b0   :  { %v7219_v55 = vpop.f32.mrf.mxu1 }
0x15b1   :  { %v2710_v57 = vpack.c.bf16 %v7219_v55, %v7217_v54 }
0x15b2   :  { %v2697_v42 = vpop.f32.mrf.mxu1 }
0x15b3   :  { %v2709_v59 = vpack.c.bf16 %v2697_v42, %v2694_v12 }
0x15b5   :  { %v3262_v39 = vsel %vm329_vm1, %v2709_v59, 0 }
0x15e1   :  { %v2811_v15 = vpop.f32.mrf.mxu1 }
0x15e2   :  { %v2818_v62 = vmul.f32 4.0, %v2811_v15 }
0x15e3   :  { %v5698_v37 = vpop.f32.mrf.mxu1 }
0x15e5   :  { %v2814_v45 = vpop.f32.mrf.mxu1 }
0x15e6   :  { %v2819_v46 = vmul.f32 4.0, %v2814_v45 }
0x15e7   :  { %v5699_v14 = vpop.f32.mrf.mxu1 }
0x15e8   :  { %v7223_v2 = vpack.c.bf16 %v2819_v46, %v2818_v62 }
0x15e9   :  { %v7225_v3 = vpop.f32.mrf.mxu1 }
0x15eb   :  { %v7227_v20 = vpop.f32.mrf.mxu1 }
0x15ed   :  { %v7229_v61 = vpop.f32.mrf.mxu1 }
0x15ee   :  { %v2942_v4 = vpack.c.bf16 %v7229_v61, %v7225_v3 }
0x15ef   :  { %v7233_v5 = vpop.f32.mrf.mxu1 }
0x15f0   :  { %v2941_v47 = vpack.c.bf16 %v7233_v5, %v7227_v20 }
0x15f1   :  { %v3039_v9 = vpop.f32.mrf.mxu1 }
0x15f2   :  { %v3045_v48 = vpack.c.bf16 %v3039_v9, %v3039_v9 }
0x15f3   :  { %v5726_v63 = vpop.f32.mrf.mxu1 }
0x15f4   :  { %5753 = vmatmul.mubr.msk.bf16.vlgmr.msra.gmra.mxu1 %vm329_vm1, %v3045_v48 }
0x15f5   :  { %5763 = vmatpush3.bf16.msra.mxu1 %v2770_v26  ;;  %v3042_v49 = vpop.f32.mrf.mxu1  ;;  %5764 = vmatprep.mubr.msk.bf16.mxu1 %vm6449_vm0, %v6448_v0 }
0x15f6   :  { %5776 = vmatprep.subr.bf16.mxu1 %v6448_v0 }
0x15f7   :  { %v5727_v30 = vpop.f32.mrf.mxu1 }
0x1657   :  { %v3141_v50 = vpop.f32.mrf.mxu1 }
0x1658   :  { %v3147_v52 = vpack.c.bf16 %v3141_v50, %v3141_v50 }
0x1659   :  { %v5738_v35 = vpop.f32.mrf.mxu1 }
0x165a   :  { %5745 = vmatmul.mubr.msk.bf16.vlgmr.msra.gmra.mxu0 %vm329_vm1, %v3147_v52  ;;  %v7255_v52 = vld [vmem:[#allocation22 + $0x28] sm:$0xff]   ;;  %v7258_v35 = vld [vmem:[#allocation22 + $0x20] sm:$0xff]  }
0x165b   :  { %5757 = vmatpush3.bf16.xpose.msra.mxu0 %v3262_v39  ;;  %v3144_v31 = vpop.f32.mrf.mxu1  ;;  %5758 = vmatprep.mubr.msk.bf16.mxu0 %vm6449_vm0, %v6448_v0 }
0x165c   :  { %5768 = vmatprep.subr.bf16.mxu0 %v6448_v0 }
0x165d   :  { %v5739_v19 = vpop.f32.mrf.mxu1 }
0x1662   :  { %5759 = vmatmul.mubr.msk.bf16.vlgmr.msra.gmra.mxu0 %vm329_vm1, %v7117_v11 }
0x1663   :  { %5772 = vmatprep.mubr.msk.bf16.mxu0 %vm6449_vm0, %v6448_v0  ;;  %5769 = vmatpush3.bf16.msra.mxu0 %v7255_v52 }
0x1664   :  { %5770 = vmatprep.subr.bf16.mxu0 %v6448_v0 }
0x1667   :  { %5771 = vmatpush3.bf16.msra.mxu0 %v7258_v35 }
0x1668   :  { %5782 = vmatprep.subr.bf16.mxu0 %v6448_v0 }
0x16b4   :  { %v3252_v60 = vpop.f32.mrf.mxu1 }
0x16b6   :  { %v5754_v26 = vpop.f32.mrf.mxu1 }
0x16b8   :  { %v3255_v56 = vpop.f32.mrf.mxu1 }
0x16b9   :  { %v3420_v56 = vsel %vm329_vm1, %v2880_v28, 0 }
0x16ba   :  { %v5755_v12 = vpop.f32.mrf.mxu1 }
0x171a   :  { %v3197_v42 = vpop.f32.mrf.mxu0 }
0x171c   :  { %v5746_v59 = vpop.f32.mrf.mxu0 }
0x171e   :  { %v3200_v15 = vpop.f32.mrf.mxu0 }
0x1720   :  { %v5747_v37 = vpop.f32.mrf.mxu0 }
0x1722   :  { %v3298_v45 = vpop.f32.mrf.mxu0 }
0x1723   :  { %v3304_v62 = vsel %vm2989_vm4, %v3298_v45, -inf }
0x1724   :  { %3305 = vmax.xlane.f32.xlu0 %v3304_v62  ;;  %v5760_v46 = vpop.f32.mrf.mxu0 }
0x1726   :  { %v3301_v14 = vpop.f32.mrf.mxu0 }
0x1728   :  { %v5761_v9 = vpop.f32.mrf.mxu0 }
0x17ad   :  { %v3306_v48 = vpop.xlane.xlu0 %3305 }
0x17ae   :  { %v3307_v63 = vsub.f32 %v3298_v45, %v3306_v48 }
0x17b0   :  { %v3308_v49 = vmul.f32 1.442695, %v3307_v63 }
0x17b2   :  { %6055 = vpow2.f32 %v3308_v49 }
0x17bf   :  { %v6056_v30 = vpop.eup %6055 }
0x17c0   :  { %v3310_v50 = vsel %vm2989_vm4, %v6056_v30, 0.0 }
0x17c1   :  { %3311 = vadd.xlane.f32.xlu1 %v3310_v50 }
0x184a   :  { %v3312_v39 = vpop.xlane.xlu1 %3311 }
0x184b   :  { %6057 = vrcp.f32 %v3312_v39 }
0x1858   :  { %v6058_v31 = vpop.eup %6057 }
0x1859   :  { %v3314_v19 = vmul.f32 %v6058_v31, %v6056_v30  ;;  %v7286_v31 = vld [vmem:[#allocation22 + $0x38] sm:$0xff]  }
0x185b   :  { %v3315_v26 = vpack.c.bf16 %v3314_v19, %v3314_v19  ;;  %v7289_v19 = vld [vmem:[#allocation22 + $0x30] sm:$0xff]  }
0x185d   :  { %5765 = vmatmul.mubr.msk.bf16.vlgmr.msra.gmra.mxu1 %vm2989_vm4, %v3315_v26 }
0x185e   :  { %5777 = vmatpush3.bf16.xpose.msra.mxu1 %v3420_v56  ;;  %5778 = vmatprep.mubr.msk.bf16.mxu1 %vm6449_vm0, %v6448_v0 }
0x185f   :  { %5788 = vmatprep.subr.bf16.mxu1 %v6448_v0 }
0x1865   :  { %5779 = vmatmul.mubr.msk.bf16.vlgmr.msra.gmra.mxu1 %vm329_vm1, %v7223_v2 }
0x1866   :  { %5792 = vmatprep.mubr.msk.bf16.mxu1 %vm6449_vm0, %v6448_v0  ;;  %5789 = vmatpush3.bf16.msra.mxu1 %v7286_v31 }
0x1867   :  { %5790 = vmatprep.subr.bf16.mxu1 %v6448_v0 }
0x186a   :  { %5791 = vmatpush3.bf16.msra.mxu1 %v7289_v19 }
0x186b   :  { %5802 = vmatprep.subr.bf16.mxu1 %v6448_v0 }
0x191d   :  { %v3353_v12 = vpop.f32.mrf.mxu1 }
0x191e   :  { %v3359_v59 = vpack.c.bf16 %v3353_v12, %v3353_v12  ;;  %v3587_v12 = vsel %vm329_vm1, %v2355_v24, 0 }
0x191f   :  { %v5766_v15 = vpop.f32.mrf.mxu1 }
0x1920   :  { %5773 = vmatmul.mubr.msk.bf16.vlgmr.msra.gmra.mxu0 %vm329_vm1, %v3359_v59  ;;  %v3582_v59 = vrot.slane %v7089_v32, 4  ;;  %v3691_v15 = vsel %vm329_vm1, %v2537_v44, 0 }
0x1921   :  { %5783 = vmatpush3.bf16.msra.mxu0 %v2941_v47  ;;  %v3356_v1 = vpop.f32.mrf.mxu1  ;;  %5784 = vmatprep.mubr.msk.bf16.mxu0 %vm6449_vm0, %v6448_v0  ;;  %v3253_v47 = vadd.f32 %v3252_v60, %v3197_v42 }
0x1922   :  { %5796 = vmatprep.subr.bf16.mxu0 %v6448_v0 }
0x1923   :  { %v5767_v38 = vpop.f32.mrf.mxu1 }
0x1925   :  { %v3456_v28 = vpop.f32.mrf.mxu1 }
0x1926   :  { %v3462_v37 = vsel %vm2989_vm4, %v3456_v28, -inf }
0x1927   :  { %3463 = vmax.xlane.f32.xlu1 %v3462_v37  ;;  %v5780_v45 = vpop.f32.mrf.mxu1 }
0x1929   :  { %v3459_v62 = vpop.f32.mrf.mxu1 }
0x192b   :  { %v5781_v46 = vpop.f32.mrf.mxu1 }
0x19b0   :  { %v3464_v14 = vpop.xlane.xlu1 %3463 }
0x19b1   :  { %v3465_v9 = vsub.f32 %v3456_v28, %v3464_v14 }
0x19b3   :  { %v3466_v48 = vmul.f32 1.442695, %v3465_v9 }
0x19b5   :  { %6059 = vpow2.f32 %v3466_v48 }
0x19c2   :  { %v6060_v20 = vpop.eup %6059 }
0x19c3   :  { %v3468_v5 = vsel %vm2989_vm4, %v6060_v20, 0.0 }
0x19c4   :  { %3469 = vadd.xlane.f32.xlu1 %v3468_v5 }
0x19e0   :  { %v3409_v63 = vpop.f32.mrf.mxu0 }
0x19e1   :  { %v7284_v49 = vadd.f32 %v3409_v63, %v3253_v47 }
0x19e2   :  { %v5774_v30 = vpop.f32.mrf.mxu0 }
0x19e4   :  { %v3412_v50 = vpop.f32.mrf.mxu0 }
0x19e6   :  { %v5775_v39 = vpop.f32.mrf.mxu0 }
0x1a4d   :  { %v3470_v26 = vpop.xlane.xlu1 %3469 }
0x1a4e   :  { %6061 = vrcp.f32 %v3470_v26 }
0x1a5b   :  { %v6062_v60 = vpop.eup %6061 }
0x1a5c   :  { %v3472_v42 = vmul.f32 %v6062_v60, %v6060_v20 }
0x1a5e   :  { %v3473_v56 = vpack.c.bf16 %v3472_v42, %v3472_v42 }
0x1a60   :  { %5785 = vmatmul.mubr.msk.bf16.vlgmr.msra.gmra.mxu0 %vm2989_vm4, %v3473_v56 }
0x1a61   :  { %5797 = vmatpush3.bf16.xpose.msra.mxu0 %v3587_v12  ;;  %5798 = vmatprep.mubr.msk.bf16.mxu0 %vm6449_vm0, %v6448_v0 }
0x1a62   :  { %5808 = vmatprep.subr.bf16.mxu0 %v6448_v0 }
0x1a68   :  { %5799 = vmatmul.mubr.msk.bf16.vlgmr.msra.gmra.mxu0 %vm329_vm1, %v3582_v59 }
0x1a69   :  { %5809 = vmatpush3.bf16.xpose.msra.mxu0 %v3691_v15  ;;  %5810 = vmatprep.mubr.msk.bf16.mxu0 %vm6449_vm0, %v6448_v0 }
0x1a6a   :  { %5820 = vmatprep.subr.bf16.mxu0 %v6448_v0 }
0x1a70   :  { %5811 = vmatmul.mubr.msk.bf16.vlgmr.msra.gmra.mxu0 %vm329_vm1, %v3686_v22 }
0x1a71   :  { %5821 = vmatpush3.bf16.msra.mxu0 %v7198_v13  ;;  %5824 = vmatprep.mubr.msk.bf16.mxu0 %vm6449_vm0, %v6448_v0 }
0x1a72   :  { %5822 = vmatprep.subr.bf16.mxu0 %v6448_v0 }
0x1a75   :  { %5823 = vmatpush3.bf16.msra.mxu0 %v7201_v36 }
0x1a76   :  { %5836 = vmatprep.subr.bf16.mxu0 %v6448_v0 }
0x1b20   :  { %v3511_v58 = vpop.f32.mrf.mxu0 }
0x1b21   :  { %v3517_v24 = vpack.c.bf16 %v3511_v58, %v3511_v58 }
0x1b22   :  { %v5786_v32 = vpop.f32.mrf.mxu0 }
0x1b23   :  { %5793 = vmatmul.mubr.msk.bf16.vlgmr.msra.gmra.mxu1 %vm329_vm1, %v3517_v24 }
0x1b24   :  { %5803 = vmatpush3.bf16.msra.mxu1 %v2424_v34  ;;  %v3514_v40 = vpop.f32.mrf.mxu0  ;;  %5804 = vmatprep.mubr.msk.bf16.mxu1 %vm6449_vm0, %v6448_v0 }
0x1b25   :  { %5814 = vmatprep.subr.bf16.mxu1 %v6448_v0  ;;  %v3881_v40 = vsel %vm329_vm1, %v2710_v57, 0 }
0x1b26   :  { %v5787_v43 = vpop.f32.mrf.mxu0 }
0x1b28   :  { %v3623_v44 = vpop.f32.mrf.mxu0 }
0x1b29   :  { %v3629_v10 = vsel %vm2989_vm4, %v3623_v44, -inf }
0x1b2a   :  { %3630 = vmax.xlane.f32.xlu1 %v3629_v10  ;;  %v5800_v13 = vpop.f32.mrf.mxu0 }
0x1b2c   :  { %v3626_v36 = vpop.f32.mrf.mxu0 }
0x1b2e   :  { %v5801_v1 = vpop.f32.mrf.mxu0 }
0x1b30   :  { %v3727_v38 = vpop.f32.mrf.mxu0 }
0x1b31   :  { %v3733_v28 = vsel %vm2989_vm4, %v3727_v38, -inf }
0x1b32   :  { %3734 = vmax.xlane.f32.xlu0 %v3733_v28  ;;  %v5812_v29 = vpop.f32.mrf.mxu0 }
0x1b34   :  { %v3730_v33 = vpop.f32.mrf.mxu0 }
0x1b36   :  { %v5813_v34 = vpop.f32.mrf.mxu0 }
0x1bb3   :  { %v3631_v37 = vpop.xlane.xlu1 %3630 }
0x1bb4   :  { %v3632_v45 = vsub.f32 %v3623_v44, %v3631_v37 }
0x1bb6   :  { %v3633_v62 = vmul.f32 1.442695, %v3632_v45 }
0x1bb8   :  { %6063 = vpow2.f32 %v3633_v62 }
0x1bbb   :  { %v3735_v46 = vpop.xlane.xlu0 %3734 }
0x1bbc   :  { %v3736_v14 = vsub.f32 %v3727_v38, %v3735_v46 }
0x1bbe   :  { %v3737_v9 = vmul.f32 1.442695, %v3736_v14 }
0x1bc0   :  { %6065 = vpow2.f32 %v3737_v9 }
0x1bc5   :  { %v6064_v48 = vpop.eup %6063 }
0x1bc6   :  { %v3635_v20 = vsel %vm2989_vm4, %v6064_v48, 0.0 }
0x1bc7   :  { %3636 = vadd.xlane.f32.xlu1 %v3635_v20  ;;  %v4024_v20 = vrot.slane %v7223_v2, 4 }
0x1bcd   :  { %v6066_v5 = vpop.eup %6065 }
0x1bce   :  { %v3739_v47 = vsel %vm2989_vm4, %v6066_v5, 0.0 }
0x1bcf   :  { %3740 = vadd.xlane.f32.xlu0 %v3739_v47 }
0x1be3   :  { %v3567_v63 = vpop.f32.mrf.mxu1 }
0x1be4   :  { %v7331_v30 = vadd.f32 %v3567_v63, %v7284_v49 }
0x1be5   :  { %v5794_v50 = vpop.f32.mrf.mxu1 }
0x1be7   :  { %v3570_v39 = vpop.f32.mrf.mxu1 }
0x1be9   :  { %v5795_v26 = vpop.f32.mrf.mxu1 }
0x1c50   :  { %v3637_v60 = vpop.xlane.xlu1 %3636 }
0x1c51   :  { %6067 = vrcp.f32 %v3637_v60 }
0x1c58   :  { %v3741_v42 = vpop.xlane.xlu0 %3740 }
0x1c59   :  { %6069 = vrcp.f32 %v3741_v42 }
0x1c5e   :  { %v6068_v56 = vpop.eup %6067 }
0x1c5f   :  { %v3639_v12 = vmul.f32 %v6068_v56, %v6064_v48  ;;  %v4029_v48 = vsel %vm329_vm1, %v2881_v25, 0 }
0x1c61   :  { %v3640_v59 = vpack.c.bf16 %v3639_v12, %v3639_v12 }
0x1c63   :  { %5805 = vmatmul.mubr.msk.bf16.vlgmr.msra.gmra.mxu1 %vm2989_vm4, %v3640_v59 }
0x1c64   :  { %5815 = vmatpush3.bf16.msra.mxu1 %v2600_v51  ;;  %5816 = vmatprep.mubr.msk.bf16.mxu1 %vm6449_vm0, %v6448_v0 }
0x1c65   :  { %5828 = vmatprep.subr.bf16.mxu1 %v6448_v0 }
0x1c66   :  { %v6070_v49 = vpop.eup %6069 }
0x1c67   :  { %v3743_v15 = vmul.f32 %v6070_v49, %v6066_v5 }
0x1c69   :  { %v3744_v22 = vpack.c.bf16 %v3743_v15, %v3743_v15 }
0x1c6b   :  { %5817 = vmatmul.mubr.msk.bf16.vlgmr.msra.gmra.mxu1 %vm2989_vm4, %v3744_v22 }
0x1c6c   :  { %5829 = vmatpush3.bf16.msra.mxu1 %v7206_v53  ;;  %5832 = vmatprep.mubr.msk.bf16.mxu1 %vm6449_vm0, %v6448_v0 }
0x1c6d   :  { %5830 = vmatprep.subr.bf16.mxu1 %v6448_v0 }
0x1c70   :  { %5831 = vmatpush3.bf16.msra.mxu1 %v7210_v41 }
0x1c71   :  { %5842 = vmatprep.subr.bf16.mxu1 %v6448_v0 }
0x1d23   :  { %v3678_v16 = vpop.f32.mrf.mxu1 }
0x1d24   :  { %v3684_v18 = vpack.c.bf16 %v3678_v16, %v3678_v16 }
0x1d25   :  { %v5806_v51 = vpop.f32.mrf.mxu1 }
0x1d26   :  { %5833 = vmatmul.mubr.msk.bf16.vlgmr.msra.gmra.mxu1 %vm329_vm1, %v3684_v18 }
0x1d27   :  { %5843 = vmatpush3.bf16.msra.mxu1 %v2771_v23  ;;  %v3681_v58 = vpop.f32.mrf.mxu1  ;;  %5844 = vmatprep.mubr.msk.bf16.mxu1 %vm6449_vm0, %v6448_v0  ;;  %v3876_v23 = vrot.slane %v7117_v11, 4 }
0x1d28   :  { %5856 = vmatprep.subr.bf16.mxu1 %v6448_v0 }
0x1d29   :  { %v5807_v53 = vpop.f32.mrf.mxu1 }
0x1d2b   :  { %v3782_v24 = vpop.f32.mrf.mxu1 }
0x1d2c   :  { %v3788_v41 = vpack.c.bf16 %v3782_v24, %v3782_v24 }
0x1d2d   :  { %v5818_v32 = vpop.f32.mrf.mxu1 }
0x1d2e   :  { %5825 = vmatmul.mubr.msk.bf16.vlgmr.msra.gmra.mxu0 %vm329_vm1, %v3788_v41 }
0x1d2f   :  { %5837 = vmatpush3.bf16.xpose.msra.mxu0 %v3881_v40  ;;  %v3785_v8 = vpop.f32.mrf.mxu1  ;;  %5838 = vmatprep.mubr.msk.bf16.mxu0 %vm6449_vm0, %v6448_v0 }
0x1d30   :  { %5848 = vmatprep.subr.bf16.mxu0 %v6448_v0 }
0x1d31   :  { %v5819_v21 = vpop.f32.mrf.mxu1 }
0x1d36   :  { %5839 = vmatmul.mubr.msk.bf16.vlgmr.msra.gmra.mxu0 %vm329_vm1, %v3876_v23 }
0x1d37   :  { %5849 = vmatpush3.bf16.msra.mxu0 %v7255_v52  ;;  %5852 = vmatprep.mubr.msk.bf16.mxu0 %vm6449_vm0, %v6448_v0 }
0x1d38   :  { %5850 = vmatprep.subr.bf16.mxu0 %v6448_v0 }
0x1d3b   :  { %5851 = vmatpush3.bf16.msra.mxu0 %v7258_v35 }
0x1d3c   :  { %5862 = vmatprep.subr.bf16.mxu0 %v6448_v0 }
0x1de6   :  { %v3869_v54 = vpop.f32.mrf.mxu1 }
0x1de8   :  { %v5834_v55 = vpop.f32.mrf.mxu1 }
0x1dea   :  { %v3872_v57 = vpop.f32.mrf.mxu1 }
0x1dec   :  { %v5835_v43 = vpop.f32.mrf.mxu1 }
0x1dee   :  { %v3826_v44 = vpop.f32.mrf.mxu0 }
0x1def   :  { %v7370_v10 = vadd.f32 %v3869_v54, %v3826_v44 }
0x1df0   :  { %v5826_v11 = vpop.f32.mrf.mxu0 }
0x1df1   :  { %v5933_v11 = vld [vmem:[#allocation23 + $0xe4] ss:$16 sps:$4 sm:$0xff]  }
0x1df2   :  { %v3829_v13 = vpop.f32.mrf.mxu0 }
0x1df3   :  { %v5934_v13 = vld [vmem:[#allocation23 + $0xe8] ss:$16 sps:$4 sm:$0xff]  }
0x1df4   :  { %v5827_v36 = vpop.f32.mrf.mxu0 }
0x1df5   :  { %v5936_v36 = vld [vmem:[#allocation23 + $0xec] ss:$16 sps:$4 sm:$0xff]  }
0x1df6   :  { %v3917_v52 = vpop.f32.mrf.mxu0 }
0x1df7   :  { %v3923_v1 = vsel %vm2989_vm4, %v3917_v52, -inf }
0x1df8   :  { %3924 = vmax.xlane.f32.xlu1 %v3923_v1  ;;  %v5840_v38 = vpop.f32.mrf.mxu0  ;;  %v5942_v1 = vld [vmem:[#allocation23 + $0xcc] ss:$16 sps:$4 sm:$0xff]  }
0x1df9   :  { %v5937_v38 = vld [vmem:[#allocation23 + $0xc0] ss:$16 sps:$4 sm:$0xff]  }
0x1dfa   :  { %v3920_v28 = vpop.f32.mrf.mxu0 }
0x1dfb   :  { %v5940_v28 = vld [vmem:[#allocation23 + $0xc8] ss:$16 sps:$4 sm:$0xff]  }
0x1dfc   :  { %v5841_v29 = vpop.f32.mrf.mxu0 }
0x1e81   :  { %v3925_v35 = vpop.xlane.xlu1 %3924 }
0x1e82   :  { %v3926_v33 = vsub.f32 %v3917_v52, %v3925_v35  ;;  %v5939_v52 = vld [vmem:[#allocation23 + $0xc4] ss:$16 sps:$4 sm:$0xff]  }
0x1e84   :  { %v3927_v34 = vmul.f32 1.442695, %v3926_v33 }
0x1e86   :  { %6071 = vpow2.f32 %v3927_v34  ;;  %v5945_v34 = vld [vmem:[#allocation23 + $0xa4] ss:$16 sps:$4 sm:$0xff]  }
0x1e93   :  { %v6072_v37 = vpop.eup %6071 }
0x1e94   :  { %v3929_v45 = vsel %vm2989_vm4, %v6072_v37, 0.0 }
0x1e95   :  { %3930 = vadd.xlane.f32.xlu0 %v3929_v45  ;;  %v5943_v45 = vld [vmem:[#allocation23 + $0xa0] ss:$16 sps:$4 sm:$0xff]  }
0x1f1e   :  { %v3931_v62 = vpop.xlane.xlu0 %3930 }
0x1f1f   :  { %6073 = vrcp.f32 %v3931_v62  ;;  %v5946_v62 = vld [vmem:[#allocation23 + $0xa8] ss:$16 sps:$4 sm:$0xff]  }
0x1f2c   :  { %v6074_v46 = vpop.eup %6073 }
0x1f2d   :  { %v3933_v14 = vmul.f32 %v6074_v46, %v6072_v37  ;;  %v5948_v37 = vld [vmem:[#allocation23 + $0xac] ss:$16 sps:$4 sm:$0xff]   ;;  %v5951_v46 = vld [vmem:[#allocation23 + $0x84] ss:$16 sps:$4 sm:$0xff]  }
0x1f2f   :  { %v3934_v9 = vpack.c.bf16 %v3933_v14, %v3933_v14  ;;  %v5954_v14 = vld [vmem:[#allocation23 + $0x8c] ss:$16 sps:$4 sm:$0xff]  }
0x1f31   :  { %5845 = vmatmul.mubr.msk.bf16.vlgmr.msra.gmra.mxu1 %vm2989_vm4, %v3934_v9  ;;  %v5949_v9 = vld [vmem:[#allocation23 + $0x80] ss:$16 sps:$4 sm:$0xff]  }
0x1f32   :  { %5857 = vmatpush3.bf16.xpose.msra.mxu1 %v4029_v48  ;;  %5858 = vmatprep.mubr.msk.bf16.mxu1 %vm6449_vm0, %v6448_v0  ;;  %v5952_v48 = vld [vmem:[#allocation23 + $0x88] ss:$16 sps:$4 sm:$0xff]  }
0x1f33   :  { %5868 = vmatprep.subr.bf16.mxu1 %v6448_v0 }
0x1f39   :  { %5859 = vmatmul.mubr.msk.bf16.vlgmr.msra.gmra.mxu1 %vm329_vm1, %v4024_v20  ;;  %v5957_v20 = vld [vmem:[#allocation23 + $0x64] ss:$16 sps:$4 sm:$0xff]  }
0x1f3a   :  { %5869 = vmatpush3.bf16.msra.mxu1 %v7286_v31  ;;  %5872 = vmatprep.mubr.msk.bf16.mxu1 %vm6449_vm0, %v6448_v0  ;;  %v5041_v31 = vld [vmem:[%s7462_s14] ss:$0 sm:$0xff] }
0x1f3b   :  { %5870 = vmatprep.subr.bf16.mxu1 %v6448_v0 }
0x1f3e   :  { %5871 = vmatpush3.bf16.msra.mxu1 %v7289_v19  ;;  %v3580_v19 = vadd.f32 %v5041_v31, %v7331_v30 }
0x1f3f   :  { %4472 = vmatprep.subr.bf16.mxu1 %v5936_v36  ;;  %v5992_v36 = vld [vmem:[#allocation25 + $0xe0] sm:$0xff]  }
0x1f40   :  { %v4174_v3 = vadd.f32 %v3580_v19, %v7009_v6  ;;  %v5964_v19 = vld [vmem:[#allocation23 + $0x48] ss:$16 sps:$4 sm:$0xff]  }
0x1ff1   :  { %v3972_v17 = vpop.f32.mrf.mxu1 }
0x1ff2   :  { %v3978_v27 = vpack.c.bf16 %v3972_v17, %v3972_v17  ;;  %v5960_v17 = vld [vmem:[#allocation23 + $0x6c] ss:$16 sps:$4 sm:$0xff]  }
0x1ff3   :  { %v5846_v25 = vpop.f32.mrf.mxu1 }
0x1ff4   :  { %5853 = vmatmul.mubr.msk.bf16.vlgmr.msra.gmra.mxu0 %vm329_vm1, %v3978_v27  ;;  %v5955_v27 = vld [vmem:[#allocation23 + $0x60] ss:$16 sps:$4 sm:$0xff]   ;;  %v5958_v25 = vld [vmem:[#allocation23 + $0x68] ss:$16 sps:$4 sm:$0xff]  }
0x1ff5   :  { %5863 = vmatpush3.bf16.msra.mxu0 %v2942_v4  ;;  %v3975_v2 = vpop.f32.mrf.mxu1  ;;  %5864 = vmatprep.mubr.msk.bf16.mxu0 %vm6449_vm0, %v6448_v0 }
0x1ff6   :  { %4429 = vmatprep.subr.bf16.mxu0 %v5933_v11  ;;  %v5963_v2 = vld [vmem:[#allocation23 + $0x44] ss:$16 sps:$4 sm:$0xff]   ;;  %v5990_v11 = vld [vmem:[#allocation25 + $0xa8] sm:$0xff]  }
0x1ff7   :  { %v5847_v5 = vpop.f32.mrf.mxu1 }
0x1ff8   :  { %v5961_v5 = vld [vmem:[#allocation23 + $0x40] ss:$16 sps:$4 sm:$0xff]  }
0x1ff9   :  { %v4065_v47 = vpop.f32.mrf.mxu1 }
0x1ffa   :  { %v4071_v63 = vsel %vm2989_vm4, %v4065_v47, -inf }
0x1ffb   :  { %4072 = vmax.xlane.f32.xlu1 %v4071_v63  ;;  %v5860_v50 = vpop.f32.mrf.mxu1  ;;  %v5972_v63 = vld [vmem:[#allocation23 + $0x2c] ss:$16 sps:$4 sm:$0xff]  }
0x1ffc   :  { %v5967_v50 = vld [vmem:[#allocation23 + $0x20] ss:$16 sps:$4 sm:$0xff]  }
0x1ffd   :  { %v4068_v39 = vpop.f32.mrf.mxu1 }
0x1ffe   :  { %v5970_v39 = vld [vmem:[#allocation23 + $0x28] ss:$16 sps:$4 sm:$0xff]  }
0x1fff   :  { %4176 = vadd.xlane.f32.xlu1 %v4174_v3  ;;  %v5861_v61 = vpop.f32.mrf.mxu1 }
0x2000   :  { %v5978_v61 = vld [vmem:[#allocation23 + $0xc] ss:$16 sps:$4 sm:$0xff]  }
0x2084   :  { %v4073_v4 = vpop.xlane.xlu1 %4072 }
0x2085   :  { %v4074_v26 = vsub.f32 %v4065_v47, %v4073_v4  ;;  %v5969_v47 = vld [vmem:[#allocation23 + $0x24] ss:$16 sps:$4 sm:$0xff]   ;;  %v5973_v4 = vld [vmem:[#allocation23] ss:$16 sps:$4 sm:$0xff]  }
0x2087   :  { %v4075_v0 = vmul.f32 1.442695, %v4074_v26  ;;  %v5976_v26 = vld [vmem:[#allocation23 + $0x8] ss:$16 sps:$4 sm:$0xff]  }
0x2088   :  { %v4177_v60 = vpop.xlane.xlu1 %4176 }
0x2089   :  { %6075 = vpow2.f32 %v4075_v0  ;;  %v4180_v42 = vmul.f32 0.0078125, %v4177_v60  ;;  %v6452_v0 = vmov 0   ;;  %v5979_v60 = vld [vmem:[#allocation25 + $0x78] sm:$0xff]  }
0x208b   :  { %v7401_v56 = vsub.f32 %v4174_v3, %v4180_v42  ;;  %v5975_v3 = vld [vmem:[#allocation23 + $0x4] ss:$16 sps:$4 sm:$0xff]   ;;  %v5980_v42 = vld [vmem:[#allocation25 + $0xf8] sm:$0xff]  }
0x208d   :  { %v4184_v30 = vmul.f32 %v7401_v56, %v7401_v56 }
0x208f   :  { %4186 = vadd.xlane.f32.xlu1 %v4184_v30 }
0x2096   :  { %v6076_v12 = vpop.eup %6075 }
0x2097   :  { %v4077_v59 = vsel %vm2989_vm4, %v6076_v12, 0.0 }
0x2098   :  { %4078 = vadd.xlane.f32.xlu0 %v4077_v59 }
0x20b4   :  { %v4016_v49 = vpop.f32.mrf.mxu0 }
0x20b5   :  { %v4022_v6 = vadd.f32 %v4016_v49, %v7370_v10  ;;  %v5931_v10 = vld [vmem:[#allocation23 + $0xe0] ss:$16 sps:$4 sm:$0xff]  }
0x20b6   :  { %v5854_v15 = vpop.f32.mrf.mxu0 }
0x20b8   :  { %v4019_v22 = vpop.f32.mrf.mxu0 }
0x20ba   :  { %v5855_v16 = vpop.f32.mrf.mxu0 }
0x2118   :  { %v4187_v30 = vpop.xlane.xlu1 %4186 }
0x2121   :  { %v4079_v18 = vpop.xlane.xlu0 %4078 }
0x2122   :  { %6077 = vrcp.f32 %v4079_v18  ;;  %v5054_v18 = vld [vmem:[%s7463_s15] ss:$0 sm:$0xff] }
0x212f   :  { %v6078_v51 = vpop.eup %6077 }
0x2130   :  { %v4081_v58 = vmul.f32 %v6078_v51, %v6076_v12  ;;  %v4190_v12 = vmul.f32 0.0078125, %v4187_v30 }
0x2132   :  { %v4082_v53 = vpack.c.bf16 %v4081_v58, %v4081_v58  ;;  %v4192_v59 = vadd.f32 1e-05, %v4190_v12 }
0x2134   :  { %5865 = vmatmul.mubr.msk.bf16.vlgmr.msra.gmra.mxu0 %vm2989_vm4, %v4082_v53  ;;  %6079 = vrsqrt.f32 %v4192_v59 }
0x2135   :  { %4430 = vmatpush1.bf16.msra.mxu0 %v5931_v10  ;;  %4461 = vmatprep.mubr.bf16.mxu0 %v6452_v0  ;;  %v5989_v10 = vld [vmem:[#allocation25 + $0x28] sm:$0xff]  }
0x2136   :  { %4431 = vmatprep.subr.bf16.mxu0 %v5939_v52  ;;  %v5993_v52 = vld [vmem:[#allocation25 + $0x20] sm:$0xff]  }
0x2139   :  { %4432 = vmatpush1.bf16.msra.mxu0 %v5937_v38  ;;  %v5995_v38 = vld [vmem:[#allocation25 + $0x58] sm:$0xff]  }
0x213a   :  { %4433 = vmatprep.subr.bf16.mxu0 %v5945_v34  ;;  %v6001_v34 = vld [vmem:[#allocation25 + $0x10] sm:$0xff]  }
0x213d   :  { %4434 = vmatpush1.bf16.msra.mxu0 %v5943_v45  ;;  %v6003_v45 = vld [vmem:[#allocation25 + $0x48] sm:$0xff]  }
0x213e   :  { %4435 = vmatprep.subr.bf16.mxu0 %v5951_v46  ;;  %v6005_v46 = vld [vmem:[#allocation25 + $0x8] sm:$0xff]  }
0x2141   :  { %4436 = vmatpush1.bf16.msra.mxu0 %v5949_v9  ;;  %v6080_v22 = vpop.eup %6079  ;;  %v6007_v9 = vld [vmem:[#allocation25 + $0x40] sm:$0xff]  }
0x2142   :  { %4437 = vmatprep.subr.bf16.mxu0 %v5957_v20  ;;  %v4196_v16 = vmul.f32 %v6080_v22, %v7401_v56  ;;  %v6009_v20 = vld [vmem:[#allocation25] sm:$0xff]  }
0x2144   :  { %v4204_v53 = vmul.f32 %v5054_v18, %v4196_v16 }
0x2145   :  { %4438 = vmatpush1.bf16.msra.mxu0 %v5955_v27  ;;  %v4249_v27 = vlaneseq }
0x2146   :  { %4439 = vmatprep.subr.bf16.mxu0 %v5963_v2 }
0x2149   :  { %4440 = vmatpush1.bf16.msra.mxu0 %v5961_v5 }
0x214a   :  { %4441 = vmatprep.subr.bf16.mxu0 %v5969_v47  ;;  %v4247_v47 = vld [vmem:[%s7466_s18] sm:$0xf] }
0x214d   :  { %4442 = vmatpush1.bf16.msra.mxu0 %v5967_v50 }
0x214e   :  { %4443 = vmatprep.subr.bf16.mxu0 %v5975_v3 }
0x2151   :  { %4444 = vmatpush1.bf16.msra.mxu0 %v5973_v4 }
0x2152   :  { %5320 = vmatprep.subr.bf16.mxu0 %v5979_v60 }
0x21f4   :  { %v4120_v24 = vpop.f32.mrf.mxu0 }
0x21f5   :  { %v4126_v41 = vpack.c.bf16 %v4120_v24, %v4120_v24  ;;  %v5055_v24 = vld [vmem:[%s7464_s16] ss:$0 sm:$0xff] }
0x21f6   :  { %v5866_v32 = vpop.f32.mrf.mxu0 }
0x21f7   :  { %5873 = vmatmul.mubr.msk.bf16.vlgmr.msra.gmra.mxu1 %vm329_vm1, %v4126_v41  ;;  %v7422_v32 = vadd.f32 %v5055_v24, %v4204_v53 }
0x21f8   :  { %v4123_v40 = vpop.f32.mrf.mxu0  ;;  %4473 = vmatpush1.bf16.msra.mxu1 %v5934_v13  ;;  %4504 = vmatprep.mubr.bf16.mxu1 %v6452_v0  ;;  %v5991_v13 = vld [vmem:[#allocation25 + $0x60] sm:$0xff]  }
0x21f9   :  { %4474 = vmatprep.subr.bf16.mxu1 %v5942_v1  ;;  %v5994_v1 = vld [vmem:[#allocation25 + $0xa0] sm:$0xff]  }
0x21fa   :  { %v5867_v8 = vpop.f32.mrf.mxu0 }
0x21fb   :  { %v5981_v8 = vld [vmem:[#allocation25 + $0x38] sm:$0xff]  }
0x21fc   :  { %4475 = vmatpush1.bf16.msra.mxu1 %v5940_v28  ;;  %v5996_v28 = vld [vmem:[#allocation25 + $0xd8] sm:$0xff]  }
0x21fd   :  { %4476 = vmatprep.subr.bf16.mxu1 %v5948_v37  ;;  %v6002_v37 = vld [vmem:[#allocation25 + $0x90] sm:$0xff]  }
0x2200   :  { %4477 = vmatpush1.bf16.msra.mxu1 %v5946_v62  ;;  %v6004_v62 = vld [vmem:[#allocation25 + $0xc8] sm:$0xff]  }
0x2201   :  { %4478 = vmatprep.subr.bf16.mxu1 %v5954_v14  ;;  %v6006_v14 = vld [vmem:[#allocation25 + $0x88] sm:$0xff]  }
0x2204   :  { %4479 = vmatpush1.bf16.msra.mxu1 %v5952_v48  ;;  %v6008_v48 = vld [vmem:[#allocation25 + $0xc0] sm:$0xff]  }
0x2205   :  { %4480 = vmatprep.subr.bf16.mxu1 %v5960_v17  ;;  %v6010_v17 = vld [vmem:[#allocation25 + $0x80] sm:$0xff]  }
0x2208   :  { %4481 = vmatpush1.bf16.msra.mxu1 %v5958_v25  ;;  %v4250_v25 = vshrl.u32 %v4249_v27, 7 }
0x220a   :  { %v4255_v2 = vsub.s32 1, %v4250_v25  ;;  %v4251_v5 = vsub.s32 0, %v4250_v25 }
0x22b7   :  { %v4164_v21 = vpop.f32.mrf.mxu1 }
0x22b8   :  { %v4170_v23 = vadd.f32 %v4164_v21, %v4022_v6  ;;  %v5982_v21 = vld [vmem:[#allocation25 + $0xb8] sm:$0xff]  }
0x22b9   :  { %v5874_v54 = vpop.f32.mrf.mxu1 }
0x22ba   :  { %v4171_v55 = vadd.f32 %v5041_v31, %v4170_v23  ;;  %v5966_v31 = vld [vmem:[#allocation23 + $0x4c] ss:$16 sps:$4 sm:$0xff]   ;;  %v5983_v23 = vld [vmem:[#allocation25 + $0x70] sm:$0xff]  }
0x22bb   :  { %v4167_v57 = vpop.f32.mrf.mxu1  ;;  %4482 = vmatprep.subr.bf16.mxu1 %v5966_v31  ;;  %v5984_v54 = vld [vmem:[#allocation25 + $0xf0] sm:$0xff]   ;;  %v4263_v31 = vsub.s32 3, %v4250_v25 }
0x22bc   :  { %v4175_v43 = vadd.f32 %v4171_v55, %v7011_v7  ;;  %4483 = vmatpush1.bf16.msra.mxu1 %v5964_v19  ;;  %v5985_v55 = vld [vmem:[#allocation25 + $0x30] sm:$0xff]   ;;  %v4259_v19 = vsub.s32 2, %v4250_v25 }
0x22bd   :  { %v5875_v44 = vpop.f32.mrf.mxu1  ;;  %4484 = vmatprep.subr.bf16.mxu1 %v5972_v63  ;;  %v5986_v57 = vld [vmem:[#allocation25 + $0xb0] sm:$0xff]   ;;  %v4264_v3 = vrot.slane %v4247_v47, %v4263_v31 }
0x22be   :  { %4178 = vadd.xlane.f32.xlu0 %v4175_v43  ;;  %v5988_v44 = vld [vmem:[#allocation25 + $0xe8] sm:$0xff]   ;;  %v4260_v4 = vrot.slane %v4247_v47, %v4259_v19 }
0x22c0   :  { %4485 = vmatpush1.bf16.msra.mxu1 %v5970_v39  ;;  %v4256_v39 = vrot.slane %v4247_v47, %v4255_v2 }
0x22c1   :  { %4486 = vmatprep.subr.bf16.mxu1 %v5978_v61  ;;  %v4252_v61 = vrot.slane %v4247_v47, %v4251_v5 }
0x22c4   :  { %4487 = vmatpush1.bf16.msra.mxu1 %v5976_v26 }
0x22c5   :  { %5342 = vmatprep.subr.bf16.mxu1 %v5980_v42 }
0x2347   :  { %v4179_v29 = vpop.xlane.xlu0 %4178 }
0x2348   :  { %v4181_v7 = vmul.f32 0.0078125, %v4179_v29  ;;  %v5997_v29 = vld [vmem:[#allocation25 + $0x18] sm:$0xff]  }
0x234a   :  { %v7410_v35 = vsub.f32 %v4175_v43, %v4181_v7  ;;  %v5987_v43 = vld [vmem:[#allocation25 + $0x68] sm:$0xff]   ;;  %v5998_v7 = vld [vmem:[#allocation25 + $0x98] sm:$0xff]  }
0x234c   :  { %v4185_v33 = vmul.f32 %v7410_v35, %v7410_v35 }
0x234e   :  { %4188 = vadd.xlane.f32.xlu0 %v4185_v33  ;;  %v6000_v33 = vld [vmem:[#allocation25 + $0xd0] sm:$0xff]  }
0x23d7   :  { %v4189_v49 = vpop.xlane.xlu0 %4188 }
0x23d8   :  { %v4191_v6 = vmul.f32 0.0078125, %v4189_v49 }
0x23da   :  { %v4193_v15 = vadd.f32 1e-05, %v4191_v6 }
0x23dc   :  { %6081 = vrsqrt.f32 %v4193_v15 }
0x23e9   :  { %v6082_v51 = vpop.eup %6081 }
0x23ea   :  { %v4197_v58 = vmul.f32 %v6082_v51, %v7410_v35  ;;  %v5999_v35 = vld [vmem:[#allocation25 + $0x50] sm:$0xff]  }
0x23ec   :  { %v4205_v41 = vmul.f32 %v5054_v18, %v4197_v58 }
0x23ee   :  { %v7424_v40 = vadd.f32 %v5055_v24, %v4205_v41 }
0x23f0   :  { %v4214_v56 = vpack.c.bf16 %v7424_v40, %v7422_v32 }
0x23f2   :  { %4462 = vmatmul.mubr.bf16.vlgmr.msra.gmra.mxu0 %v4214_v56  ;;  %4505 = vmatmul.mubr.bf16.vlgmr.msra.gmra.mxu1 %v4214_v56 }
0x23f3   :  { %5321 = vmatpush3.bf16.msra.mxu0 %v5981_v8  ;;  %5343 = vmatpush3.bf16.msra.mxu1 %v5982_v21 }
0x23f4   :  { %5322 = vmatprep.subr.bf16.mxu0 %v5983_v23  ;;  %5344 = vmatprep.subr.bf16.mxu1 %v5984_v54 }
0x23f7   :  { %5323 = vmatpush3.bf16.msra.mxu0 %v5985_v55  ;;  %5345 = vmatpush3.bf16.msra.mxu1 %v5986_v57 }
0x23f8   :  { %5324 = vmatprep.subr.bf16.mxu0 %v5987_v43  ;;  %5346 = vmatprep.subr.bf16.mxu1 %v5988_v44 }
0x23fb   :  { %5325 = vmatpush3.bf16.msra.mxu0 %v5989_v10  ;;  %5347 = vmatpush3.bf16.msra.mxu1 %v5990_v11  ;;  %v5088_v11 = vld [vmem:[%s7468_s20] ss:$0 sm:$0xff] }
0x23fc   :  { %5326 = vmatprep.subr.bf16.mxu0 %v5991_v13  ;;  %5348 = vmatprep.subr.bf16.mxu1 %v5992_v36 }
0x23ff   :  { %5327 = vmatpush3.bf16.msra.mxu0 %v5993_v52  ;;  %5349 = vmatpush3.bf16.msra.mxu1 %v5994_v1 }
0x2400   :  { %5328 = vmatprep.subr.bf16.mxu0 %v5995_v38  ;;  %5350 = vmatprep.subr.bf16.mxu1 %v5996_v28 }
0x2403   :  { %5329 = vmatpush3.bf16.msra.mxu0 %v5997_v29  ;;  %5351 = vmatpush3.bf16.msra.mxu1 %v5998_v7 }
0x2404   :  { %5330 = vmatprep.subr.bf16.mxu0 %v5999_v35  ;;  %5352 = vmatprep.subr.bf16.mxu1 %v6000_v33 }
0x2407   :  { %5331 = vmatpush3.bf16.msra.mxu0 %v6001_v34  ;;  %5353 = vmatpush3.bf16.msra.mxu1 %v6002_v37 }
0x2408   :  { %5332 = vmatprep.subr.bf16.mxu0 %v6003_v45  ;;  %5354 = vmatprep.subr.bf16.mxu1 %v6004_v62 }
0x240b   :  { %5333 = vmatpush3.bf16.msra.mxu0 %v6005_v46  ;;  %5355 = vmatpush3.bf16.msra.mxu1 %v6006_v14 }
0x240c   :  { %5334 = vmatprep.subr.bf16.mxu0 %v6007_v9  ;;  %5356 = vmatprep.subr.bf16.mxu1 %v6008_v48 }
0x240f   :  { %5335 = vmatpush3.bf16.msra.mxu0 %v6009_v20  ;;  %5357 = vmatpush3.bf16.msra.mxu1 %v6010_v17 }
0x24b2   :  { %v4463_v63 = vpop.f32.mrf.mxu0  ;;  %v4506_v50 = vpop.f32.mrf.mxu1 }
0x24b3   :  { %v4464_v6 = vadd.f32 %v4463_v63, %v4252_v61  ;;  %v4507_v15 = vadd.f32 %v4506_v50, %v4260_v4 }
0x24b4   :  { %v4465_v26 = vpop.f32.mrf.mxu0  ;;  %v4508_v0 = vpop.f32.mrf.mxu1 }
0x24b5   :  { %v4466_v30 = vadd.f32 %v4465_v26, %v4256_v39  ;;  %v4509_v12 = vadd.f32 %v4508_v0, %v4264_v3  ;;  %v4515_v56 = vmax.f32 %v4464_v6, 0.0  ;;  %v4517_v23 = vmax.f32 %v4507_v15, 0.0  ;;  %v5122_v0 = vld [vmem:[%s7470_s22] ss:$0 sm:$0xff] }
0x24b6   :  { %v4467_v60 = vpop.f32.mrf.mxu0  ;;  %v4510_v42 = vpop.f32.mrf.mxu1 }
0x24b7   :  { %v4468_v59 = vadd.f32 %v4467_v60, %v4252_v61  ;;  %v4511_v49 = vadd.f32 %v4510_v42, %v4260_v4  ;;  %v4516_v24 = vmax.f32 %v4466_v30, 0.0  ;;  %v4518_v41 = vmax.f32 %v4509_v12, 0.0 }
0x24b8   :  { %v4469_v22 = vpop.f32.mrf.mxu0  ;;  %v4512_v16 = vpop.f32.mrf.mxu1 }
0x24b9   :  { %v4470_v18 = vadd.f32 %v4469_v22, %v4256_v39  ;;  %v4513_v51 = vadd.f32 %v4512_v16, %v4264_v3  ;;  %v4519_v58 = vmax.f32 %v4468_v59, 0.0  ;;  %v4521_v53 = vmax.f32 %v4511_v49, 0.0  ;;  %v5121_v3 = vld [vmem:[%s7469_s21] ss:$0 sm:$0xff] }
0x24bb   :  { %v4520_v8 = vmax.f32 %v4470_v18, 0.0  ;;  %v4522_v21 = vmax.f32 %v4513_v51, 0.0  ;;  %v4523_v57 = vpack.c.bf16 %v4519_v58, %v4515_v56  ;;  %v4525_v43 = vpack.c.bf16 %v4521_v53, %v4517_v23 }
0x24bd   :  { %v4524_v54 = vpack.c.bf16 %v4520_v8, %v4516_v24  ;;  %v4526_v55 = vpack.c.bf16 %v4522_v21, %v4518_v41 }
0x24bf   :  { %4822 = vmatprep.mubr.bf16.mxu0 %v4524_v54  ;;  %4863 = vmatprep.mubr.bf16.mxu1 %v4526_v55 }
0x24c0   :  { %4823 = vmatmul.mubr.bf16.vlgmr.msra.gmra.mxu0 %v4523_v57  ;;  %4864 = vmatmul.mubr.bf16.vlgmr.msra.gmra.mxu1 %v4525_v43 }
0x2580   :  { %v5336_v44 = vpop.f32.mrf.mxu0  ;;  %v5358_v10 = vpop.f32.mrf.mxu1 }
0x2582   :  { %v5337_v13 = vpop.f32.mrf.mxu0  ;;  %v5359_v36 = vpop.f32.mrf.mxu1 }
0x2583   :  { %v5338_v52 = vadd.f32 %v5337_v13, %v5336_v44  ;;  %v5360_v29 = vadd.f32 %v5359_v36, %v5358_v10 }
0x2584   :  { %v5339_v1 = vpop.f32.mrf.mxu0  ;;  %v5361_v38 = vpop.f32.mrf.mxu1 }
0x2585   :  { %v4825_v28 = vadd.f32 %v5338_v52, %v5088_v11 }
0x2586   :  { %v5340_v7 = vpop.f32.mrf.mxu0  ;;  %v5362_v35 = vpop.f32.mrf.mxu1 }
0x2587   :  { %v4866_v33 = vadd.f32 %v5360_v29, %v4825_v28  ;;  %v5341_v34 = vadd.f32 %v5340_v7, %v5339_v1  ;;  %v5363_v45 = vadd.f32 %v5362_v35, %v5361_v38 }
0x2589   :  { %v4828_v37 = vadd.f32 %v5341_v34, %v5088_v11  ;;  %v4874_v62 = vadd.f32 %v4866_v33, %v7422_v32 }
0x258b   :  { %v4869_v46 = vadd.f32 %v5363_v45, %v4828_v37  ;;  %4876 = vadd.xlane.f32.xlu1 %v4874_v62 }
0x258d   :  { %v4875_v14 = vadd.f32 %v4869_v46, %v7424_v40 }
0x258f   :  { %4878 = vadd.xlane.f32.xlu0 %v4875_v14 }
0x2614   :  { %v4877_v9 = vpop.xlane.xlu1 %4876 }
0x2615   :  { %v4880_v48 = vmul.f32 0.0078125, %v4877_v9 }
0x2617   :  { %v4882_v20 = vsub.f32 %v4874_v62, %v4880_v48 }
0x2618   :  { %v4879_v17 = vpop.xlane.xlu0 %4878 }
0x2619   :  { %v4881_v27 = vmul.f32 0.0078125, %v4879_v17  ;;  %v4884_v25 = vmul.f32 %v4882_v20, %v4882_v20 }
0x261b   :  { %v4883_v2 = vsub.f32 %v4875_v14, %v4881_v27  ;;  %4886 = vadd.xlane.f32.xlu1 %v4884_v25 }
0x261d   :  { %v4885_v31 = vmul.f32 %v4883_v2, %v4883_v2 }
0x261f   :  { %4888 = vadd.xlane.f32.xlu0 %v4885_v31 }
0x26a4   :  { %v4887_v5 = vpop.xlane.xlu1 %4886 }
0x26a5   :  { %v4890_v19 = vmul.f32 0.0078125, %v4887_v5 }
0x26a7   :  { %v4892_v47 = vadd.f32 1e-05, %v4890_v19 }
0x26a8   :  { %v4889_v63 = vpop.xlane.xlu0 %4888 }
0x26a9   :  { %6083 = vrsqrt.f32 %v4892_v47  ;;  %v4891_v32 = vmul.f32 0.0078125, %v4889_v63 }
0x26ab   :  { %v4893_v50 = vadd.f32 1e-05, %v4891_v32 }
0x26ad   :  { %6085 = vrsqrt.f32 %v4893_v50 }
0x26b6   :  { %v6084_v40 = vpop.eup %6083 }
0x26b7   :  { %v4896_v39 = vmul.f32 %v6084_v40, %v4882_v20 }
0x26b9   :  { %v4904_v26 = vmul.f32 %v5121_v3, %v4896_v39 }
0x26ba   :  { %v6086_v61 = vpop.eup %6085 }
0x26bb   :  { %v4897_v4 = vmul.f32 %v6086_v61, %v4883_v2  ;;  %v4912_v42 = vadd.f32 %v5122_v0, %v4904_v26 }
0x26bd   :  { %v4905_v60 = vmul.f32 %v5121_v3, %v4897_v4 }
0x26bf   :  { %v4913_v30 = vadd.f32 %v5122_v0, %v4905_v60 }
0x26c1   :  { %v5126_v12 = vpack.c.bf16 %v4913_v30, %v4912_v42 }
0x26c3   :  { %5127 = vst [vmem:[#allocation26] sm:$0xff] %v5126_v12  }
0x26c4   :  { %6400 = shalt.err (!%p6397_p9)
}
0x26c5   :  { %s7495_s30 = sld [smem:[#allocation44_spill]] }
0x26cb   :  { %4929 = dma.vmem_to_hbm [thread:$0]  %s4924_s3, 128, %s7495_s30, [#allocation4], %s6431_s28, %s6431_s28, %s6432_s29  }
0x26cc   :  { %6425 = dma.done.wait [#allocation4], 128  }
0x26cd   :  { %6426 = vsyncadd [#allocation4], 4294967168 }
0x26ce   :  { %4933 = vsyncpa [#allocation3], 1 }
0x26cf   :  { %4934 = vsyncpa [#allocation6], 1 }
0x26d0   :  { %4935 = vsyncpa [#allocation9], 1 }
0x26d1   :  { %4936 = vsyncpa [#allocation12], 1 }
0x26d2   :  { %4937 = vsyncpa [#allocation15], 1 }
0x26d3   :  { %4938 = vsyncpa [#allocation18], 1 }
0x26d4   :  { %4939 = vsyncpa [#allocation21], 1 }
0x26d5   :  { %4940 = vsyncpa [#allocation24], 1 }
0x26d6   :  { %4941 = vsyncpa [#allocation4], 1 }

</bundles_post_ra>
